<compile_context>
chip_gen: v7x
topology: tpu7x:2x2x1
jax: 0.10.0
libtpu: 0.0.40
codegen_flags: <defaults>
</compile_context>

<pallas_src>
import jax
import jax.numpy as jnp
import numpy as np
from jax.experimental import pallas as pl
from jax.experimental.pallas import tpu as pltpu


# ----------------------------------------------------------------------------
# Fused LSTM-stack Pallas kernel (all layers + both directions, one call)
# ----------------------------------------------------------------------------
def _make_lstm_stack_kernel(T, B, H, n_layers, num_dirs):
    """Build the fused kernel for a stacked (bi)LSTM.

    Ref layout (in order):
      x_ref                       : (T*B, E)            time-major, row = t*B + b
      per layer l in [0, n_layers):
        wih_ref[l]                : (In_l, num_dirs*4H) W_ih^T, dirs concat on cols
        whh_ref[l]                : (num_dirs, H, 4H)   W_hh^T per direction
        b_ref[l]                  : (1, num_dirs*4H)    b_ih + b_hh
      hfin_ref                    : (B, num_dirs*H)     final hidden (the output)
      seq_sc (scratch)            : (T*B, num_dirs*H)   inter-layer sequence
      gx_sc  (scratch)            : (T*B, num_dirs*4H)  hoisted x-gate projection
    Gate order is PyTorch's (i, f, g, o).
    """
    GH = 4 * H

    def kernel(*refs):
        x_ref = refs[0]
        layer_refs = refs[1:1 + 3 * n_layers]
        hfin_ref = refs[1 + 3 * n_layers]
        seq_sc = refs[2 + 3 * n_layers]
        gx_sc = refs[3 + 3 * n_layers]

        cur_ref = x_ref                          # layer input, (T*B, In)
        for layer in range(n_layers):
            wih_ref, whh_ref, b_ref = layer_refs[3 * layer:3 * layer + 3]

            # Hoisted input projection for BOTH directions: one big MXU matmul.
            gx_sc[...] = (jnp.dot(cur_ref[...], wih_ref[...],
                                  preferred_element_type=jnp.float32)
                          + b_ref[...])          # (T*B, num_dirs*4H)

            for d in range(num_dirs):
                whh = whh_ref[d]                 # (H, 4H), loaded once per dir
                h = jnp.zeros((B, H), jnp.float32)
                c = jnp.zeros((B, H), jnp.float32)
                time_order = range(T - 1, -1, -1) if d == 1 else range(T)

                # Serial recurrence, fully unrolled (T is small & static):
                # only h @ W_hh and pointwise gate math per step.
                for t in time_order:
                    row = t * B
                    g = (gx_sc[row:row + B, d * GH:(d + 1) * GH]
                         + jnp.dot(h, whh, preferred_element_type=jnp.float32))
                    i_g = jax.nn.sigmoid(g[:, 0 * H:1 * H])
                    f_g = jax.nn.sigmoid(g[:, 1 * H:2 * H])
                    g_g = jnp.tanh(g[:, 2 * H:3 * H])
                    o_g = jax.nn.sigmoid(g[:, 3 * H:4 * H])
                    c = f_g * c + i_g * g_g
                    h = o_g * jnp.tanh(c)
                    if layer < n_layers - 1:
                        # Only non-final layers need the full sequence output.
                        seq_sc[row:row + B, d * H:(d + 1) * H] = h

                if layer == n_layers - 1:
                    # hidden = cat(hidden[-2], hidden[-1]) == [fwd_final, bwd_final]
                    hfin_ref[:, d * H:(d + 1) * H] = h

            cur_ref = seq_sc                     # next layer reads the concat seq

    return kernel


def lstm_stack_pallas(x_flat, layer_params, T, B, H, num_dirs):
    """x_flat: (T*B, E) time-major.  Returns final hidden (B, num_dirs*H)."""
    n_layers = len(layer_params)
    kernel = _make_lstm_stack_kernel(T, B, H, n_layers, num_dirs)
    inputs = [x_flat]
    for lp in layer_params:
        inputs += [lp["wih"], lp["whh"], lp["b"]]
    return pl.pallas_call(
        kernel,
        out_shape=jax.ShapeDtypeStruct((B, num_dirs * H), jnp.float32),
        scratch_shapes=[
            pltpu.VMEM((T * B, num_dirs * H), jnp.float32),      # seq_sc
            pltpu.VMEM((T * B, num_dirs * 4 * H), jnp.float32),  # gx_sc
        ],
        compiler_params=pltpu.CompilerParams(
            vmem_limit_bytes=32 * 1024 * 1024),
    )(*inputs)


# ----------------------------------------------------------------------------
# Parameters (PyTorch nn.LSTM layout, pre-transposed / packed for the kernel)
# ----------------------------------------------------------------------------
def init_params(key, vocab_size, embedding_dim, hidden_dim, n_layers=2,
                bidirectional=True, pad_idx=0):
    num_dirs = 2 if bidirectional else 1
    params = {}
    k_emb, key = jax.random.split(key)
    emb = jax.random.normal(k_emb, (vocab_size, embedding_dim), jnp.float32)
    emb = emb.at[pad_idx].set(0.0)               # padding_idx row is zero
    params["embedding"] = emb

    bound = 1.0 / np.sqrt(hidden_dim)
    layers = []
    for layer in range(n_layers):
        in_size = embedding_dim if layer == 0 else hidden_dim * num_dirs
        wih_dirs, whh_dirs, b_dirs = [], [], []
        for _d in range(num_dirs):
            key, k1, k2, k3, k4 = jax.random.split(key, 5)
            w_ih = jax.random.uniform(k1, (4 * hidden_dim, in_size),
                                      jnp.float32, -bound, bound)
            w_hh = jax.random.uniform(k2, (4 * hidden_dim, hidden_dim),
                                      jnp.float32, -bound, bound)
            b_ih = jax.random.uniform(k3, (4 * hidden_dim,), jnp.float32,
                                      -bound, bound)
            b_hh = jax.random.uniform(k4, (4 * hidden_dim,), jnp.float32,
                                      -bound, bound)
            wih_dirs.append(w_ih.T)              # (In, 4H)
            whh_dirs.append(w_hh.T)              # (H, 4H)
            b_dirs.append(b_ih + b_hh)           # (4H,)
        layers.append({
            "wih": jnp.concatenate(wih_dirs, axis=1),        # (In, num_dirs*4H)
            "whh": jnp.stack(whh_dirs, axis=0),              # (num_dirs, H, 4H)
            "b": jnp.concatenate(b_dirs).reshape(1, -1),     # (1, num_dirs*4H)
        })
    params["lstm"] = layers
    params["n_layers"] = n_layers
    params["num_dirs"] = num_dirs
    params["hidden_dim"] = hidden_dim
    return params


# ----------------------------------------------------------------------------
# Forward (eval-mode semantics of TextEncoder.forward)
# ----------------------------------------------------------------------------
def text_encoder_forward(text, params):
    """text: (B, T) int32 -> hidden: (B, num_dirs*H) float32."""
    B, T = text.shape
    emb = params["embedding"]
    # Embedding lookup as a gather (no one-hot matmul).  dropout: identity (eval).
    embedded = jnp.take(emb, text, axis=0)                   # (B, T, E)
    x_flat = jnp.transpose(embedded, (1, 0, 2)).reshape(T * B, -1)  # row = t*B + b
    hidden = lstm_stack_pallas(x_flat, params["lstm"], T, B,
                               params["hidden_dim"], params["num_dirs"])
    # final dropout: identity in eval mode.
    return hidden


# ----------------------------------------------------------------------------
# Pure-JAX reference (for the correctness check)
# ----------------------------------------------------------------------------
def _ref_dir(x, w_ih_t, w_hh_t, b, reverse):
    T, B, _ = x.shape
    H = w_hh_t.shape[0]
    h = jnp.zeros((B, H), jnp.float32)
    c = jnp.zeros((B, H), jnp.float32)
    out = [None] * T
    order = range(T - 1, -1, -1) if reverse else range(T)
    for t in order:
        g = x[t] @ w_ih_t + h @ w_hh_t + b
        i_g = jax.nn.sigmoid(g[:, :H])
        f_g = jax.nn.sigmoid(g[:, H:2 * H])
        g_g = jnp.tanh(g[:, 2 * H:3 * H])
        o_g = jax.nn.sigmoid(g[:, 3 * H:])
        c = f_g * c + i_g * g_g
        h = o_g * jnp.tanh(c)
        out[t] = h
    return jnp.stack(out), h


def ref_forward(text, params):
    H = params["hidden_dim"]
    nd = params["num_dirs"]
    x = jnp.transpose(params["embedding"][text], (1, 0, 2))   # (T, B, E)
    finals = None
    for lp in params["lstm"]:
        outs, fs = [], []
        for d in range(nd):
            o, h = _ref_dir(x,
                            lp["wih"][:, d * 4 * H:(d + 1) * 4 * H],
                            lp["whh"][d],
                            lp["b"][:, d * 4 * H:(d + 1) * 4 * H],
                            reverse=(d == 1))
            outs.append(o)
            fs.append(h)
        x = jnp.concatenate(outs, axis=-1)
        finals = fs
    return jnp.concatenate(finals, axis=-1)


# ----------------------------------------------------------------------------
if __name__ == "__main__":
    VOCAB, EMB, HID = 50, 32, 32
    B, T = 2, 8

    key = jax.random.PRNGKey(0)
    k_text, k_params = jax.random.split(key)
    params = init_params(k_params, VOCAB, EMB, HID, n_layers=2,
                         bidirectional=True, pad_idx=0)
    text = jax.random.randint(k_text, (B, T), 0, VOCAB, dtype=jnp.int32)

    out = text_encoder_forward(text, params)
    out = jax.block_until_ready(out)
    assert out.shape == (B, 2 * HID), out.shape

    ref = jax.block_until_ready(ref_forward(text, params))
    np.testing.assert_allclose(np.asarray(out), np.asarray(ref),
                               rtol=1e-4, atol=1e-4)
    print("KERNEL_OK")
</pallas_src>

<mosaic_0001>
module attributes {stable_mosaic.version = 11 : i64} {
  func.func @kernel(%arg0: memref<16x32xf32, #tpu.memory_space<vmem>>, %arg1: memref<32x256xf32, #tpu.memory_space<vmem>>, %arg2: memref<2x32x128xf32, #tpu.memory_space<vmem>>, %arg3: memref<1x256xf32, #tpu.memory_space<vmem>>, %arg4: memref<64x256xf32, #tpu.memory_space<vmem>>, %arg5: memref<2x32x128xf32, #tpu.memory_space<vmem>>, %arg6: memref<1x256xf32, #tpu.memory_space<vmem>>, %arg7: memref<2x64xf32, #tpu.memory_space<vmem>>, %arg8: memref<16x64xf32, #tpu.memory_space<vmem>>, %arg9: memref<16x256xf32, #tpu.memory_space<vmem>>) attributes {dimension_semantics = [], scalar_prefetch = 0 : i64, scratch_operands = 2 : i64, tpu.core_type = #tpu.core_type<tc>} {
    %c0 = arith.constant 0 : index
    %c0_0 = arith.constant 0 : index
    %0 = vector.load %arg0[%c0, %c0_0] : memref<16x32xf32, #tpu.memory_space<vmem>>, vector<16x32xf32>
    %c0_1 = arith.constant 0 : index
    %c0_2 = arith.constant 0 : index
    %1 = vector.load %arg1[%c0_1, %c0_2] : memref<32x256xf32, #tpu.memory_space<vmem>>, vector<32x256xf32>
    %cst = arith.constant dense<0.000000e+00> : vector<16x256xf32>
    %2 = tpu.matmul %0, %1, %cst {dimension_numbers = #tpu.dot_dimension_numbers<[1], [0], [0], [1], [0, 0, 1, 1], [], []>} : vector<16x32xf32>, vector<32x256xf32>, vector<16x256xf32> -> vector<16x256xf32>
    %c0_3 = arith.constant 0 : index
    %c0_4 = arith.constant 0 : index
    %3 = vector.load %arg3[%c0_3, %c0_4] : memref<1x256xf32, #tpu.memory_space<vmem>>, vector<1x256xf32>
    %4 = vector.broadcast %3 : vector<1x256xf32> to vector<16x256xf32>
    %5 = arith.addf %2, %4 : vector<16x256xf32>
    %c0_5 = arith.constant 0 : index
    %c0_6 = arith.constant 0 : index
    %6 = vector.load %arg9[%c0_5, %c0_6] : memref<16x256xf32, #tpu.memory_space<vmem>>, vector<16x256xf32>
    tpu.vector_store %arg9[%c0_5, %c0_6], %5 {strides = array<i32>} : memref<16x256xf32, #tpu.memory_space<vmem>>, vector<16x256xf32>,
    %c0_7 = arith.constant 0 : index
    %c0_8 = arith.constant 0 : index
    %c0_9 = arith.constant 0 : index
    %7 = vector.load %arg2[%c0_7, %c0_8, %c0_9] : memref<2x32x128xf32, #tpu.memory_space<vmem>>, vector<1x32x128xf32>
    %8 = vector.shape_cast %7 : vector<1x32x128xf32> to vector<32x128xf32>
    %cst_10 = arith.constant 0.000000e+00 : f32
    %9 = vector.broadcast %cst_10 : f32 to vector<2x32xf32>
    %cst_11 = arith.constant 0.000000e+00 : f32
    %10 = vector.broadcast %cst_11 : f32 to vector<2x32xf32>
    %c0_12 = arith.constant 0 : index
    %c0_13 = arith.constant 0 : index
    %11 = vector.load %arg9[%c0_12, %c0_13] : memref<16x256xf32, #tpu.memory_space<vmem>>, vector<2x128xf32>
    %cst_14 = arith.constant dense<0.000000e+00> : vector<2x128xf32>
    %12 = tpu.matmul %9, %8, %cst_14 {dimension_numbers = #tpu.dot_dimension_numbers<[1], [0], [0], [1], [0, 0, 1, 1], [], []>} : vector<2x32xf32>, vector<32x128xf32>, vector<2x128xf32> -> vector<2x128xf32>
    %13 = arith.addf %11, %12 : vector<2x128xf32>
    %14 = vector.extract_strided_slice %13 {offsets = [0, 0], sizes = [2, 32], strides = [1, 1]} : vector<2x128xf32> to vector<2x32xf32>
    %15 = arith.negf %14 : vector<2x32xf32>
    %16 = math.exp %15 : vector<2x32xf32>
    %cst_15 = arith.constant 1.000000e+00 : f32
    %17 = vector.broadcast %cst_15 : f32 to vector<2x32xf32>
    %18 = arith.addf %17, %16 : vector<2x32xf32>
    %19 = arith.divf %17, %18 : vector<2x32xf32>
    %20 = vector.extract_strided_slice %13 {offsets = [0, 32], sizes = [2, 32], strides = [1, 1]} : vector<2x128xf32> to vector<2x32xf32>
    %21 = arith.negf %20 : vector<2x32xf32>
    %22 = math.exp %21 : vector<2x32xf32>
    %cst_16 = arith.constant 1.000000e+00 : f32
    %23 = vector.broadcast %cst_16 : f32 to vector<2x32xf32>
    %24 = arith.addf %23, %22 : vector<2x32xf32>
    %25 = arith.divf %23, %24 : vector<2x32xf32>
    %26 = vector.extract_strided_slice %13 {offsets = [0, 64], sizes = [2, 32], strides = [1, 1]} : vector<2x128xf32> to vector<2x32xf32>
    %27 = math.tanh %26 : vector<2x32xf32>
    %28 = vector.extract_strided_slice %13 {offsets = [0, 96], sizes = [2, 32], strides = [1, 1]} : vector<2x128xf32> to vector<2x32xf32>
    %29 = arith.negf %28 : vector<2x32xf32>
    %30 = math.exp %29 : vector<2x32xf32>
    %cst_17 = arith.constant 1.000000e+00 : f32
    %31 = vector.broadcast %cst_17 : f32 to vector<2x32xf32>
    %32 = arith.addf %31, %30 : vector<2x32xf32>
    %33 = arith.divf %31, %32 : vector<2x32xf32>
    %34 = arith.mulf %25, %10 : vector<2x32xf32>
    %35 = arith.mulf %19, %27 : vector<2x32xf32>
    %36 = arith.addf %34, %35 : vector<2x32xf32>
    %37 = math.tanh %36 : vector<2x32xf32>
    %38 = arith.mulf %33, %37 : vector<2x32xf32>
    %c0_18 = arith.constant 0 : index
    %c0_19 = arith.constant 0 : index
    %39 = vector.load %arg8[%c0_18, %c0_19] : memref<16x64xf32, #tpu.memory_space<vmem>>, vector<2x32xf32>
    tpu.vector_store %arg8[%c0_18, %c0_19], %38 {strides = array<i32>} : memref<16x64xf32, #tpu.memory_space<vmem>>, vector<2x32xf32>,
    %c2 = arith.constant 2 : index
    %c0_20 = arith.constant 0 : index
    %40 = vector.load %arg9[%c2, %c0_20] : memref<16x256xf32, #tpu.memory_space<vmem>>, vector<2x128xf32>
    %cst_21 = arith.constant dense<0.000000e+00> : vector<2x128xf32>
    %41 = tpu.matmul %38, %8, %cst_21 {dimension_numbers = #tpu.dot_dimension_numbers<[1], [0], [0], [1], [0, 0, 1, 1], [], []>} : vector<2x32xf32>, vector<32x128xf32>, vector<2x128xf32> -> vector<2x128xf32>
    %42 = arith.addf %40, %41 : vector<2x128xf32>
    %43 = vector.extract_strided_slice %42 {offsets = [0, 0], sizes = [2, 32], strides = [1, 1]} : vector<2x128xf32> to vector<2x32xf32>
    %44 = arith.negf %43 : vector<2x32xf32>
    %45 = math.exp %44 : vector<2x32xf32>
    %cst_22 = arith.constant 1.000000e+00 : f32
    %46 = vector.broadcast %cst_22 : f32 to vector<2x32xf32>
    %47 = arith.addf %46, %45 : vector<2x32xf32>
    %48 = arith.divf %46, %47 : vector<2x32xf32>
    %49 = vector.extract_strided_slice %42 {offsets = [0, 32], sizes = [2, 32], strides = [1, 1]} : vector<2x128xf32> to vector<2x32xf32>
    %50 = arith.negf %49 : vector<2x32xf32>
    %51 = math.exp %50 : vector<2x32xf32>
    %cst_23 = arith.constant 1.000000e+00 : f32
    %52 = vector.broadcast %cst_23 : f32 to vector<2x32xf32>
    %53 = arith.addf %52, %51 : vector<2x32xf32>
    %54 = arith.divf %52, %53 : vector<2x32xf32>
    %55 = vector.extract_strided_slice %42 {offsets = [0, 64], sizes = [2, 32], strides = [1, 1]} : vector<2x128xf32> to vector<2x32xf32>
    %56 = math.tanh %55 : vector<2x32xf32>
    %57 = vector.extract_strided_slice %42 {offsets = [0, 96], sizes = [2, 32], strides = [1, 1]} : vector<2x128xf32> to vector<2x32xf32>
    %58 = arith.negf %57 : vector<2x32xf32>
    %59 = math.exp %58 : vector<2x32xf32>
    %cst_24 = arith.constant 1.000000e+00 : f32
    %60 = vector.broadcast %cst_24 : f32 to vector<2x32xf32>
    %61 = arith.addf %60, %59 : vector<2x32xf32>
    %62 = arith.divf %60, %61 : vector<2x32xf32>
    %63 = arith.mulf %54, %36 : vector<2x32xf32>
    %64 = arith.mulf %48, %56 : vector<2x32xf32>
    %65 = arith.addf %63, %64 : vector<2x32xf32>
    %66 = math.tanh %65 : vector<2x32xf32>
    %67 = arith.mulf %62, %66 : vector<2x32xf32>
    %c2_25 = arith.constant 2 : index
    %c0_26 = arith.constant 0 : index
    %68 = vector.load %arg8[%c2_25, %c0_26] : memref<16x64xf32, #tpu.memory_space<vmem>>, vector<2x32xf32>
    tpu.vector_store %arg8[%c2_25, %c0_26], %67 {strides = array<i32>} : memref<16x64xf32, #tpu.memory_space<vmem>>, vector<2x32xf32>,
    %c4 = arith.constant 4 : index
    %c0_27 = arith.constant 0 : index
    %69 = vector.load %arg9[%c4, %c0_27] : memref<16x256xf32, #tpu.memory_space<vmem>>, vector<2x128xf32>
    %cst_28 = arith.constant dense<0.000000e+00> : vector<2x128xf32>
    %70 = tpu.matmul %67, %8, %cst_28 {dimension_numbers = #tpu.dot_dimension_numbers<[1], [0], [0], [1], [0, 0, 1, 1], [], []>} : vector<2x32xf32>, vector<32x128xf32>, vector<2x128xf32> -> vector<2x128xf32>
    %71 = arith.addf %69, %70 : vector<2x128xf32>
    %72 = vector.extract_strided_slice %71 {offsets = [0, 0], sizes = [2, 32], strides = [1, 1]} : vector<2x128xf32> to vector<2x32xf32>
    %73 = arith.negf %72 : vector<2x32xf32>
    %74 = math.exp %73 : vector<2x32xf32>
    %cst_29 = arith.constant 1.000000e+00 : f32
    %75 = vector.broadcast %cst_29 : f32 to vector<2x32xf32>
    %76 = arith.addf %75, %74 : vector<2x32xf32>
    %77 = arith.divf %75, %76 : vector<2x32xf32>
    %78 = vector.extract_strided_slice %71 {offsets = [0, 32], sizes = [2, 32], strides = [1, 1]} : vector<2x128xf32> to vector<2x32xf32>
    %79 = arith.negf %78 : vector<2x32xf32>
    %80 = math.exp %79 : vector<2x32xf32>
    %cst_30 = arith.constant 1.000000e+00 : f32
    %81 = vector.broadcast %cst_30 : f32 to vector<2x32xf32>
    %82 = arith.addf %81, %80 : vector<2x32xf32>
    %83 = arith.divf %81, %82 : vector<2x32xf32>
    %84 = vector.extract_strided_slice %71 {offsets = [0, 64], sizes = [2, 32], strides = [1, 1]} : vector<2x128xf32> to vector<2x32xf32>
    %85 = math.tanh %84 : vector<2x32xf32>
    %86 = vector.extract_strided_slice %71 {offsets = [0, 96], sizes = [2, 32], strides = [1, 1]} : vector<2x128xf32> to vector<2x32xf32>
    %87 = arith.negf %86 : vector<2x32xf32>
    %88 = math.exp %87 : vector<2x32xf32>
    %cst_31 = arith.constant 1.000000e+00 : f32
    %89 = vector.broadcast %cst_31 : f32 to vector<2x32xf32>
    %90 = arith.addf %89, %88 : vector<2x32xf32>
    %91 = arith.divf %89, %90 : vector<2x32xf32>
    %92 = arith.mulf %83, %65 : vector<2x32xf32>
    %93 = arith.mulf %77, %85 : vector<2x32xf32>
    %94 = arith.addf %92, %93 : vector<2x32xf32>
    %95 = math.tanh %94 : vector<2x32xf32>
    %96 = arith.mulf %91, %95 : vector<2x32xf32>
    %c4_32 = arith.constant 4 : index
    %c0_33 = arith.constant 0 : index
    %97 = vector.load %arg8[%c4_32, %c0_33] : memref<16x64xf32, #tpu.memory_space<vmem>>, vector<2x32xf32>
    tpu.vector_store %arg8[%c4_32, %c0_33], %96 {strides = array<i32>} : memref<16x64xf32, #tpu.memory_space<vmem>>, vector<2x32xf32>,
    %c6 = arith.constant 6 : index
    %c0_34 = arith.constant 0 : index
    %98 = vector.load %arg9[%c6, %c0_34] : memref<16x256xf32, #tpu.memory_space<vmem>>, vector<2x128xf32>
    %cst_35 = arith.constant dense<0.000000e+00> : vector<2x128xf32>
    %99 = tpu.matmul %96, %8, %cst_35 {dimension_numbers = #tpu.dot_dimension_numbers<[1], [0], [0], [1], [0, 0, 1, 1], [], []>} : vector<2x32xf32>, vector<32x128xf32>, vector<2x128xf32> -> vector<2x128xf32>
    %100 = arith.addf %98, %99 : vector<2x128xf32>
    %101 = vector.extract_strided_slice %100 {offsets = [0, 0], sizes = [2, 32], strides = [1, 1]} : vector<2x128xf32> to vector<2x32xf32>
    %102 = arith.negf %101 : vector<2x32xf32>
    %103 = math.exp %102 : vector<2x32xf32>
    %cst_36 = arith.constant 1.000000e+00 : f32
    %104 = vector.broadcast %cst_36 : f32 to vector<2x32xf32>
    %105 = arith.addf %104, %103 : vector<2x32xf32>
    %106 = arith.divf %104, %105 : vector<2x32xf32>
    %107 = vector.extract_strided_slice %100 {offsets = [0, 32], sizes = [2, 32], strides = [1, 1]} : vector<2x128xf32> to vector<2x32xf32>
    %108 = arith.negf %107 : vector<2x32xf32>
    %109 = math.exp %108 : vector<2x32xf32>
    %cst_37 = arith.constant 1.000000e+00 : f32
    %110 = vector.broadcast %cst_37 : f32 to vector<2x32xf32>
    %111 = arith.addf %110, %109 : vector<2x32xf32>
    %112 = arith.divf %110, %111 : vector<2x32xf32>
    %113 = vector.extract_strided_slice %100 {offsets = [0, 64], sizes = [2, 32], strides = [1, 1]} : vector<2x128xf32> to vector<2x32xf32>
    %114 = math.tanh %113 : vector<2x32xf32>
    %115 = vector.extract_strided_slice %100 {offsets = [0, 96], sizes = [2, 32], strides = [1, 1]} : vector<2x128xf32> to vector<2x32xf32>
    %116 = arith.negf %115 : vector<2x32xf32>
    %117 = math.exp %116 : vector<2x32xf32>
    %cst_38 = arith.constant 1.000000e+00 : f32
    %118 = vector.broadcast %cst_38 : f32 to vector<2x32xf32>
    %119 = arith.addf %118, %117 : vector<2x32xf32>
    %120 = arith.divf %118, %119 : vector<2x32xf32>
    %121 = arith.mulf %112, %94 : vector<2x32xf32>
    %122 = arith.mulf %106, %114 : vector<2x32xf32>
    %123 = arith.addf %121, %122 : vector<2x32xf32>
    %124 = math.tanh %123 : vector<2x32xf32>
    %125 = arith.mulf %120, %124 : vector<2x32xf32>
    %c6_39 = arith.constant 6 : index
    %c0_40 = arith.constant 0 : index
    %126 = vector.load %arg8[%c6_39, %c0_40] : memref<16x64xf32, #tpu.memory_space<vmem>>, vector<2x32xf32>
    tpu.vector_store %arg8[%c6_39, %c0_40], %125 {strides = array<i32>} : memref<16x64xf32, #tpu.memory_space<vmem>>, vector<2x32xf32>,
    %c8 = arith.constant 8 : index
    %c0_41 = arith.constant 0 : index
    %127 = vector.load %arg9[%c8, %c0_41] : memref<16x256xf32, #tpu.memory_space<vmem>>, vector<2x128xf32>
    %cst_42 = arith.constant dense<0.000000e+00> : vector<2x128xf32>
    %128 = tpu.matmul %125, %8, %cst_42 {dimension_numbers = #tpu.dot_dimension_numbers<[1], [0], [0], [1], [0, 0, 1, 1], [], []>} : vector<2x32xf32>, vector<32x128xf32>, vector<2x128xf32> -> vector<2x128xf32>
    %129 = arith.addf %127, %128 : vector<2x128xf32>
    %130 = vector.extract_strided_slice %129 {offsets = [0, 0], sizes = [2, 32], strides = [1, 1]} : vector<2x128xf32> to vector<2x32xf32>
    %131 = arith.negf %130 : vector<2x32xf32>
    %132 = math.exp %131 : vector<2x32xf32>
    %cst_43 = arith.constant 1.000000e+00 : f32
    %133 = vector.broadcast %cst_43 : f32 to vector<2x32xf32>
    %134 = arith.addf %133, %132 : vector<2x32xf32>
    %135 = arith.divf %133, %134 : vector<2x32xf32>
    %136 = vector.extract_strided_slice %129 {offsets = [0, 32], sizes = [2, 32], strides = [1, 1]} : vector<2x128xf32> to vector<2x32xf32>
    %137 = arith.negf %136 : vector<2x32xf32>
    %138 = math.exp %137 : vector<2x32xf32>
    %cst_44 = arith.constant 1.000000e+00 : f32
    %139 = vector.broadcast %cst_44 : f32 to vector<2x32xf32>
    %140 = arith.addf %139, %138 : vector<2x32xf32>
    %141 = arith.divf %139, %140 : vector<2x32xf32>
    %142 = vector.extract_strided_slice %129 {offsets = [0, 64], sizes = [2, 32], strides = [1, 1]} : vector<2x128xf32> to vector<2x32xf32>
    %143 = math.tanh %142 : vector<2x32xf32>
    %144 = vector.extract_strided_slice %129 {offsets = [0, 96], sizes = [2, 32], strides = [1, 1]} : vector<2x128xf32> to vector<2x32xf32>
    %145 = arith.negf %144 : vector<2x32xf32>
    %146 = math.exp %145 : vector<2x32xf32>
    %cst_45 = arith.constant 1.000000e+00 : f32
    %147 = vector.broadcast %cst_45 : f32 to vector<2x32xf32>
    %148 = arith.addf %147, %146 : vector<2x32xf32>
    %149 = arith.divf %147, %148 : vector<2x32xf32>
    %150 = arith.mulf %141, %123 : vector<2x32xf32>
    %151 = arith.mulf %135, %143 : vector<2x32xf32>
    %152 = arith.addf %150, %151 : vector<2x32xf32>
    %153 = math.tanh %152 : vector<2x32xf32>
    %154 = arith.mulf %149, %153 : vector<2x32xf32>
    %c8_46 = arith.constant 8 : index
    %c0_47 = arith.constant 0 : index
    %155 = vector.load %arg8[%c8_46, %c0_47] : memref<16x64xf32, #tpu.memory_space<vmem>>, vector<2x32xf32>
    tpu.vector_store %arg8[%c8_46, %c0_47], %154 {strides = array<i32>} : memref<16x64xf32, #tpu.memory_space<vmem>>, vector<2x32xf32>,
    %c10 = arith.constant 10 : index
    %c0_48 = arith.constant 0 : index
    %156 = vector.load %arg9[%c10, %c0_48] : memref<16x256xf32, #tpu.memory_space<vmem>>, vector<2x128xf32>
    %cst_49 = arith.constant dense<0.000000e+00> : vector<2x128xf32>
    %157 = tpu.matmul %154, %8, %cst_49 {dimension_numbers = #tpu.dot_dimension_numbers<[1], [0], [0], [1], [0, 0, 1, 1], [], []>} : vector<2x32xf32>, vector<32x128xf32>, vector<2x128xf32> -> vector<2x128xf32>
    %158 = arith.addf %156, %157 : vector<2x128xf32>
    %159 = vector.extract_strided_slice %158 {offsets = [0, 0], sizes = [2, 32], strides = [1, 1]} : vector<2x128xf32> to vector<2x32xf32>
    %160 = arith.negf %159 : vector<2x32xf32>
    %161 = math.exp %160 : vector<2x32xf32>
    %cst_50 = arith.constant 1.000000e+00 : f32
    %162 = vector.broadcast %cst_50 : f32 to vector<2x32xf32>
    %163 = arith.addf %162, %161 : vector<2x32xf32>
    %164 = arith.divf %162, %163 : vector<2x32xf32>
    %165 = vector.extract_strided_slice %158 {offsets = [0, 32], sizes = [2, 32], strides = [1, 1]} : vector<2x128xf32> to vector<2x32xf32>
    %166 = arith.negf %165 : vector<2x32xf32>
    %167 = math.exp %166 : vector<2x32xf32>
    %cst_51 = arith.constant 1.000000e+00 : f32
    %168 = vector.broadcast %cst_51 : f32 to vector<2x32xf32>
    %169 = arith.addf %168, %167 : vector<2x32xf32>
    %170 = arith.divf %168, %169 : vector<2x32xf32>
    %171 = vector.extract_strided_slice %158 {offsets = [0, 64], sizes = [2, 32], strides = [1, 1]} : vector<2x128xf32> to vector<2x32xf32>
    %172 = math.tanh %171 : vector<2x32xf32>
    %173 = vector.extract_strided_slice %158 {offsets = [0, 96], sizes = [2, 32], strides = [1, 1]} : vector<2x128xf32> to vector<2x32xf32>
    %174 = arith.negf %173 : vector<2x32xf32>
    %175 = math.exp %174 : vector<2x32xf32>
    %cst_52 = arith.constant 1.000000e+00 : f32
    %176 = vector.broadcast %cst_52 : f32 to vector<2x32xf32>
    %177 = arith.addf %176, %175 : vector<2x32xf32>
    %178 = arith.divf %176, %177 : vector<2x32xf32>
    %179 = arith.mulf %170, %152 : vector<2x32xf32>
    %180 = arith.mulf %164, %172 : vector<2x32xf32>
    %181 = arith.addf %179, %180 : vector<2x32xf32>
    %182 = math.tanh %181 : vector<2x32xf32>
    %183 = arith.mulf %178, %182 : vector<2x32xf32>
    %c10_53 = arith.constant 10 : index
    %c0_54 = arith.constant 0 : index
    %184 = vector.load %arg8[%c10_53, %c0_54] : memref<16x64xf32, #tpu.memory_space<vmem>>, vector<2x32xf32>
    tpu.vector_store %arg8[%c10_53, %c0_54], %183 {strides = array<i32>} : memref<16x64xf32, #tpu.memory_space<vmem>>, vector<2x32xf32>,
    %c12 = arith.constant 12 : index
    %c0_55 = arith.constant 0 : index
    %185 = vector.load %arg9[%c12, %c0_55] : memref<16x256xf32, #tpu.memory_space<vmem>>, vector<2x128xf32>
    %cst_56 = arith.constant dense<0.000000e+00> : vector<2x128xf32>
    %186 = tpu.matmul %183, %8, %cst_56 {dimension_numbers = #tpu.dot_dimension_numbers<[1], [0], [0], [1], [0, 0, 1, 1], [], []>} : vector<2x32xf32>, vector<32x128xf32>, vector<2x128xf32> -> vector<2x128xf32>
    %187 = arith.addf %185, %186 : vector<2x128xf32>
    %188 = vector.extract_strided_slice %187 {offsets = [0, 0], sizes = [2, 32], strides = [1, 1]} : vector<2x128xf32> to vector<2x32xf32>
    %189 = arith.negf %188 : vector<2x32xf32>
    %190 = math.exp %189 : vector<2x32xf32>
    %cst_57 = arith.constant 1.000000e+00 : f32
    %191 = vector.broadcast %cst_57 : f32 to vector<2x32xf32>
    %192 = arith.addf %191, %190 : vector<2x32xf32>
    %193 = arith.divf %191, %192 : vector<2x32xf32>
    %194 = vector.extract_strided_slice %187 {offsets = [0, 32], sizes = [2, 32], strides = [1, 1]} : vector<2x128xf32> to vector<2x32xf32>
    %195 = arith.negf %194 : vector<2x32xf32>
    %196 = math.exp %195 : vector<2x32xf32>
    %cst_58 = arith.constant 1.000000e+00 : f32
    %197 = vector.broadcast %cst_58 : f32 to vector<2x32xf32>
    %198 = arith.addf %197, %196 : vector<2x32xf32>
    %199 = arith.divf %197, %198 : vector<2x32xf32>
    %200 = vector.extract_strided_slice %187 {offsets = [0, 64], sizes = [2, 32], strides = [1, 1]} : vector<2x128xf32> to vector<2x32xf32>
    %201 = math.tanh %200 : vector<2x32xf32>
    %202 = vector.extract_strided_slice %187 {offsets = [0, 96], sizes = [2, 32], strides = [1, 1]} : vector<2x128xf32> to vector<2x32xf32>
    %203 = arith.negf %202 : vector<2x32xf32>
    %204 = math.exp %203 : vector<2x32xf32>
    %cst_59 = arith.constant 1.000000e+00 : f32
    %205 = vector.broadcast %cst_59 : f32 to vector<2x32xf32>
    %206 = arith.addf %205, %204 : vector<2x32xf32>
    %207 = arith.divf %205, %206 : vector<2x32xf32>
    %208 = arith.mulf %199, %181 : vector<2x32xf32>
    %209 = arith.mulf %193, %201 : vector<2x32xf32>
    %210 = arith.addf %208, %209 : vector<2x32xf32>
    %211 = math.tanh %210 : vector<2x32xf32>
    %212 = arith.mulf %207, %211 : vector<2x32xf32>
    %c12_60 = arith.constant 12 : index
    %c0_61 = arith.constant 0 : index
    %213 = vector.load %arg8[%c12_60, %c0_61] : memref<16x64xf32, #tpu.memory_space<vmem>>, vector<2x32xf32>
    tpu.vector_store %arg8[%c12_60, %c0_61], %212 {strides = array<i32>} : memref<16x64xf32, #tpu.memory_space<vmem>>, vector<2x32xf32>,
    %c14 = arith.constant 14 : index
    %c0_62 = arith.constant 0 : index
    %214 = vector.load %arg9[%c14, %c0_62] : memref<16x256xf32, #tpu.memory_space<vmem>>, vector<2x128xf32>
    %cst_63 = arith.constant dense<0.000000e+00> : vector<2x128xf32>
    %215 = tpu.matmul %212, %8, %cst_63 {dimension_numbers = #tpu.dot_dimension_numbers<[1], [0], [0], [1], [0, 0, 1, 1], [], []>} : vector<2x32xf32>, vector<32x128xf32>, vector<2x128xf32> -> vector<2x128xf32>
    %216 = arith.addf %214, %215 : vector<2x128xf32>
    %217 = vector.extract_strided_slice %216 {offsets = [0, 0], sizes = [2, 32], strides = [1, 1]} : vector<2x128xf32> to vector<2x32xf32>
    %218 = arith.negf %217 : vector<2x32xf32>
    %219 = math.exp %218 : vector<2x32xf32>
    %cst_64 = arith.constant 1.000000e+00 : f32
    %220 = vector.broadcast %cst_64 : f32 to vector<2x32xf32>
    %221 = arith.addf %220, %219 : vector<2x32xf32>
    %222 = arith.divf %220, %221 : vector<2x32xf32>
    %223 = vector.extract_strided_slice %216 {offsets = [0, 32], sizes = [2, 32], strides = [1, 1]} : vector<2x128xf32> to vector<2x32xf32>
    %224 = arith.negf %223 : vector<2x32xf32>
    %225 = math.exp %224 : vector<2x32xf32>
    %cst_65 = arith.constant 1.000000e+00 : f32
    %226 = vector.broadcast %cst_65 : f32 to vector<2x32xf32>
    %227 = arith.addf %226, %225 : vector<2x32xf32>
    %228 = arith.divf %226, %227 : vector<2x32xf32>
    %229 = vector.extract_strided_slice %216 {offsets = [0, 64], sizes = [2, 32], strides = [1, 1]} : vector<2x128xf32> to vector<2x32xf32>
    %230 = math.tanh %229 : vector<2x32xf32>
    %231 = vector.extract_strided_slice %216 {offsets = [0, 96], sizes = [2, 32], strides = [1, 1]} : vector<2x128xf32> to vector<2x32xf32>
    %232 = arith.negf %231 : vector<2x32xf32>
    %233 = math.exp %232 : vector<2x32xf32>
    %cst_66 = arith.constant 1.000000e+00 : f32
    %234 = vector.broadcast %cst_66 : f32 to vector<2x32xf32>
    %235 = arith.addf %234, %233 : vector<2x32xf32>
    %236 = arith.divf %234, %235 : vector<2x32xf32>
    %237 = arith.mulf %228, %210 : vector<2x32xf32>
    %238 = arith.mulf %222, %230 : vector<2x32xf32>
    %239 = arith.addf %237, %238 : vector<2x32xf32>
    %240 = math.tanh %239 : vector<2x32xf32>
    %241 = arith.mulf %236, %240 : vector<2x32xf32>
    %c14_67 = arith.constant 14 : index
    %c0_68 = arith.constant 0 : index
    %242 = vector.load %arg8[%c14_67, %c0_68] : memref<16x64xf32, #tpu.memory_space<vmem>>, vector<2x32xf32>
    tpu.vector_store %arg8[%c14_67, %c0_68], %241 {strides = array<i32>} : memref<16x64xf32, #tpu.memory_space<vmem>>, vector<2x32xf32>,
    %c1 = arith.constant 1 : index
    %c0_69 = arith.constant 0 : index
    %c0_70 = arith.constant 0 : index
    %243 = vector.load %arg2[%c1, %c0_69, %c0_70] : memref<2x32x128xf32, #tpu.memory_space<vmem>>, vector<1x32x128xf32>
    %244 = vector.shape_cast %243 : vector<1x32x128xf32> to vector<32x128xf32>
    %cst_71 = arith.constant 0.000000e+00 : f32
    %245 = vector.broadcast %cst_71 : f32 to vector<2x32xf32>
    %cst_72 = arith.constant 0.000000e+00 : f32
    %246 = vector.broadcast %cst_72 : f32 to vector<2x32xf32>
    %c14_73 = arith.constant 14 : index
    %c128 = arith.constant 128 : index
    %247 = vector.load %arg9[%c14_73, %c128] : memref<16x256xf32, #tpu.memory_space<vmem>>, vector<2x128xf32>
    %cst_74 = arith.constant dense<0.000000e+00> : vector<2x128xf32>
    %248 = tpu.matmul %245, %244, %cst_74 {dimension_numbers = #tpu.dot_dimension_numbers<[1], [0], [0], [1], [0, 0, 1, 1], [], []>} : vector<2x32xf32>, vector<32x128xf32>, vector<2x128xf32> -> vector<2x128xf32>
    %249 = arith.addf %247, %248 : vector<2x128xf32>
    %250 = vector.extract_strided_slice %249 {offsets = [0, 0], sizes = [2, 32], strides = [1, 1]} : vector<2x128xf32> to vector<2x32xf32>
    %251 = arith.negf %250 : vector<2x32xf32>
    %252 = math.exp %251 : vector<2x32xf32>
    %cst_75 = arith.constant 1.000000e+00 : f32
    %253 = vector.broadcast %cst_75 : f32 to vector<2x32xf32>
    %254 = arith.addf %253, %252 : vector<2x32xf32>
    %255 = arith.divf %253, %254 : vector<2x32xf32>
    %256 = vector.extract_strided_slice %249 {offsets = [0, 32], sizes = [2, 32], strides = [1, 1]} : vector<2x128xf32> to vector<2x32xf32>
    %257 = arith.negf %256 : vector<2x32xf32>
    %258 = math.exp %257 : vector<2x32xf32>
    %cst_76 = arith.constant 1.000000e+00 : f32
    %259 = vector.broadcast %cst_76 : f32 to vector<2x32xf32>
    %260 = arith.addf %259, %258 : vector<2x32xf32>
    %261 = arith.divf %259, %260 : vector<2x32xf32>
    %262 = vector.extract_strided_slice %249 {offsets = [0, 64], sizes = [2, 32], strides = [1, 1]} : vector<2x128xf32> to vector<2x32xf32>
    %263 = math.tanh %262 : vector<2x32xf32>
    %264 = vector.extract_strided_slice %249 {offsets = [0, 96], sizes = [2, 32], strides = [1, 1]} : vector<2x128xf32> to vector<2x32xf32>
    %265 = arith.negf %264 : vector<2x32xf32>
    %266 = math.exp %265 : vector<2x32xf32>
    %cst_77 = arith.constant 1.000000e+00 : f32
    %267 = vector.broadcast %cst_77 : f32 to vector<2x32xf32>
    %268 = arith.addf %267, %266 : vector<2x32xf32>
    %269 = arith.divf %267, %268 : vector<2x32xf32>
    %270 = arith.mulf %261, %246 : vector<2x32xf32>
    %271 = arith.mulf %255, %263 : vector<2x32xf32>
    %272 = arith.addf %270, %271 : vector<2x32xf32>
    %273 = math.tanh %272 : vector<2x32xf32>
    %274 = arith.mulf %269, %273 : vector<2x32xf32>
    %c14_78 = arith.constant 14 : index
    %c32 = arith.constant 32 : index
    %275 = vector.load %arg8[%c14_78, %c32] : memref<16x64xf32, #tpu.memory_space<vmem>>, vector<2x32xf32>
    tpu.vector_store %arg8[%c14_78, %c32], %274 {strides = array<i32>} : memref<16x64xf32, #tpu.memory_space<vmem>>, vector<2x32xf32>,
    %c12_79 = arith.constant 12 : index
    %c128_80 = arith.constant 128 : index
    %276 = vector.load %arg9[%c12_79, %c128_80] : memref<16x256xf32, #tpu.memory_space<vmem>>, vector<2x128xf32>
    %cst_81 = arith.constant dense<0.000000e+00> : vector<2x128xf32>
    %277 = tpu.matmul %274, %244, %cst_81 {dimension_numbers = #tpu.dot_dimension_numbers<[1], [0], [0], [1], [0, 0, 1, 1], [], []>} : vector<2x32xf32>, vector<32x128xf32>, vector<2x128xf32> -> vector<2x128xf32>
    %278 = arith.addf %276, %277 : vector<2x128xf32>
    %279 = vector.extract_strided_slice %278 {offsets = [0, 0], sizes = [2, 32], strides = [1, 1]} : vector<2x128xf32> to vector<2x32xf32>
    %280 = arith.negf %279 : vector<2x32xf32>
    %281 = math.exp %280 : vector<2x32xf32>
    %cst_82 = arith.constant 1.000000e+00 : f32
    %282 = vector.broadcast %cst_82 : f32 to vector<2x32xf32>
    %283 = arith.addf %282, %281 : vector<2x32xf32>
    %284 = arith.divf %282, %283 : vector<2x32xf32>
    %285 = vector.extract_strided_slice %278 {offsets = [0, 32], sizes = [2, 32], strides = [1, 1]} : vector<2x128xf32> to vector<2x32xf32>
    %286 = arith.negf %285 : vector<2x32xf32>
    %287 = math.exp %286 : vector<2x32xf32>
    %cst_83 = arith.constant 1.000000e+00 : f32
    %288 = vector.broadcast %cst_83 : f32 to vector<2x32xf32>
    %289 = arith.addf %288, %287 : vector<2x32xf32>
    %290 = arith.divf %288, %289 : vector<2x32xf32>
    %291 = vector.extract_strided_slice %278 {offsets = [0, 64], sizes = [2, 32], strides = [1, 1]} : vector<2x128xf32> to vector<2x32xf32>
    %292 = math.tanh %291 : vector<2x32xf32>
    %293 = vector.extract_strided_slice %278 {offsets = [0, 96], sizes = [2, 32], strides = [1, 1]} : vector<2x128xf32> to vector<2x32xf32>
    %294 = arith.negf %293 : vector<2x32xf32>
    %295 = math.exp %294 : vector<2x32xf32>
    %cst_84 = arith.constant 1.000000e+00 : f32
    %296 = vector.broadcast %cst_84 : f32 to vector<2x32xf32>
    %297 = arith.addf %296, %295 : vector<2x32xf32>
    %298 = arith.divf %296, %297 : vector<2x32xf32>
    %299 = arith.mulf %290, %272 : vector<2x32xf32>
    %300 = arith.mulf %284, %292 : vector<2x32xf32>
    %301 = arith.addf %299, %300 : vector<2x32xf32>
    %302 = math.tanh %301 : vector<2x32xf32>
    %303 = arith.mulf %298, %302 : vector<2x32xf32>
    %c12_85 = arith.constant 12 : index
    %c32_86 = arith.constant 32 : index
    %304 = vector.load %arg8[%c12_85, %c32_86] : memref<16x64xf32, #tpu.memory_space<vmem>>, vector<2x32xf32>
    tpu.vector_store %arg8[%c12_85, %c32_86], %303 {strides = array<i32>} : memref<16x64xf32, #tpu.memory_space<vmem>>, vector<2x32xf32>,
    %c10_87 = arith.constant 10 : index
    %c128_88 = arith.constant 128 : index
    %305 = vector.load %arg9[%c10_87, %c128_88] : memref<16x256xf32, #tpu.memory_space<vmem>>, vector<2x128xf32>
    %cst_89 = arith.constant dense<0.000000e+00> : vector<2x128xf32>
    %306 = tpu.matmul %303, %244, %cst_89 {dimension_numbers = #tpu.dot_dimension_numbers<[1], [0], [0], [1], [0, 0, 1, 1], [], []>} : vector<2x32xf32>, vector<32x128xf32>, vector<2x128xf32> -> vector<2x128xf32>
    %307 = arith.addf %305, %306 : vector<2x128xf32>
    %308 = vector.extract_strided_slice %307 {offsets = [0, 0], sizes = [2, 32], strides = [1, 1]} : vector<2x128xf32> to vector<2x32xf32>
    %309 = arith.negf %308 : vector<2x32xf32>
    %310 = math.exp %309 : vector<2x32xf32>
    %cst_90 = arith.constant 1.000000e+00 : f32
    %311 = vector.broadcast %cst_90 : f32 to vector<2x32xf32>
    %312 = arith.addf %311, %310 : vector<2x32xf32>
    %313 = arith.divf %311, %312 : vector<2x32xf32>
    %314 = vector.extract_strided_slice %307 {offsets = [0, 32], sizes = [2, 32], strides = [1, 1]} : vector<2x128xf32> to vector<2x32xf32>
    %315 = arith.negf %314 : vector<2x32xf32>
    %316 = math.exp %315 : vector<2x32xf32>
    %cst_91 = arith.constant 1.000000e+00 : f32
    %317 = vector.broadcast %cst_91 : f32 to vector<2x32xf32>
    %318 = arith.addf %317, %316 : vector<2x32xf32>
    %319 = arith.divf %317, %318 : vector<2x32xf32>
    %320 = vector.extract_strided_slice %307 {offsets = [0, 64], sizes = [2, 32], strides = [1, 1]} : vector<2x128xf32> to vector<2x32xf32>
    %321 = math.tanh %320 : vector<2x32xf32>
    %322 = vector.extract_strided_slice %307 {offsets = [0, 96], sizes = [2, 32], strides = [1, 1]} : vector<2x128xf32> to vector<2x32xf32>
    %323 = arith.negf %322 : vector<2x32xf32>
    %324 = math.exp %323 : vector<2x32xf32>
    %cst_92 = arith.constant 1.000000e+00 : f32
    %325 = vector.broadcast %cst_92 : f32 to vector<2x32xf32>
    %326 = arith.addf %325, %324 : vector<2x32xf32>
    %327 = arith.divf %325, %326 : vector<2x32xf32>
    %328 = arith.mulf %319, %301 : vector<2x32xf32>
    %329 = arith.mulf %313, %321 : vector<2x32xf32>
    %330 = arith.addf %328, %329 : vector<2x32xf32>
    %331 = math.tanh %330 : vector<2x32xf32>
    %332 = arith.mulf %327, %331 : vector<2x32xf32>
    %c10_93 = arith.constant 10 : index
    %c32_94 = arith.constant 32 : index
    %333 = vector.load %arg8[%c10_93, %c32_94] : memref<16x64xf32, #tpu.memory_space<vmem>>, vector<2x32xf32>
    tpu.vector_store %arg8[%c10_93, %c32_94], %332 {strides = array<i32>} : memref<16x64xf32, #tpu.memory_space<vmem>>, vector<2x32xf32>,
    %c8_95 = arith.constant 8 : index
    %c128_96 = arith.constant 128 : index
    %334 = vector.load %arg9[%c8_95, %c128_96] : memref<16x256xf32, #tpu.memory_space<vmem>>, vector<2x128xf32>
    %cst_97 = arith.constant dense<0.000000e+00> : vector<2x128xf32>
    %335 = tpu.matmul %332, %244, %cst_97 {dimension_numbers = #tpu.dot_dimension_numbers<[1], [0], [0], [1], [0, 0, 1, 1], [], []>} : vector<2x32xf32>, vector<32x128xf32>, vector<2x128xf32> -> vector<2x128xf32>
    %336 = arith.addf %334, %335 : vector<2x128xf32>
    %337 = vector.extract_strided_slice %336 {offsets = [0, 0], sizes = [2, 32], strides = [1, 1]} : vector<2x128xf32> to vector<2x32xf32>
    %338 = arith.negf %337 : vector<2x32xf32>
    %339 = math.exp %338 : vector<2x32xf32>
    %cst_98 = arith.constant 1.000000e+00 : f32
    %340 = vector.broadcast %cst_98 : f32 to vector<2x32xf32>
    %341 = arith.addf %340, %339 : vector<2x32xf32>
    %342 = arith.divf %340, %341 : vector<2x32xf32>
    %343 = vector.extract_strided_slice %336 {offsets = [0, 32], sizes = [2, 32], strides = [1, 1]} : vector<2x128xf32> to vector<2x32xf32>
    %344 = arith.negf %343 : vector<2x32xf32>
    %345 = math.exp %344 : vector<2x32xf32>
    %cst_99 = arith.constant 1.000000e+00 : f32
    %346 = vector.broadcast %cst_99 : f32 to vector<2x32xf32>
    %347 = arith.addf %346, %345 : vector<2x32xf32>
    %348 = arith.divf %346, %347 : vector<2x32xf32>
    %349 = vector.extract_strided_slice %336 {offsets = [0, 64], sizes = [2, 32], strides = [1, 1]} : vector<2x128xf32> to vector<2x32xf32>
    %350 = math.tanh %349 : vector<2x32xf32>
    %351 = vector.extract_strided_slice %336 {offsets = [0, 96], sizes = [2, 32], strides = [1, 1]} : vector<2x128xf32> to vector<2x32xf32>
    %352 = arith.negf %351 : vector<2x32xf32>
    %353 = math.exp %352 : vector<2x32xf32>
    %cst_100 = arith.constant 1.000000e+00 : f32
    %354 = vector.broadcast %cst_100 : f32 to vector<2x32xf32>
    %355 = arith.addf %354, %353 : vector<2x32xf32>
    %356 = arith.divf %354, %355 : vector<2x32xf32>
    %357 = arith.mulf %348, %330 : vector<2x32xf32>
    %358 = arith.mulf %342, %350 : vector<2x32xf32>
    %359 = arith.addf %357, %358 : vector<2x32xf32>
    %360 = math.tanh %359 : vector<2x32xf32>
    %361 = arith.mulf %356, %360 : vector<2x32xf32>
    %c8_101 = arith.constant 8 : index
    %c32_102 = arith.constant 32 : index
    %362 = vector.load %arg8[%c8_101, %c32_102] : memref<16x64xf32, #tpu.memory_space<vmem>>, vector<2x32xf32>
    tpu.vector_store %arg8[%c8_101, %c32_102], %361 {strides = array<i32>} : memref<16x64xf32, #tpu.memory_space<vmem>>, vector<2x32xf32>,
    %c6_103 = arith.constant 6 : index
    %c128_104 = arith.constant 128 : index
    %363 = vector.load %arg9[%c6_103, %c128_104] : memref<16x256xf32, #tpu.memory_space<vmem>>, vector<2x128xf32>
    %cst_105 = arith.constant dense<0.000000e+00> : vector<2x128xf32>
    %364 = tpu.matmul %361, %244, %cst_105 {dimension_numbers = #tpu.dot_dimension_numbers<[1], [0], [0], [1], [0, 0, 1, 1], [], []>} : vector<2x32xf32>, vector<32x128xf32>, vector<2x128xf32> -> vector<2x128xf32>
    %365 = arith.addf %363, %364 : vector<2x128xf32>
    %366 = vector.extract_strided_slice %365 {offsets = [0, 0], sizes = [2, 32], strides = [1, 1]} : vector<2x128xf32> to vector<2x32xf32>
    %367 = arith.negf %366 : vector<2x32xf32>
    %368 = math.exp %367 : vector<2x32xf32>
    %cst_106 = arith.constant 1.000000e+00 : f32
    %369 = vector.broadcast %cst_106 : f32 to vector<2x32xf32>
    %370 = arith.addf %369, %368 : vector<2x32xf32>
    %371 = arith.divf %369, %370 : vector<2x32xf32>
    %372 = vector.extract_strided_slice %365 {offsets = [0, 32], sizes = [2, 32], strides = [1, 1]} : vector<2x128xf32> to vector<2x32xf32>
    %373 = arith.negf %372 : vector<2x32xf32>
    %374 = math.exp %373 : vector<2x32xf32>
    %cst_107 = arith.constant 1.000000e+00 : f32
    %375 = vector.broadcast %cst_107 : f32 to vector<2x32xf32>
    %376 = arith.addf %375, %374 : vector<2x32xf32>
    %377 = arith.divf %375, %376 : vector<2x32xf32>
    %378 = vector.extract_strided_slice %365 {offsets = [0, 64], sizes = [2, 32], strides = [1, 1]} : vector<2x128xf32> to vector<2x32xf32>
    %379 = math.tanh %378 : vector<2x32xf32>
    %380 = vector.extract_strided_slice %365 {offsets = [0, 96], sizes = [2, 32], strides = [1, 1]} : vector<2x128xf32> to vector<2x32xf32>
    %381 = arith.negf %380 : vector<2x32xf32>
    %382 = math.exp %381 : vector<2x32xf32>
    %cst_108 = arith.constant 1.000000e+00 : f32
    %383 = vector.broadcast %cst_108 : f32 to vector<2x32xf32>
    %384 = arith.addf %383, %382 : vector<2x32xf32>
    %385 = arith.divf %383, %384 : vector<2x32xf32>
    %386 = arith.mulf %377, %359 : vector<2x32xf32>
    %387 = arith.mulf %371, %379 : vector<2x32xf32>
    %388 = arith.addf %386, %387 : vector<2x32xf32>
    %389 = math.tanh %388 : vector<2x32xf32>
    %390 = arith.mulf %385, %389 : vector<2x32xf32>
    %c6_109 = arith.constant 6 : index
    %c32_110 = arith.constant 32 : index
    %391 = vector.load %arg8[%c6_109, %c32_110] : memref<16x64xf32, #tpu.memory_space<vmem>>, vector<2x32xf32>
    tpu.vector_store %arg8[%c6_109, %c32_110], %390 {strides = array<i32>} : memref<16x64xf32, #tpu.memory_space<vmem>>, vector<2x32xf32>,
    %c4_111 = arith.constant 4 : index
    %c128_112 = arith.constant 128 : index
    %392 = vector.load %arg9[%c4_111, %c128_112] : memref<16x256xf32, #tpu.memory_space<vmem>>, vector<2x128xf32>
    %cst_113 = arith.constant dense<0.000000e+00> : vector<2x128xf32>
    %393 = tpu.matmul %390, %244, %cst_113 {dimension_numbers = #tpu.dot_dimension_numbers<[1], [0], [0], [1], [0, 0, 1, 1], [], []>} : vector<2x32xf32>, vector<32x128xf32>, vector<2x128xf32> -> vector<2x128xf32>
    %394 = arith.addf %392, %393 : vector<2x128xf32>
    %395 = vector.extract_strided_slice %394 {offsets = [0, 0], sizes = [2, 32], strides = [1, 1]} : vector<2x128xf32> to vector<2x32xf32>
    %396 = arith.negf %395 : vector<2x32xf32>
    %397 = math.exp %396 : vector<2x32xf32>
    %cst_114 = arith.constant 1.000000e+00 : f32
    %398 = vector.broadcast %cst_114 : f32 to vector<2x32xf32>
    %399 = arith.addf %398, %397 : vector<2x32xf32>
    %400 = arith.divf %398, %399 : vector<2x32xf32>
    %401 = vector.extract_strided_slice %394 {offsets = [0, 32], sizes = [2, 32], strides = [1, 1]} : vector<2x128xf32> to vector<2x32xf32>
    %402 = arith.negf %401 : vector<2x32xf32>
    %403 = math.exp %402 : vector<2x32xf32>
    %cst_115 = arith.constant 1.000000e+00 : f32
    %404 = vector.broadcast %cst_115 : f32 to vector<2x32xf32>
    %405 = arith.addf %404, %403 : vector<2x32xf32>
    %406 = arith.divf %404, %405 : vector<2x32xf32>
    %407 = vector.extract_strided_slice %394 {offsets = [0, 64], sizes = [2, 32], strides = [1, 1]} : vector<2x128xf32> to vector<2x32xf32>
    %408 = math.tanh %407 : vector<2x32xf32>
    %409 = vector.extract_strided_slice %394 {offsets = [0, 96], sizes = [2, 32], strides = [1, 1]} : vector<2x128xf32> to vector<2x32xf32>
    %410 = arith.negf %409 : vector<2x32xf32>
    %411 = math.exp %410 : vector<2x32xf32>
    %cst_116 = arith.constant 1.000000e+00 : f32
    %412 = vector.broadcast %cst_116 : f32 to vector<2x32xf32>
    %413 = arith.addf %412, %411 : vector<2x32xf32>
    %414 = arith.divf %412, %413 : vector<2x32xf32>
    %415 = arith.mulf %406, %388 : vector<2x32xf32>
    %416 = arith.mulf %400, %408 : vector<2x32xf32>
    %417 = arith.addf %415, %416 : vector<2x32xf32>
    %418 = math.tanh %417 : vector<2x32xf32>
    %419 = arith.mulf %414, %418 : vector<2x32xf32>
    %c4_117 = arith.constant 4 : index
    %c32_118 = arith.constant 32 : index
    %420 = vector.load %arg8[%c4_117, %c32_118] : memref<16x64xf32, #tpu.memory_space<vmem>>, vector<2x32xf32>
    tpu.vector_store %arg8[%c4_117, %c32_118], %419 {strides = array<i32>} : memref<16x64xf32, #tpu.memory_space<vmem>>, vector<2x32xf32>,
    %c2_119 = arith.constant 2 : index
    %c128_120 = arith.constant 128 : index
    %421 = vector.load %arg9[%c2_119, %c128_120] : memref<16x256xf32, #tpu.memory_space<vmem>>, vector<2x128xf32>
    %cst_121 = arith.constant dense<0.000000e+00> : vector<2x128xf32>
    %422 = tpu.matmul %419, %244, %cst_121 {dimension_numbers = #tpu.dot_dimension_numbers<[1], [0], [0], [1], [0, 0, 1, 1], [], []>} : vector<2x32xf32>, vector<32x128xf32>, vector<2x128xf32> -> vector<2x128xf32>
    %423 = arith.addf %421, %422 : vector<2x128xf32>
    %424 = vector.extract_strided_slice %423 {offsets = [0, 0], sizes = [2, 32], strides = [1, 1]} : vector<2x128xf32> to vector<2x32xf32>
    %425 = arith.negf %424 : vector<2x32xf32>
    %426 = math.exp %425 : vector<2x32xf32>
    %cst_122 = arith.constant 1.000000e+00 : f32
    %427 = vector.broadcast %cst_122 : f32 to vector<2x32xf32>
    %428 = arith.addf %427, %426 : vector<2x32xf32>
    %429 = arith.divf %427, %428 : vector<2x32xf32>
    %430 = vector.extract_strided_slice %423 {offsets = [0, 32], sizes = [2, 32], strides = [1, 1]} : vector<2x128xf32> to vector<2x32xf32>
    %431 = arith.negf %430 : vector<2x32xf32>
    %432 = math.exp %431 : vector<2x32xf32>
    %cst_123 = arith.constant 1.000000e+00 : f32
    %433 = vector.broadcast %cst_123 : f32 to vector<2x32xf32>
    %434 = arith.addf %433, %432 : vector<2x32xf32>
    %435 = arith.divf %433, %434 : vector<2x32xf32>
    %436 = vector.extract_strided_slice %423 {offsets = [0, 64], sizes = [2, 32], strides = [1, 1]} : vector<2x128xf32> to vector<2x32xf32>
    %437 = math.tanh %436 : vector<2x32xf32>
    %438 = vector.extract_strided_slice %423 {offsets = [0, 96], sizes = [2, 32], strides = [1, 1]} : vector<2x128xf32> to vector<2x32xf32>
    %439 = arith.negf %438 : vector<2x32xf32>
    %440 = math.exp %439 : vector<2x32xf32>
    %cst_124 = arith.constant 1.000000e+00 : f32
    %441 = vector.broadcast %cst_124 : f32 to vector<2x32xf32>
    %442 = arith.addf %441, %440 : vector<2x32xf32>
    %443 = arith.divf %441, %442 : vector<2x32xf32>
    %444 = arith.mulf %435, %417 : vector<2x32xf32>
    %445 = arith.mulf %429, %437 : vector<2x32xf32>
    %446 = arith.addf %444, %445 : vector<2x32xf32>
    %447 = math.tanh %446 : vector<2x32xf32>
    %448 = arith.mulf %443, %447 : vector<2x32xf32>
    %c2_125 = arith.constant 2 : index
    %c32_126 = arith.constant 32 : index
    %449 = vector.load %arg8[%c2_125, %c32_126] : memref<16x64xf32, #tpu.memory_space<vmem>>, vector<2x32xf32>
    tpu.vector_store %arg8[%c2_125, %c32_126], %448 {strides = array<i32>} : memref<16x64xf32, #tpu.memory_space<vmem>>, vector<2x32xf32>,
    %c0_127 = arith.constant 0 : index
    %c128_128 = arith.constant 128 : index
    %450 = vector.load %arg9[%c0_127, %c128_128] : memref<16x256xf32, #tpu.memory_space<vmem>>, vector<2x128xf32>
    %cst_129 = arith.constant dense<0.000000e+00> : vector<2x128xf32>
    %451 = tpu.matmul %448, %244, %cst_129 {dimension_numbers = #tpu.dot_dimension_numbers<[1], [0], [0], [1], [0, 0, 1, 1], [], []>} : vector<2x32xf32>, vector<32x128xf32>, vector<2x128xf32> -> vector<2x128xf32>
    %452 = arith.addf %450, %451 : vector<2x128xf32>
    %453 = vector.extract_strided_slice %452 {offsets = [0, 0], sizes = [2, 32], strides = [1, 1]} : vector<2x128xf32> to vector<2x32xf32>
    %454 = arith.negf %453 : vector<2x32xf32>
    %455 = math.exp %454 : vector<2x32xf32>
    %cst_130 = arith.constant 1.000000e+00 : f32
    %456 = vector.broadcast %cst_130 : f32 to vector<2x32xf32>
    %457 = arith.addf %456, %455 : vector<2x32xf32>
    %458 = arith.divf %456, %457 : vector<2x32xf32>
    %459 = vector.extract_strided_slice %452 {offsets = [0, 32], sizes = [2, 32], strides = [1, 1]} : vector<2x128xf32> to vector<2x32xf32>
    %460 = arith.negf %459 : vector<2x32xf32>
    %461 = math.exp %460 : vector<2x32xf32>
    %cst_131 = arith.constant 1.000000e+00 : f32
    %462 = vector.broadcast %cst_131 : f32 to vector<2x32xf32>
    %463 = arith.addf %462, %461 : vector<2x32xf32>
    %464 = arith.divf %462, %463 : vector<2x32xf32>
    %465 = vector.extract_strided_slice %452 {offsets = [0, 64], sizes = [2, 32], strides = [1, 1]} : vector<2x128xf32> to vector<2x32xf32>
    %466 = math.tanh %465 : vector<2x32xf32>
    %467 = vector.extract_strided_slice %452 {offsets = [0, 96], sizes = [2, 32], strides = [1, 1]} : vector<2x128xf32> to vector<2x32xf32>
    %468 = arith.negf %467 : vector<2x32xf32>
    %469 = math.exp %468 : vector<2x32xf32>
    %cst_132 = arith.constant 1.000000e+00 : f32
    %470 = vector.broadcast %cst_132 : f32 to vector<2x32xf32>
    %471 = arith.addf %470, %469 : vector<2x32xf32>
    %472 = arith.divf %470, %471 : vector<2x32xf32>
    %473 = arith.mulf %464, %446 : vector<2x32xf32>
    %474 = arith.mulf %458, %466 : vector<2x32xf32>
    %475 = arith.addf %473, %474 : vector<2x32xf32>
    %476 = math.tanh %475 : vector<2x32xf32>
    %477 = arith.mulf %472, %476 : vector<2x32xf32>
    %c0_133 = arith.constant 0 : index
    %c32_134 = arith.constant 32 : index
    %478 = vector.load %arg8[%c0_133, %c32_134] : memref<16x64xf32, #tpu.memory_space<vmem>>, vector<2x32xf32>
    tpu.vector_store %arg8[%c0_133, %c32_134], %477 {strides = array<i32>} : memref<16x64xf32, #tpu.memory_space<vmem>>, vector<2x32xf32>,
    %c0_135 = arith.constant 0 : index
    %c0_136 = arith.constant 0 : index
    %479 = vector.load %arg8[%c0_135, %c0_136] : memref<16x64xf32, #tpu.memory_space<vmem>>, vector<16x64xf32>
    %c0_137 = arith.constant 0 : index
    %c0_138 = arith.constant 0 : index
    %480 = vector.load %arg4[%c0_137, %c0_138] : memref<64x256xf32, #tpu.memory_space<vmem>>, vector<64x256xf32>
    %cst_139 = arith.constant dense<0.000000e+00> : vector<16x256xf32>
    %481 = tpu.matmul %479, %480, %cst_139 {dimension_numbers = #tpu.dot_dimension_numbers<[1], [0], [0], [1], [0, 0, 1, 1], [], []>} : vector<16x64xf32>, vector<64x256xf32>, vector<16x256xf32> -> vector<16x256xf32>
    %c0_140 = arith.constant 0 : index
    %c0_141 = arith.constant 0 : index
    %482 = vector.load %arg6[%c0_140, %c0_141] : memref<1x256xf32, #tpu.memory_space<vmem>>, vector<1x256xf32>
    %483 = vector.broadcast %482 : vector<1x256xf32> to vector<16x256xf32>
    %484 = arith.addf %481, %483 : vector<16x256xf32>
    %c0_142 = arith.constant 0 : index
    %c0_143 = arith.constant 0 : index
    %485 = vector.load %arg9[%c0_142, %c0_143] : memref<16x256xf32, #tpu.memory_space<vmem>>, vector<16x256xf32>
    tpu.vector_store %arg9[%c0_142, %c0_143], %484 {strides = array<i32>} : memref<16x256xf32, #tpu.memory_space<vmem>>, vector<16x256xf32>,
    %c0_144 = arith.constant 0 : index
    %c0_145 = arith.constant 0 : index
    %c0_146 = arith.constant 0 : index
    %486 = vector.load %arg5[%c0_144, %c0_145, %c0_146] : memref<2x32x128xf32, #tpu.memory_space<vmem>>, vector<1x32x128xf32>
    %487 = vector.shape_cast %486 : vector<1x32x128xf32> to vector<32x128xf32>
    %cst_147 = arith.constant 0.000000e+00 : f32
    %488 = vector.broadcast %cst_147 : f32 to vector<2x32xf32>
    %cst_148 = arith.constant 0.000000e+00 : f32
    %489 = vector.broadcast %cst_148 : f32 to vector<2x32xf32>
    %c0_149 = arith.constant 0 : index
    %c0_150 = arith.constant 0 : index
    %490 = vector.load %arg9[%c0_149, %c0_150] : memref<16x256xf32, #tpu.memory_space<vmem>>, vector<2x128xf32>
    %cst_151 = arith.constant dense<0.000000e+00> : vector<2x128xf32>
    %491 = tpu.matmul %488, %487, %cst_151 {dimension_numbers = #tpu.dot_dimension_numbers<[1], [0], [0], [1], [0, 0, 1, 1], [], []>} : vector<2x32xf32>, vector<32x128xf32>, vector<2x128xf32> -> vector<2x128xf32>
    %492 = arith.addf %490, %491 : vector<2x128xf32>
    %493 = vector.extract_strided_slice %492 {offsets = [0, 0], sizes = [2, 32], strides = [1, 1]} : vector<2x128xf32> to vector<2x32xf32>
    %494 = arith.negf %493 : vector<2x32xf32>
    %495 = math.exp %494 : vector<2x32xf32>
    %cst_152 = arith.constant 1.000000e+00 : f32
    %496 = vector.broadcast %cst_152 : f32 to vector<2x32xf32>
    %497 = arith.addf %496, %495 : vector<2x32xf32>
    %498 = arith.divf %496, %497 : vector<2x32xf32>
    %499 = vector.extract_strided_slice %492 {offsets = [0, 32], sizes = [2, 32], strides = [1, 1]} : vector<2x128xf32> to vector<2x32xf32>
    %500 = arith.negf %499 : vector<2x32xf32>
    %501 = math.exp %500 : vector<2x32xf32>
    %cst_153 = arith.constant 1.000000e+00 : f32
    %502 = vector.broadcast %cst_153 : f32 to vector<2x32xf32>
    %503 = arith.addf %502, %501 : vector<2x32xf32>
    %504 = arith.divf %502, %503 : vector<2x32xf32>
    %505 = vector.extract_strided_slice %492 {offsets = [0, 64], sizes = [2, 32], strides = [1, 1]} : vector<2x128xf32> to vector<2x32xf32>
    %506 = math.tanh %505 : vector<2x32xf32>
    %507 = vector.extract_strided_slice %492 {offsets = [0, 96], sizes = [2, 32], strides = [1, 1]} : vector<2x128xf32> to vector<2x32xf32>
    %508 = arith.negf %507 : vector<2x32xf32>
    %509 = math.exp %508 : vector<2x32xf32>
    %cst_154 = arith.constant 1.000000e+00 : f32
    %510 = vector.broadcast %cst_154 : f32 to vector<2x32xf32>
    %511 = arith.addf %510, %509 : vector<2x32xf32>
    %512 = arith.divf %510, %511 : vector<2x32xf32>
    %513 = arith.mulf %504, %489 : vector<2x32xf32>
    %514 = arith.mulf %498, %506 : vector<2x32xf32>
    %515 = arith.addf %513, %514 : vector<2x32xf32>
    %516 = math.tanh %515 : vector<2x32xf32>
    %517 = arith.mulf %512, %516 : vector<2x32xf32>
    %c2_155 = arith.constant 2 : index
    %c0_156 = arith.constant 0 : index
    %518 = vector.load %arg9[%c2_155, %c0_156] : memref<16x256xf32, #tpu.memory_space<vmem>>, vector<2x128xf32>
    %cst_157 = arith.constant dense<0.000000e+00> : vector<2x128xf32>
    %519 = tpu.matmul %517, %487, %cst_157 {dimension_numbers = #tpu.dot_dimension_numbers<[1], [0], [0], [1], [0, 0, 1, 1], [], []>} : vector<2x32xf32>, vector<32x128xf32>, vector<2x128xf32> -> vector<2x128xf32>
    %520 = arith.addf %518, %519 : vector<2x128xf32>
    %521 = vector.extract_strided_slice %520 {offsets = [0, 0], sizes = [2, 32], strides = [1, 1]} : vector<2x128xf32> to vector<2x32xf32>
    %522 = arith.negf %521 : vector<2x32xf32>
    %523 = math.exp %522 : vector<2x32xf32>
    %cst_158 = arith.constant 1.000000e+00 : f32
    %524 = vector.broadcast %cst_158 : f32 to vector<2x32xf32>
    %525 = arith.addf %524, %523 : vector<2x32xf32>
    %526 = arith.divf %524, %525 : vector<2x32xf32>
    %527 = vector.extract_strided_slice %520 {offsets = [0, 32], sizes = [2, 32], strides = [1, 1]} : vector<2x128xf32> to vector<2x32xf32>
    %528 = arith.negf %527 : vector<2x32xf32>
    %529 = math.exp %528 : vector<2x32xf32>
    %cst_159 = arith.constant 1.000000e+00 : f32
    %530 = vector.broadcast %cst_159 : f32 to vector<2x32xf32>
    %531 = arith.addf %530, %529 : vector<2x32xf32>
    %532 = arith.divf %530, %531 : vector<2x32xf32>
    %533 = vector.extract_strided_slice %520 {offsets = [0, 64], sizes = [2, 32], strides = [1, 1]} : vector<2x128xf32> to vector<2x32xf32>
    %534 = math.tanh %533 : vector<2x32xf32>
    %535 = vector.extract_strided_slice %520 {offsets = [0, 96], sizes = [2, 32], strides = [1, 1]} : vector<2x128xf32> to vector<2x32xf32>
    %536 = arith.negf %535 : vector<2x32xf32>
    %537 = math.exp %536 : vector<2x32xf32>
    %cst_160 = arith.constant 1.000000e+00 : f32
    %538 = vector.broadcast %cst_160 : f32 to vector<2x32xf32>
    %539 = arith.addf %538, %537 : vector<2x32xf32>
    %540 = arith.divf %538, %539 : vector<2x32xf32>
    %541 = arith.mulf %532, %515 : vector<2x32xf32>
    %542 = arith.mulf %526, %534 : vector<2x32xf32>
    %543 = arith.addf %541, %542 : vector<2x32xf32>
    %544 = math.tanh %543 : vector<2x32xf32>
    %545 = arith.mulf %540, %544 : vector<2x32xf32>
    %c4_161 = arith.constant 4 : index
    %c0_162 = arith.constant 0 : index
    %546 = vector.load %arg9[%c4_161, %c0_162] : memref<16x256xf32, #tpu.memory_space<vmem>>, vector<2x128xf32>
    %cst_163 = arith.constant dense<0.000000e+00> : vector<2x128xf32>
    %547 = tpu.matmul %545, %487, %cst_163 {dimension_numbers = #tpu.dot_dimension_numbers<[1], [0], [0], [1], [0, 0, 1, 1], [], []>} : vector<2x32xf32>, vector<32x128xf32>, vector<2x128xf32> -> vector<2x128xf32>
    %548 = arith.addf %546, %547 : vector<2x128xf32>
    %549 = vector.extract_strided_slice %548 {offsets = [0, 0], sizes = [2, 32], strides = [1, 1]} : vector<2x128xf32> to vector<2x32xf32>
    %550 = arith.negf %549 : vector<2x32xf32>
    %551 = math.exp %550 : vector<2x32xf32>
    %cst_164 = arith.constant 1.000000e+00 : f32
    %552 = vector.broadcast %cst_164 : f32 to vector<2x32xf32>
    %553 = arith.addf %552, %551 : vector<2x32xf32>
    %554 = arith.divf %552, %553 : vector<2x32xf32>
    %555 = vector.extract_strided_slice %548 {offsets = [0, 32], sizes = [2, 32], strides = [1, 1]} : vector<2x128xf32> to vector<2x32xf32>
    %556 = arith.negf %555 : vector<2x32xf32>
    %557 = math.exp %556 : vector<2x32xf32>
    %cst_165 = arith.constant 1.000000e+00 : f32
    %558 = vector.broadcast %cst_165 : f32 to vector<2x32xf32>
    %559 = arith.addf %558, %557 : vector<2x32xf32>
    %560 = arith.divf %558, %559 : vector<2x32xf32>
    %561 = vector.extract_strided_slice %548 {offsets = [0, 64], sizes = [2, 32], strides = [1, 1]} : vector<2x128xf32> to vector<2x32xf32>
    %562 = math.tanh %561 : vector<2x32xf32>
    %563 = vector.extract_strided_slice %548 {offsets = [0, 96], sizes = [2, 32], strides = [1, 1]} : vector<2x128xf32> to vector<2x32xf32>
    %564 = arith.negf %563 : vector<2x32xf32>
    %565 = math.exp %564 : vector<2x32xf32>
    %cst_166 = arith.constant 1.000000e+00 : f32
    %566 = vector.broadcast %cst_166 : f32 to vector<2x32xf32>
    %567 = arith.addf %566, %565 : vector<2x32xf32>
    %568 = arith.divf %566, %567 : vector<2x32xf32>
    %569 = arith.mulf %560, %543 : vector<2x32xf32>
    %570 = arith.mulf %554, %562 : vector<2x32xf32>
    %571 = arith.addf %569, %570 : vector<2x32xf32>
    %572 = math.tanh %571 : vector<2x32xf32>
    %573 = arith.mulf %568, %572 : vector<2x32xf32>
    %c6_167 = arith.constant 6 : index
    %c0_168 = arith.constant 0 : index
    %574 = vector.load %arg9[%c6_167, %c0_168] : memref<16x256xf32, #tpu.memory_space<vmem>>, vector<2x128xf32>
    %cst_169 = arith.constant dense<0.000000e+00> : vector<2x128xf32>
    %575 = tpu.matmul %573, %487, %cst_169 {dimension_numbers = #tpu.dot_dimension_numbers<[1], [0], [0], [1], [0, 0, 1, 1], [], []>} : vector<2x32xf32>, vector<32x128xf32>, vector<2x128xf32> -> vector<2x128xf32>
    %576 = arith.addf %574, %575 : vector<2x128xf32>
    %577 = vector.extract_strided_slice %576 {offsets = [0, 0], sizes = [2, 32], strides = [1, 1]} : vector<2x128xf32> to vector<2x32xf32>
    %578 = arith.negf %577 : vector<2x32xf32>
    %579 = math.exp %578 : vector<2x32xf32>
    %cst_170 = arith.constant 1.000000e+00 : f32
    %580 = vector.broadcast %cst_170 : f32 to vector<2x32xf32>
    %581 = arith.addf %580, %579 : vector<2x32xf32>
    %582 = arith.divf %580, %581 : vector<2x32xf32>
    %583 = vector.extract_strided_slice %576 {offsets = [0, 32], sizes = [2, 32], strides = [1, 1]} : vector<2x128xf32> to vector<2x32xf32>
    %584 = arith.negf %583 : vector<2x32xf32>
    %585 = math.exp %584 : vector<2x32xf32>
    %cst_171 = arith.constant 1.000000e+00 : f32
    %586 = vector.broadcast %cst_171 : f32 to vector<2x32xf32>
    %587 = arith.addf %586, %585 : vector<2x32xf32>
    %588 = arith.divf %586, %587 : vector<2x32xf32>
    %589 = vector.extract_strided_slice %576 {offsets = [0, 64], sizes = [2, 32], strides = [1, 1]} : vector<2x128xf32> to vector<2x32xf32>
    %590 = math.tanh %589 : vector<2x32xf32>
    %591 = vector.extract_strided_slice %576 {offsets = [0, 96], sizes = [2, 32], strides = [1, 1]} : vector<2x128xf32> to vector<2x32xf32>
    %592 = arith.negf %591 : vector<2x32xf32>
    %593 = math.exp %592 : vector<2x32xf32>
    %cst_172 = arith.constant 1.000000e+00 : f32
    %594 = vector.broadcast %cst_172 : f32 to vector<2x32xf32>
    %595 = arith.addf %594, %593 : vector<2x32xf32>
    %596 = arith.divf %594, %595 : vector<2x32xf32>
    %597 = arith.mulf %588, %571 : vector<2x32xf32>
    %598 = arith.mulf %582, %590 : vector<2x32xf32>
    %599 = arith.addf %597, %598 : vector<2x32xf32>
    %600 = math.tanh %599 : vector<2x32xf32>
    %601 = arith.mulf %596, %600 : vector<2x32xf32>
    %c8_173 = arith.constant 8 : index
    %c0_174 = arith.constant 0 : index
    %602 = vector.load %arg9[%c8_173, %c0_174] : memref<16x256xf32, #tpu.memory_space<vmem>>, vector<2x128xf32>
    %cst_175 = arith.constant dense<0.000000e+00> : vector<2x128xf32>
    %603 = tpu.matmul %601, %487, %cst_175 {dimension_numbers = #tpu.dot_dimension_numbers<[1], [0], [0], [1], [0, 0, 1, 1], [], []>} : vector<2x32xf32>, vector<32x128xf32>, vector<2x128xf32> -> vector<2x128xf32>
    %604 = arith.addf %602, %603 : vector<2x128xf32>
    %605 = vector.extract_strided_slice %604 {offsets = [0, 0], sizes = [2, 32], strides = [1, 1]} : vector<2x128xf32> to vector<2x32xf32>
    %606 = arith.negf %605 : vector<2x32xf32>
    %607 = math.exp %606 : vector<2x32xf32>
    %cst_176 = arith.constant 1.000000e+00 : f32
    %608 = vector.broadcast %cst_176 : f32 to vector<2x32xf32>
    %609 = arith.addf %608, %607 : vector<2x32xf32>
    %610 = arith.divf %608, %609 : vector<2x32xf32>
    %611 = vector.extract_strided_slice %604 {offsets = [0, 32], sizes = [2, 32], strides = [1, 1]} : vector<2x128xf32> to vector<2x32xf32>
    %612 = arith.negf %611 : vector<2x32xf32>
    %613 = math.exp %612 : vector<2x32xf32>
    %cst_177 = arith.constant 1.000000e+00 : f32
    %614 = vector.broadcast %cst_177 : f32 to vector<2x32xf32>
    %615 = arith.addf %614, %613 : vector<2x32xf32>
    %616 = arith.divf %614, %615 : vector<2x32xf32>
    %617 = vector.extract_strided_slice %604 {offsets = [0, 64], sizes = [2, 32], strides = [1, 1]} : vector<2x128xf32> to vector<2x32xf32>
    %618 = math.tanh %617 : vector<2x32xf32>
    %619 = vector.extract_strided_slice %604 {offsets = [0, 96], sizes = [2, 32], strides = [1, 1]} : vector<2x128xf32> to vector<2x32xf32>
    %620 = arith.negf %619 : vector<2x32xf32>
    %621 = math.exp %620 : vector<2x32xf32>
    %cst_178 = arith.constant 1.000000e+00 : f32
    %622 = vector.broadcast %cst_178 : f32 to vector<2x32xf32>
    %623 = arith.addf %622, %621 : vector<2x32xf32>
    %624 = arith.divf %622, %623 : vector<2x32xf32>
    %625 = arith.mulf %616, %599 : vector<2x32xf32>
    %626 = arith.mulf %610, %618 : vector<2x32xf32>
    %627 = arith.addf %625, %626 : vector<2x32xf32>
    %628 = math.tanh %627 : vector<2x32xf32>
    %629 = arith.mulf %624, %628 : vector<2x32xf32>
    %c10_179 = arith.constant 10 : index
    %c0_180 = arith.constant 0 : index
    %630 = vector.load %arg9[%c10_179, %c0_180] : memref<16x256xf32, #tpu.memory_space<vmem>>, vector<2x128xf32>
    %cst_181 = arith.constant dense<0.000000e+00> : vector<2x128xf32>
    %631 = tpu.matmul %629, %487, %cst_181 {dimension_numbers = #tpu.dot_dimension_numbers<[1], [0], [0], [1], [0, 0, 1, 1], [], []>} : vector<2x32xf32>, vector<32x128xf32>, vector<2x128xf32> -> vector<2x128xf32>
    %632 = arith.addf %630, %631 : vector<2x128xf32>
    %633 = vector.extract_strided_slice %632 {offsets = [0, 0], sizes = [2, 32], strides = [1, 1]} : vector<2x128xf32> to vector<2x32xf32>
    %634 = arith.negf %633 : vector<2x32xf32>
    %635 = math.exp %634 : vector<2x32xf32>
    %cst_182 = arith.constant 1.000000e+00 : f32
    %636 = vector.broadcast %cst_182 : f32 to vector<2x32xf32>
    %637 = arith.addf %636, %635 : vector<2x32xf32>
    %638 = arith.divf %636, %637 : vector<2x32xf32>
    %639 = vector.extract_strided_slice %632 {offsets = [0, 32], sizes = [2, 32], strides = [1, 1]} : vector<2x128xf32> to vector<2x32xf32>
    %640 = arith.negf %639 : vector<2x32xf32>
    %641 = math.exp %640 : vector<2x32xf32>
    %cst_183 = arith.constant 1.000000e+00 : f32
    %642 = vector.broadcast %cst_183 : f32 to vector<2x32xf32>
    %643 = arith.addf %642, %641 : vector<2x32xf32>
    %644 = arith.divf %642, %643 : vector<2x32xf32>
    %645 = vector.extract_strided_slice %632 {offsets = [0, 64], sizes = [2, 32], strides = [1, 1]} : vector<2x128xf32> to vector<2x32xf32>
    %646 = math.tanh %645 : vector<2x32xf32>
    %647 = vector.extract_strided_slice %632 {offsets = [0, 96], sizes = [2, 32], strides = [1, 1]} : vector<2x128xf32> to vector<2x32xf32>
    %648 = arith.negf %647 : vector<2x32xf32>
    %649 = math.exp %648 : vector<2x32xf32>
    %cst_184 = arith.constant 1.000000e+00 : f32
    %650 = vector.broadcast %cst_184 : f32 to vector<2x32xf32>
    %651 = arith.addf %650, %649 : vector<2x32xf32>
    %652 = arith.divf %650, %651 : vector<2x32xf32>
    %653 = arith.mulf %644, %627 : vector<2x32xf32>
    %654 = arith.mulf %638, %646 : vector<2x32xf32>
    %655 = arith.addf %653, %654 : vector<2x32xf32>
    %656 = math.tanh %655 : vector<2x32xf32>
    %657 = arith.mulf %652, %656 : vector<2x32xf32>
    %c12_185 = arith.constant 12 : index
    %c0_186 = arith.constant 0 : index
    %658 = vector.load %arg9[%c12_185, %c0_186] : memref<16x256xf32, #tpu.memory_space<vmem>>, vector<2x128xf32>
    %cst_187 = arith.constant dense<0.000000e+00> : vector<2x128xf32>
    %659 = tpu.matmul %657, %487, %cst_187 {dimension_numbers = #tpu.dot_dimension_numbers<[1], [0], [0], [1], [0, 0, 1, 1], [], []>} : vector<2x32xf32>, vector<32x128xf32>, vector<2x128xf32> -> vector<2x128xf32>
    %660 = arith.addf %658, %659 : vector<2x128xf32>
    %661 = vector.extract_strided_slice %660 {offsets = [0, 0], sizes = [2, 32], strides = [1, 1]} : vector<2x128xf32> to vector<2x32xf32>
    %662 = arith.negf %661 : vector<2x32xf32>
    %663 = math.exp %662 : vector<2x32xf32>
    %cst_188 = arith.constant 1.000000e+00 : f32
    %664 = vector.broadcast %cst_188 : f32 to vector<2x32xf32>
    %665 = arith.addf %664, %663 : vector<2x32xf32>
    %666 = arith.divf %664, %665 : vector<2x32xf32>
    %667 = vector.extract_strided_slice %660 {offsets = [0, 32], sizes = [2, 32], strides = [1, 1]} : vector<2x128xf32> to vector<2x32xf32>
    %668 = arith.negf %667 : vector<2x32xf32>
    %669 = math.exp %668 : vector<2x32xf32>
    %cst_189 = arith.constant 1.000000e+00 : f32
    %670 = vector.broadcast %cst_189 : f32 to vector<2x32xf32>
    %671 = arith.addf %670, %669 : vector<2x32xf32>
    %672 = arith.divf %670, %671 : vector<2x32xf32>
    %673 = vector.extract_strided_slice %660 {offsets = [0, 64], sizes = [2, 32], strides = [1, 1]} : vector<2x128xf32> to vector<2x32xf32>
    %674 = math.tanh %673 : vector<2x32xf32>
    %675 = vector.extract_strided_slice %660 {offsets = [0, 96], sizes = [2, 32], strides = [1, 1]} : vector<2x128xf32> to vector<2x32xf32>
    %676 = arith.negf %675 : vector<2x32xf32>
    %677 = math.exp %676 : vector<2x32xf32>
    %cst_190 = arith.constant 1.000000e+00 : f32
    %678 = vector.broadcast %cst_190 : f32 to vector<2x32xf32>
    %679 = arith.addf %678, %677 : vector<2x32xf32>
    %680 = arith.divf %678, %679 : vector<2x32xf32>
    %681 = arith.mulf %672, %655 : vector<2x32xf32>
    %682 = arith.mulf %666, %674 : vector<2x32xf32>
    %683 = arith.addf %681, %682 : vector<2x32xf32>
    %684 = math.tanh %683 : vector<2x32xf32>
    %685 = arith.mulf %680, %684 : vector<2x32xf32>
    %c14_191 = arith.constant 14 : index
    %c0_192 = arith.constant 0 : index
    %686 = vector.load %arg9[%c14_191, %c0_192] : memref<16x256xf32, #tpu.memory_space<vmem>>, vector<2x128xf32>
    %cst_193 = arith.constant dense<0.000000e+00> : vector<2x128xf32>
    %687 = tpu.matmul %685, %487, %cst_193 {dimension_numbers = #tpu.dot_dimension_numbers<[1], [0], [0], [1], [0, 0, 1, 1], [], []>} : vector<2x32xf32>, vector<32x128xf32>, vector<2x128xf32> -> vector<2x128xf32>
    %688 = arith.addf %686, %687 : vector<2x128xf32>
    %689 = vector.extract_strided_slice %688 {offsets = [0, 0], sizes = [2, 32], strides = [1, 1]} : vector<2x128xf32> to vector<2x32xf32>
    %690 = arith.negf %689 : vector<2x32xf32>
    %691 = math.exp %690 : vector<2x32xf32>
    %cst_194 = arith.constant 1.000000e+00 : f32
    %692 = vector.broadcast %cst_194 : f32 to vector<2x32xf32>
    %693 = arith.addf %692, %691 : vector<2x32xf32>
    %694 = arith.divf %692, %693 : vector<2x32xf32>
    %695 = vector.extract_strided_slice %688 {offsets = [0, 32], sizes = [2, 32], strides = [1, 1]} : vector<2x128xf32> to vector<2x32xf32>
    %696 = arith.negf %695 : vector<2x32xf32>
    %697 = math.exp %696 : vector<2x32xf32>
    %cst_195 = arith.constant 1.000000e+00 : f32
    %698 = vector.broadcast %cst_195 : f32 to vector<2x32xf32>
    %699 = arith.addf %698, %697 : vector<2x32xf32>
    %700 = arith.divf %698, %699 : vector<2x32xf32>
    %701 = vector.extract_strided_slice %688 {offsets = [0, 64], sizes = [2, 32], strides = [1, 1]} : vector<2x128xf32> to vector<2x32xf32>
    %702 = math.tanh %701 : vector<2x32xf32>
    %703 = vector.extract_strided_slice %688 {offsets = [0, 96], sizes = [2, 32], strides = [1, 1]} : vector<2x128xf32> to vector<2x32xf32>
    %704 = arith.negf %703 : vector<2x32xf32>
    %705 = math.exp %704 : vector<2x32xf32>
    %cst_196 = arith.constant 1.000000e+00 : f32
    %706 = vector.broadcast %cst_196 : f32 to vector<2x32xf32>
    %707 = arith.addf %706, %705 : vector<2x32xf32>
    %708 = arith.divf %706, %707 : vector<2x32xf32>
    %709 = arith.mulf %700, %683 : vector<2x32xf32>
    %710 = arith.mulf %694, %702 : vector<2x32xf32>
    %711 = arith.addf %709, %710 : vector<2x32xf32>
    %712 = math.tanh %711 : vector<2x32xf32>
    %713 = arith.mulf %708, %712 : vector<2x32xf32>
    %c0_197 = arith.constant 0 : index
    %c0_198 = arith.constant 0 : index
    %714 = vector.load %arg7[%c0_197, %c0_198] : memref<2x64xf32, #tpu.memory_space<vmem>>, vector<2x32xf32>
    tpu.vector_store %arg7[%c0_197, %c0_198], %713 {strides = array<i32>} : memref<2x64xf32, #tpu.memory_space<vmem>>, vector<2x32xf32>,
    %c1_199 = arith.constant 1 : index
    %c0_200 = arith.constant 0 : index
    %c0_201 = arith.constant 0 : index
    %715 = vector.load %arg5[%c1_199, %c0_200, %c0_201] : memref<2x32x128xf32, #tpu.memory_space<vmem>>, vector<1x32x128xf32>
    %716 = vector.shape_cast %715 : vector<1x32x128xf32> to vector<32x128xf32>
    %cst_202 = arith.constant 0.000000e+00 : f32
    %717 = vector.broadcast %cst_202 : f32 to vector<2x32xf32>
    %cst_203 = arith.constant 0.000000e+00 : f32
    %718 = vector.broadcast %cst_203 : f32 to vector<2x32xf32>
    %c14_204 = arith.constant 14 : index
    %c128_205 = arith.constant 128 : index
    %719 = vector.load %arg9[%c14_204, %c128_205] : memref<16x256xf32, #tpu.memory_space<vmem>>, vector<2x128xf32>
    %cst_206 = arith.constant dense<0.000000e+00> : vector<2x128xf32>
    %720 = tpu.matmul %717, %716, %cst_206 {dimension_numbers = #tpu.dot_dimension_numbers<[1], [0], [0], [1], [0, 0, 1, 1], [], []>} : vector<2x32xf32>, vector<32x128xf32>, vector<2x128xf32> -> vector<2x128xf32>
    %721 = arith.addf %719, %720 : vector<2x128xf32>
    %722 = vector.extract_strided_slice %721 {offsets = [0, 0], sizes = [2, 32], strides = [1, 1]} : vector<2x128xf32> to vector<2x32xf32>
    %723 = arith.negf %722 : vector<2x32xf32>
    %724 = math.exp %723 : vector<2x32xf32>
    %cst_207 = arith.constant 1.000000e+00 : f32
    %725 = vector.broadcast %cst_207 : f32 to vector<2x32xf32>
    %726 = arith.addf %725, %724 : vector<2x32xf32>
    %727 = arith.divf %725, %726 : vector<2x32xf32>
    %728 = vector.extract_strided_slice %721 {offsets = [0, 32], sizes = [2, 32], strides = [1, 1]} : vector<2x128xf32> to vector<2x32xf32>
    %729 = arith.negf %728 : vector<2x32xf32>
    %730 = math.exp %729 : vector<2x32xf32>
    %cst_208 = arith.constant 1.000000e+00 : f32
    %731 = vector.broadcast %cst_208 : f32 to vector<2x32xf32>
    %732 = arith.addf %731, %730 : vector<2x32xf32>
    %733 = arith.divf %731, %732 : vector<2x32xf32>
    %734 = vector.extract_strided_slice %721 {offsets = [0, 64], sizes = [2, 32], strides = [1, 1]} : vector<2x128xf32> to vector<2x32xf32>
    %735 = math.tanh %734 : vector<2x32xf32>
    %736 = vector.extract_strided_slice %721 {offsets = [0, 96], sizes = [2, 32], strides = [1, 1]} : vector<2x128xf32> to vector<2x32xf32>
    %737 = arith.negf %736 : vector<2x32xf32>
    %738 = math.exp %737 : vector<2x32xf32>
    %cst_209 = arith.constant 1.000000e+00 : f32
    %739 = vector.broadcast %cst_209 : f32 to vector<2x32xf32>
    %740 = arith.addf %739, %738 : vector<2x32xf32>
    %741 = arith.divf %739, %740 : vector<2x32xf32>
    %742 = arith.mulf %733, %718 : vector<2x32xf32>
    %743 = arith.mulf %727, %735 : vector<2x32xf32>
    %744 = arith.addf %742, %743 : vector<2x32xf32>
    %745 = math.tanh %744 : vector<2x32xf32>
    %746 = arith.mulf %741, %745 : vector<2x32xf32>
    %c12_210 = arith.constant 12 : index
    %c128_211 = arith.constant 128 : index
    %747 = vector.load %arg9[%c12_210, %c128_211] : memref<16x256xf32, #tpu.memory_space<vmem>>, vector<2x128xf32>
    %cst_212 = arith.constant dense<0.000000e+00> : vector<2x128xf32>
    %748 = tpu.matmul %746, %716, %cst_212 {dimension_numbers = #tpu.dot_dimension_numbers<[1], [0], [0], [1], [0, 0, 1, 1], [], []>} : vector<2x32xf32>, vector<32x128xf32>, vector<2x128xf32> -> vector<2x128xf32>
    %749 = arith.addf %747, %748 : vector<2x128xf32>
    %750 = vector.extract_strided_slice %749 {offsets = [0, 0], sizes = [2, 32], strides = [1, 1]} : vector<2x128xf32> to vector<2x32xf32>
    %751 = arith.negf %750 : vector<2x32xf32>
    %752 = math.exp %751 : vector<2x32xf32>
    %cst_213 = arith.constant 1.000000e+00 : f32
    %753 = vector.broadcast %cst_213 : f32 to vector<2x32xf32>
    %754 = arith.addf %753, %752 : vector<2x32xf32>
    %755 = arith.divf %753, %754 : vector<2x32xf32>
    %756 = vector.extract_strided_slice %749 {offsets = [0, 32], sizes = [2, 32], strides = [1, 1]} : vector<2x128xf32> to vector<2x32xf32>
    %757 = arith.negf %756 : vector<2x32xf32>
    %758 = math.exp %757 : vector<2x32xf32>
    %cst_214 = arith.constant 1.000000e+00 : f32
    %759 = vector.broadcast %cst_214 : f32 to vector<2x32xf32>
    %760 = arith.addf %759, %758 : vector<2x32xf32>
    %761 = arith.divf %759, %760 : vector<2x32xf32>
    %762 = vector.extract_strided_slice %749 {offsets = [0, 64], sizes = [2, 32], strides = [1, 1]} : vector<2x128xf32> to vector<2x32xf32>
    %763 = math.tanh %762 : vector<2x32xf32>
    %764 = vector.extract_strided_slice %749 {offsets = [0, 96], sizes = [2, 32], strides = [1, 1]} : vector<2x128xf32> to vector<2x32xf32>
    %765 = arith.negf %764 : vector<2x32xf32>
    %766 = math.exp %765 : vector<2x32xf32>
    %cst_215 = arith.constant 1.000000e+00 : f32
    %767 = vector.broadcast %cst_215 : f32 to vector<2x32xf32>
    %768 = arith.addf %767, %766 : vector<2x32xf32>
    %769 = arith.divf %767, %768 : vector<2x32xf32>
    %770 = arith.mulf %761, %744 : vector<2x32xf32>
    %771 = arith.mulf %755, %763 : vector<2x32xf32>
    %772 = arith.addf %770, %771 : vector<2x32xf32>
    %773 = math.tanh %772 : vector<2x32xf32>
    %774 = arith.mulf %769, %773 : vector<2x32xf32>
    %c10_216 = arith.constant 10 : index
    %c128_217 = arith.constant 128 : index
    %775 = vector.load %arg9[%c10_216, %c128_217] : memref<16x256xf32, #tpu.memory_space<vmem>>, vector<2x128xf32>
    %cst_218 = arith.constant dense<0.000000e+00> : vector<2x128xf32>
    %776 = tpu.matmul %774, %716, %cst_218 {dimension_numbers = #tpu.dot_dimension_numbers<[1], [0], [0], [1], [0, 0, 1, 1], [], []>} : vector<2x32xf32>, vector<32x128xf32>, vector<2x128xf32> -> vector<2x128xf32>
    %777 = arith.addf %775, %776 : vector<2x128xf32>
    %778 = vector.extract_strided_slice %777 {offsets = [0, 0], sizes = [2, 32], strides = [1, 1]} : vector<2x128xf32> to vector<2x32xf32>
    %779 = arith.negf %778 : vector<2x32xf32>
    %780 = math.exp %779 : vector<2x32xf32>
    %cst_219 = arith.constant 1.000000e+00 : f32
    %781 = vector.broadcast %cst_219 : f32 to vector<2x32xf32>
    %782 = arith.addf %781, %780 : vector<2x32xf32>
    %783 = arith.divf %781, %782 : vector<2x32xf32>
    %784 = vector.extract_strided_slice %777 {offsets = [0, 32], sizes = [2, 32], strides = [1, 1]} : vector<2x128xf32> to vector<2x32xf32>
    %785 = arith.negf %784 : vector<2x32xf32>
    %786 = math.exp %785 : vector<2x32xf32>
    %cst_220 = arith.constant 1.000000e+00 : f32
    %787 = vector.broadcast %cst_220 : f32 to vector<2x32xf32>
    %788 = arith.addf %787, %786 : vector<2x32xf32>
    %789 = arith.divf %787, %788 : vector<2x32xf32>
    %790 = vector.extract_strided_slice %777 {offsets = [0, 64], sizes = [2, 32], strides = [1, 1]} : vector<2x128xf32> to vector<2x32xf32>
    %791 = math.tanh %790 : vector<2x32xf32>
    %792 = vector.extract_strided_slice %777 {offsets = [0, 96], sizes = [2, 32], strides = [1, 1]} : vector<2x128xf32> to vector<2x32xf32>
    %793 = arith.negf %792 : vector<2x32xf32>
    %794 = math.exp %793 : vector<2x32xf32>
    %cst_221 = arith.constant 1.000000e+00 : f32
    %795 = vector.broadcast %cst_221 : f32 to vector<2x32xf32>
    %796 = arith.addf %795, %794 : vector<2x32xf32>
    %797 = arith.divf %795, %796 : vector<2x32xf32>
    %798 = arith.mulf %789, %772 : vector<2x32xf32>
    %799 = arith.mulf %783, %791 : vector<2x32xf32>
    %800 = arith.addf %798, %799 : vector<2x32xf32>
    %801 = math.tanh %800 : vector<2x32xf32>
    %802 = arith.mulf %797, %801 : vector<2x32xf32>
    %c8_222 = arith.constant 8 : index
    %c128_223 = arith.constant 128 : index
    %803 = vector.load %arg9[%c8_222, %c128_223] : memref<16x256xf32, #tpu.memory_space<vmem>>, vector<2x128xf32>
    %cst_224 = arith.constant dense<0.000000e+00> : vector<2x128xf32>
    %804 = tpu.matmul %802, %716, %cst_224 {dimension_numbers = #tpu.dot_dimension_numbers<[1], [0], [0], [1], [0, 0, 1, 1], [], []>} : vector<2x32xf32>, vector<32x128xf32>, vector<2x128xf32> -> vector<2x128xf32>
    %805 = arith.addf %803, %804 : vector<2x128xf32>
    %806 = vector.extract_strided_slice %805 {offsets = [0, 0], sizes = [2, 32], strides = [1, 1]} : vector<2x128xf32> to vector<2x32xf32>
    %807 = arith.negf %806 : vector<2x32xf32>
    %808 = math.exp %807 : vector<2x32xf32>
    %cst_225 = arith.constant 1.000000e+00 : f32
    %809 = vector.broadcast %cst_225 : f32 to vector<2x32xf32>
    %810 = arith.addf %809, %808 : vector<2x32xf32>
    %811 = arith.divf %809, %810 : vector<2x32xf32>
    %812 = vector.extract_strided_slice %805 {offsets = [0, 32], sizes = [2, 32], strides = [1, 1]} : vector<2x128xf32> to vector<2x32xf32>
    %813 = arith.negf %812 : vector<2x32xf32>
    %814 = math.exp %813 : vector<2x32xf32>
    %cst_226 = arith.constant 1.000000e+00 : f32
    %815 = vector.broadcast %cst_226 : f32 to vector<2x32xf32>
    %816 = arith.addf %815, %814 : vector<2x32xf32>
    %817 = arith.divf %815, %816 : vector<2x32xf32>
    %818 = vector.extract_strided_slice %805 {offsets = [0, 64], sizes = [2, 32], strides = [1, 1]} : vector<2x128xf32> to vector<2x32xf32>
    %819 = math.tanh %818 : vector<2x32xf32>
    %820 = vector.extract_strided_slice %805 {offsets = [0, 96], sizes = [2, 32], strides = [1, 1]} : vector<2x128xf32> to vector<2x32xf32>
    %821 = arith.negf %820 : vector<2x32xf32>
    %822 = math.exp %821 : vector<2x32xf32>
    %cst_227 = arith.constant 1.000000e+00 : f32
    %823 = vector.broadcast %cst_227 : f32 to vector<2x32xf32>
    %824 = arith.addf %823, %822 : vector<2x32xf32>
    %825 = arith.divf %823, %824 : vector<2x32xf32>
    %826 = arith.mulf %817, %800 : vector<2x32xf32>
    %827 = arith.mulf %811, %819 : vector<2x32xf32>
    %828 = arith.addf %826, %827 : vector<2x32xf32>
    %829 = math.tanh %828 : vector<2x32xf32>
    %830 = arith.mulf %825, %829 : vector<2x32xf32>
    %c6_228 = arith.constant 6 : index
    %c128_229 = arith.constant 128 : index
    %831 = vector.load %arg9[%c6_228, %c128_229] : memref<16x256xf32, #tpu.memory_space<vmem>>, vector<2x128xf32>
    %cst_230 = arith.constant dense<0.000000e+00> : vector<2x128xf32>
    %832 = tpu.matmul %830, %716, %cst_230 {dimension_numbers = #tpu.dot_dimension_numbers<[1], [0], [0], [1], [0, 0, 1, 1], [], []>} : vector<2x32xf32>, vector<32x128xf32>, vector<2x128xf32> -> vector<2x128xf32>
    %833 = arith.addf %831, %832 : vector<2x128xf32>
    %834 = vector.extract_strided_slice %833 {offsets = [0, 0], sizes = [2, 32], strides = [1, 1]} : vector<2x128xf32> to vector<2x32xf32>
    %835 = arith.negf %834 : vector<2x32xf32>
    %836 = math.exp %835 : vector<2x32xf32>
    %cst_231 = arith.constant 1.000000e+00 : f32
    %837 = vector.broadcast %cst_231 : f32 to vector<2x32xf32>
    %838 = arith.addf %837, %836 : vector<2x32xf32>
    %839 = arith.divf %837, %838 : vector<2x32xf32>
    %840 = vector.extract_strided_slice %833 {offsets = [0, 32], sizes = [2, 32], strides = [1, 1]} : vector<2x128xf32> to vector<2x32xf32>
    %841 = arith.negf %840 : vector<2x32xf32>
    %842 = math.exp %841 : vector<2x32xf32>
    %cst_232 = arith.constant 1.000000e+00 : f32
    %843 = vector.broadcast %cst_232 : f32 to vector<2x32xf32>
    %844 = arith.addf %843, %842 : vector<2x32xf32>
    %845 = arith.divf %843, %844 : vector<2x32xf32>
    %846 = vector.extract_strided_slice %833 {offsets = [0, 64], sizes = [2, 32], strides = [1, 1]} : vector<2x128xf32> to vector<2x32xf32>
    %847 = math.tanh %846 : vector<2x32xf32>
    %848 = vector.extract_strided_slice %833 {offsets = [0, 96], sizes = [2, 32], strides = [1, 1]} : vector<2x128xf32> to vector<2x32xf32>
    %849 = arith.negf %848 : vector<2x32xf32>
    %850 = math.exp %849 : vector<2x32xf32>
    %cst_233 = arith.constant 1.000000e+00 : f32
    %851 = vector.broadcast %cst_233 : f32 to vector<2x32xf32>
    %852 = arith.addf %851, %850 : vector<2x32xf32>
    %853 = arith.divf %851, %852 : vector<2x32xf32>
    %854 = arith.mulf %845, %828 : vector<2x32xf32>
    %855 = arith.mulf %839, %847 : vector<2x32xf32>
    %856 = arith.addf %854, %855 : vector<2x32xf32>
    %857 = math.tanh %856 : vector<2x32xf32>
    %858 = arith.mulf %853, %857 : vector<2x32xf32>
    %c4_234 = arith.constant 4 : index
    %c128_235 = arith.constant 128 : index
    %859 = vector.load %arg9[%c4_234, %c128_235] : memref<16x256xf32, #tpu.memory_space<vmem>>, vector<2x128xf32>
    %cst_236 = arith.constant dense<0.000000e+00> : vector<2x128xf32>
    %860 = tpu.matmul %858, %716, %cst_236 {dimension_numbers = #tpu.dot_dimension_numbers<[1], [0], [0], [1], [0, 0, 1, 1], [], []>} : vector<2x32xf32>, vector<32x128xf32>, vector<2x128xf32> -> vector<2x128xf32>
    %861 = arith.addf %859, %860 : vector<2x128xf32>
    %862 = vector.extract_strided_slice %861 {offsets = [0, 0], sizes = [2, 32], strides = [1, 1]} : vector<2x128xf32> to vector<2x32xf32>
    %863 = arith.negf %862 : vector<2x32xf32>
    %864 = math.exp %863 : vector<2x32xf32>
    %cst_237 = arith.constant 1.000000e+00 : f32
    %865 = vector.broadcast %cst_237 : f32 to vector<2x32xf32>
    %866 = arith.addf %865, %864 : vector<2x32xf32>
    %867 = arith.divf %865, %866 : vector<2x32xf32>
    %868 = vector.extract_strided_slice %861 {offsets = [0, 32], sizes = [2, 32], strides = [1, 1]} : vector<2x128xf32> to vector<2x32xf32>
    %869 = arith.negf %868 : vector<2x32xf32>
    %870 = math.exp %869 : vector<2x32xf32>
    %cst_238 = arith.constant 1.000000e+00 : f32
    %871 = vector.broadcast %cst_238 : f32 to vector<2x32xf32>
    %872 = arith.addf %871, %870 : vector<2x32xf32>
    %873 = arith.divf %871, %872 : vector<2x32xf32>
    %874 = vector.extract_strided_slice %861 {offsets = [0, 64], sizes = [2, 32], strides = [1, 1]} : vector<2x128xf32> to vector<2x32xf32>
    %875 = math.tanh %874 : vector<2x32xf32>
    %876 = vector.extract_strided_slice %861 {offsets = [0, 96], sizes = [2, 32], strides = [1, 1]} : vector<2x128xf32> to vector<2x32xf32>
    %877 = arith.negf %876 : vector<2x32xf32>
    %878 = math.exp %877 : vector<2x32xf32>
    %cst_239 = arith.constant 1.000000e+00 : f32
    %879 = vector.broadcast %cst_239 : f32 to vector<2x32xf32>
    %880 = arith.addf %879, %878 : vector<2x32xf32>
    %881 = arith.divf %879, %880 : vector<2x32xf32>
    %882 = arith.mulf %873, %856 : vector<2x32xf32>
    %883 = arith.mulf %867, %875 : vector<2x32xf32>
    %884 = arith.addf %882, %883 : vector<2x32xf32>
    %885 = math.tanh %884 : vector<2x32xf32>
    %886 = arith.mulf %881, %885 : vector<2x32xf32>
    %c2_240 = arith.constant 2 : index
    %c128_241 = arith.constant 128 : index
    %887 = vector.load %arg9[%c2_240, %c128_241] : memref<16x256xf32, #tpu.memory_space<vmem>>, vector<2x128xf32>
    %cst_242 = arith.constant dense<0.000000e+00> : vector<2x128xf32>
    %888 = tpu.matmul %886, %716, %cst_242 {dimension_numbers = #tpu.dot_dimension_numbers<[1], [0], [0], [1], [0, 0, 1, 1], [], []>} : vector<2x32xf32>, vector<32x128xf32>, vector<2x128xf32> -> vector<2x128xf32>
    %889 = arith.addf %887, %888 : vector<2x128xf32>
    %890 = vector.extract_strided_slice %889 {offsets = [0, 0], sizes = [2, 32], strides = [1, 1]} : vector<2x128xf32> to vector<2x32xf32>
    %891 = arith.negf %890 : vector<2x32xf32>
    %892 = math.exp %891 : vector<2x32xf32>
    %cst_243 = arith.constant 1.000000e+00 : f32
    %893 = vector.broadcast %cst_243 : f32 to vector<2x32xf32>
    %894 = arith.addf %893, %892 : vector<2x32xf32>
    %895 = arith.divf %893, %894 : vector<2x32xf32>
    %896 = vector.extract_strided_slice %889 {offsets = [0, 32], sizes = [2, 32], strides = [1, 1]} : vector<2x128xf32> to vector<2x32xf32>
    %897 = arith.negf %896 : vector<2x32xf32>
    %898 = math.exp %897 : vector<2x32xf32>
    %cst_244 = arith.constant 1.000000e+00 : f32
    %899 = vector.broadcast %cst_244 : f32 to vector<2x32xf32>
    %900 = arith.addf %899, %898 : vector<2x32xf32>
    %901 = arith.divf %899, %900 : vector<2x32xf32>
    %902 = vector.extract_strided_slice %889 {offsets = [0, 64], sizes = [2, 32], strides = [1, 1]} : vector<2x128xf32> to vector<2x32xf32>
    %903 = math.tanh %902 : vector<2x32xf32>
    %904 = vector.extract_strided_slice %889 {offsets = [0, 96], sizes = [2, 32], strides = [1, 1]} : vector<2x128xf32> to vector<2x32xf32>
    %905 = arith.negf %904 : vector<2x32xf32>
    %906 = math.exp %905 : vector<2x32xf32>
    %cst_245 = arith.constant 1.000000e+00 : f32
    %907 = vector.broadcast %cst_245 : f32 to vector<2x32xf32>
    %908 = arith.addf %907, %906 : vector<2x32xf32>
    %909 = arith.divf %907, %908 : vector<2x32xf32>
    %910 = arith.mulf %901, %884 : vector<2x32xf32>
    %911 = arith.mulf %895, %903 : vector<2x32xf32>
    %912 = arith.addf %910, %911 : vector<2x32xf32>
    %913 = math.tanh %912 : vector<2x32xf32>
    %914 = arith.mulf %909, %913 : vector<2x32xf32>
    %c0_246 = arith.constant 0 : index
    %c128_247 = arith.constant 128 : index
    %915 = vector.load %arg9[%c0_246, %c128_247] : memref<16x256xf32, #tpu.memory_space<vmem>>, vector<2x128xf32>
    %cst_248 = arith.constant dense<0.000000e+00> : vector<2x128xf32>
    %916 = tpu.matmul %914, %716, %cst_248 {dimension_numbers = #tpu.dot_dimension_numbers<[1], [0], [0], [1], [0, 0, 1, 1], [], []>} : vector<2x32xf32>, vector<32x128xf32>, vector<2x128xf32> -> vector<2x128xf32>
    %917 = arith.addf %915, %916 : vector<2x128xf32>
    %918 = vector.extract_strided_slice %917 {offsets = [0, 0], sizes = [2, 32], strides = [1, 1]} : vector<2x128xf32> to vector<2x32xf32>
    %919 = arith.negf %918 : vector<2x32xf32>
    %920 = math.exp %919 : vector<2x32xf32>
    %cst_249 = arith.constant 1.000000e+00 : f32
    %921 = vector.broadcast %cst_249 : f32 to vector<2x32xf32>
    %922 = arith.addf %921, %920 : vector<2x32xf32>
    %923 = arith.divf %921, %922 : vector<2x32xf32>
    %924 = vector.extract_strided_slice %917 {offsets = [0, 32], sizes = [2, 32], strides = [1, 1]} : vector<2x128xf32> to vector<2x32xf32>
    %925 = arith.negf %924 : vector<2x32xf32>
    %926 = math.exp %925 : vector<2x32xf32>
    %cst_250 = arith.constant 1.000000e+00 : f32
    %927 = vector.broadcast %cst_250 : f32 to vector<2x32xf32>
    %928 = arith.addf %927, %926 : vector<2x32xf32>
    %929 = arith.divf %927, %928 : vector<2x32xf32>
    %930 = vector.extract_strided_slice %917 {offsets = [0, 64], sizes = [2, 32], strides = [1, 1]} : vector<2x128xf32> to vector<2x32xf32>
    %931 = math.tanh %930 : vector<2x32xf32>
    %932 = vector.extract_strided_slice %917 {offsets = [0, 96], sizes = [2, 32], strides = [1, 1]} : vector<2x128xf32> to vector<2x32xf32>
    %933 = arith.negf %932 : vector<2x32xf32>
    %934 = math.exp %933 : vector<2x32xf32>
    %cst_251 = arith.constant 1.000000e+00 : f32
    %935 = vector.broadcast %cst_251 : f32 to vector<2x32xf32>
    %936 = arith.addf %935, %934 : vector<2x32xf32>
    %937 = arith.divf %935, %936 : vector<2x32xf32>
    %938 = arith.mulf %929, %912 : vector<2x32xf32>
    %939 = arith.mulf %923, %931 : vector<2x32xf32>
    %940 = arith.addf %938, %939 : vector<2x32xf32>
    %941 = math.tanh %940 : vector<2x32xf32>
    %942 = arith.mulf %937, %941 : vector<2x32xf32>
    %c0_252 = arith.constant 0 : index
    %c32_253 = arith.constant 32 : index
    %943 = vector.load %arg7[%c0_252, %c32_253] : memref<2x64xf32, #tpu.memory_space<vmem>>, vector<2x32xf32>
    tpu.vector_store %arg7[%c0_252, %c32_253], %942 {strides = array<i32>} : memref<2x64xf32, #tpu.memory_space<vmem>>, vector<2x32xf32>,
    return
  }
}

</mosaic_0001>

<bundles_post_ra>
// kernel: tpu_custom_call.1
= control target key start
LH: loop header
LB: loop body
LE: loop exit
PB: predicated region body
PF: predicated region fallthrough
CT: control target
= control target key end

     0   :  { %12 = vsyncpa [#allocation5], 0  ;;  %s5673_s0 = inlined_call_operand.hbm [shape: f32[16,32], index: 0, kind: input, shape index: {}]   ;;  %s5674_s1 = inlined_call_operand.hbm [shape: f32[32,256], index: 1, kind: input, shape index: {}]   ;;  %s5675_s2 = inlined_call_operand.hbm [shape: f32[2,32,128], index: 2, kind: input, shape index: {}]   ;;  %s5676_s3 = inlined_call_operand.vmem [shape: f32[1,256], index: 3, kind: input, shape index: {}]   ;;  %s5677_s4 = inlined_call_operand.hbm [shape: f32[64,256], index: 4, kind: input, shape index: {}]   ;;  %s5678_s5 = inlined_call_operand.hbm [shape: f32[2,32,128], index: 5, kind: input, shape index: {}]   ;;  %s5679_s6 = inlined_call_operand.vmem [shape: f32[1,256], index: 6, kind: input, shape index: {}]   ;;  %s5680_s7 = inlined_call_operand.hbm [shape: f32[2,64], index: 7, kind: output, shape index: {}]  }
   0x1   :  { %13 = vsyncpa [#allocation8], 0 }
   0x2   :  { %14 = vsyncpa [#allocation11], 0 }
   0x3   :  { %15 = vsyncpa [#allocation6], 0  ;;  %s5034_s24 = smov [#allocation7]   ;;  %s4894_s28 = scalar_lea.hbm %s5674_s1, 1024 }
   0x4   :  { %s33_s25 = sshll.u32 %s5034_s24, 4  ;;  %p4895_p0 = scmp.ne.s32.totalorder %s5674_s1, %s4894_s28  ;;  %s34_s25 = int_to_ptr.vmem [resolvable:$true] %s33_s25 }
   0x5   :  { %p4898_p1 = scmp.lt.u32.totalorder %s4894_s28, %s5674_s1 }
   0x7   :  { %p4900_p2 = pnand %p4898_p1, %p4895_p0 }
   0x9   :  { %4903 = shalt.err (!%p4900_p2)
}
   0xa   :  { %s4904_s10 = scalar_lea.vmem %s34_s25, 1024  ;;  %p4909_p4 = scmp.lt.s32.totalorder %s34_s25, %s34_s25 }
   0xb   :  { %p4905_p3 = scmp.ne.s32.totalorder %s34_s25, %s4904_s10  ;;  %p4910_p5 = scmp.lt.s32.totalorder %s4904_s10, %s4904_s10 }
   0xd   :  { %p4911_p6 = por %p4910_p5, %p4909_p4 }
   0xf   :  { %p4912_p7 = pnand %p4911_p6, %p4905_p3 }
  0x11   :  { %4915 = shalt.err (!%p4912_p7)
}
  0x12   :  { %s5035_s11 = smov 256   ;;  %s5036_s12 = smov 16  }
  0x13   :  { %39 = dma.hbm_to_vmem [thread:$0]  %s5674_s1, 1024, %s34_s25, [#allocation8], %s5035_s11, %s5035_s11, %s5036_s12  }
  0x14   :  { %s5037_s15 = smov [#allocation10]   ;;  %s5038_s17 = smov [#allocation4]  }
  0x15   :  { %s59_s16 = sshll.u32 %s5037_s15, 4  ;;  %s21_s18 = sshll.u32 %s5038_s17, 4  ;;  %s60_s16 = int_to_ptr.vmem [resolvable:$true] %s59_s16  ;;  %s22_s18 = int_to_ptr.vmem [resolvable:$true] %s21_s18 }
  0x16   :  { %s4916_s21 = scalar_lea.hbm %s5677_s4, 2048 }
  0x17   :  { %p4917_p8 = scmp.ne.s32.totalorder %s5677_s4, %s4916_s21  ;;  %p4920_p9 = scmp.lt.u32.totalorder %s4916_s21, %s5677_s4 }
  0x19   :  { %p4922_p10 = pnand %p4920_p9, %p4917_p8 }
  0x1b   :  { %4925 = shalt.err (!%p4922_p10)
}
  0x1c   :  { %s4926_s1 = scalar_lea.vmem %s60_s16, 2048  ;;  %p4931_p12 = scmp.lt.s32.totalorder %s60_s16, %s60_s16 }
  0x1d   :  { %p4927_p11 = scmp.ne.s32.totalorder %s60_s16, %s4926_s1  ;;  %p4932_p13 = scmp.lt.s32.totalorder %s4926_s1, %s4926_s1 }
  0x1f   :  { %p4933_p0 = por %p4932_p13, %p4931_p12 }
  0x21   :  { %p4934_p1 = pnand %p4933_p0, %p4927_p11 }
  0x23   :  { %4937 = shalt.err (!%p4934_p1)
}
  0x24   :  { %65 = dma.hbm_to_vmem [thread:$0]  %s5677_s4, 2048, %s60_s16, [#allocation11], %s5035_s11, %s5035_s11, %s5036_s12  }
  0x25   :  { %s4938_s30 = scalar_lea.hbm %s5673_s0, 256 }
  0x26   :  { %p4939_p2 = scmp.ne.s32.totalorder %s5673_s0, %s4938_s30  ;;  %p4942_p3 = scmp.lt.u32.totalorder %s4938_s30, %s5673_s0 }
  0x28   :  { %p4944_p4 = pnand %p4942_p3, %p4939_p2 }
  0x2a   :  { %4947 = shalt.err (!%p4944_p4)
}
  0x2b   :  { %s4948_s14 = scalar_lea.vmem %s22_s18, 256  ;;  %p4953_p6 = scmp.lt.s32.totalorder %s22_s18, %s22_s18 }
  0x2c   :  { %p4949_p5 = scmp.ne.s32.totalorder %s22_s18, %s4948_s14  ;;  %p4954_p7 = scmp.lt.s32.totalorder %s4948_s14, %s4948_s14 }
  0x2e   :  { %p4955_p8 = por %p4954_p7, %p4953_p6 }
  0x30   :  { %p4956_p9 = pnand %p4955_p8, %p4949_p5 }
  0x32   :  { %4959 = shalt.err (!%p4956_p9)
}
  0x33   :  { %s5039_s4 = smov 128   ;;  %s5040_s11 = smov 8  }
  0x34   :  { %27 = dma.hbm_to_vmem [thread:$0]  %s5673_s0, 256, %s22_s18, [#allocation5], %s5039_s4, %s5039_s4, %s5040_s11  }
  0x35   :  { %s5041_s16 = smov [#allocation9]   ;;  %s5042_s19 = smov [#allocation12]  }
  0x36   :  { %s45_s17 = sshll.u32 %s5041_s16, 4  ;;  %s71_s20 = sshll.u32 %s5042_s19, 4  ;;  %s46_s17 = int_to_ptr.vmem [resolvable:$true] %s45_s17  ;;  %s72_s20 = int_to_ptr.vmem [resolvable:$true] %s71_s20 }
  0x37   :  { %s4960_s23 = scalar_lea.hbm %s5675_s2, 1024 }
  0x38   :  { %p4961_p10 = scmp.ne.s32.totalorder %s5675_s2, %s4960_s23  ;;  %p4964_p11 = scmp.lt.u32.totalorder %s4960_s23, %s5675_s2 }
  0x3a   :  { %p4966_p12 = pnand %p4964_p11, %p4961_p10 }
  0x3c   :  { %4969 = shalt.err (!%p4966_p12)
}
  0x3d   :  { %s4970_s0 = scalar_lea.vmem %s46_s17, 1024  ;;  %p4975_p0 = scmp.lt.s32.totalorder %s46_s17, %s46_s17 }
  0x3e   :  { %p4971_p13 = scmp.ne.s32.totalorder %s46_s17, %s4970_s0  ;;  %p4976_p1 = scmp.lt.s32.totalorder %s4970_s0, %s4970_s0 }
  0x40   :  { %p4977_p2 = por %p4976_p1, %p4975_p0 }
  0x42   :  { %p4978_p3 = pnand %p4977_p2, %p4971_p13 }
  0x44   :  { %4981 = shalt.err (!%p4978_p3)
}
  0x45   :  { %51 = dma.hbm_to_vmem [thread:$0]  %s5675_s2, 1024, %s46_s17, [#allocation8], %s5039_s4, %s5039_s4, %s5040_s11  }
  0x46   :  { %s4982_s30 = scalar_lea.hbm %s5678_s5, 1024 }
  0x47   :  { %p4983_p4 = scmp.ne.s32.totalorder %s5678_s5, %s4982_s30  ;;  %p4986_p5 = scmp.lt.u32.totalorder %s4982_s30, %s5678_s5 }
  0x49   :  { %p4988_p6 = pnand %p4986_p5, %p4983_p4 }
  0x4b   :  { %4991 = shalt.err (!%p4988_p6)
}
  0x4c   :  { %s4992_s14 = scalar_lea.vmem %s72_s20, 1024  ;;  %p4997_p8 = scmp.lt.s32.totalorder %s72_s20, %s72_s20 }
  0x4d   :  { %p4993_p7 = scmp.ne.s32.totalorder %s72_s20, %s4992_s14  ;;  %p4998_p9 = scmp.lt.s32.totalorder %s4992_s14, %s4992_s14 }
  0x4f   :  { %p4999_p10 = por %p4998_p9, %p4997_p8 }
  0x51   :  { %p5000_p11 = pnand %p4999_p10, %p4993_p7 }
  0x53   :  { %5003 = shalt.err (!%p5000_p11)
}
  0x54   :  { %77 = dma.hbm_to_vmem [thread:$0]  %s5678_s5, 1024, %s72_s20, [#allocation11], %s5039_s4, %s5039_s4, %s5040_s11  }
  0x55   :  { %5026 = dma.done.wait [#allocation5], 256  }
  0x56   :  { %5027 = vsyncadd [#allocation5], 4294967040 }
  0x57   :  { %5028 = dma.done.wait [#allocation8], 2048  }
  0x58   :  { %5029 = vsyncadd [#allocation8], 4294965248 }
  0x59   :  { %5030 = dma.done.wait [#allocation11], 3072  }
  0x5a   :  { %5031 = vsyncadd [#allocation11], 4294964224  ;;  %v5043_v0 = vmov 0.0   ;;  %v5044_v1 = vmov 0.0|0.0   ;;  %vm5045_vm0 = vmmov 0   ;;  %v98_v2 = vld [vmem:[#allocation7 + $0x8] sm:$0xff]  ;;  %v107_v21 = vlaneseq }
  0x5b   :  { %188 = vmatprep.mubr.f32.mxu0 %v5043_v0  ;;  %4415 = vmatprep.subr.bf16.mxu1 %v5044_v1  ;;  %v100_v3 = vld [vmem:[#allocation7 + $0x18] sm:$0xff]  ;;  %v97_v4 = vld [vmem:[#allocation7] sm:$0xff]  ;;  %v99_v6 = vld [vmem:[#allocation7 + $0x10] sm:$0xff]  ;;  %vm117_vm1 = vcmask 261120   ;;  %s5047_s11 = smov 32   ;;  %vm312_vm2 = vcmask 254976  }
  0x5c   :  { %4063 = vmatprep.mubr.msk.f32.mxu1 %vm5045_vm0, %v5043_v0  ;;  %v4407_v5 = vpack.c.bf16 %v100_v3, %v98_v2  ;;  %v102_v7 = vld [vmem:[#allocation7 + $0x28] sm:$0xff]  ;;  %v104_v8 = vld [vmem:[#allocation7 + $0x38] sm:$0xff]  ;;  %v4409_v9 = vpack.c.bf16 %v99_v6, %v97_v4  ;;  %v101_v11 = vld [vmem:[#allocation7 + $0x20] sm:$0xff]  ;;  %v5184_v22 = vshrl.u32 %v107_v21, 7  ;;  %vm422_vm3 = vcmask 257026  }
  0x5d   :  { %v4411_v10 = vpack.c.bf16 %v104_v8, %v102_v7  ;;  %v103_v12 = vld [vmem:[#allocation7 + $0x30] sm:$0xff]  ;;  %v205_v13 = vld [vmem:[#allocation9] sm:$0xff]  ;;  %v206_v14 = vld [vmem:[#allocation9 + $0x8] sm:$0xff]  ;;  %vm648_vm4 = vcmask 261126   ;;  %vm535_vm5 = vcmask 259076   ;;  %vm1313_vm6 = vcmask 521476  }
  0x5e   :  { %4408 = vmatprep.subr.bf16.mxu0 %v4407_v5  ;;  %v207_v15 = vld [vmem:[#allocation9 + $0x10] sm:$0xff]  ;;  %v4413_v16 = vpack.c.bf16 %v103_v12, %v101_v11  ;;  %v5162_v17 = vpack.c.bf16 %v206_v14, %v205_v13  ;;  %v208_v18 = vld [vmem:[#allocation9 + $0x18] sm:$0xff]  ;;  %v109_v23 = vsub.s32 0, %v5184_v22  ;;  %v105_v24 = vld [vmem:[%s5676_s3] sm:$0x3]  ;;  %v113_v25 = vsub.s32 1, %v5184_v22 }
  0x5f   :  { %4410 = vmatpush1.bf16.msra.mxu0 %v4409_v9  ;;  %v5165_v19 = vpack.c.bf16 %v208_v18, %v207_v15  ;;  %v95_v20 = vld [vmem:[#allocation4] sm:$0xff]  ;;  %s5046_s3 = smov 64   ;;  %v96_v46 = vld [vmem:[#allocation4 + $0x8] sm:$0xff]  ;;  %vm1200_vm7 = vcmask 523526   ;;  %vm1426_vm8 = vcmask 519426   ;;  %vm1536_vm9 = vcmask 517376  }
  0x60   :  { %4412 = vmatprep.subr.bf16.mxu0 %v4411_v10  ;;  %4417 = vmatpush3.bf16.msra.mxu1 %v5162_v17  ;;  %v110_v26 = vrot.slane %v105_v24, %v109_v23  ;;  %v114_v27 = vrot.slane %v105_v24, %v113_v25  ;;  %vm2012_vm10 = vcmask 523264  }
  0x61   :  { %4418 = vmatprep.subr.bf16.mxu1 %v5044_v1 }
  0x63   :  { %4414 = vmatpush1.bf16.msra.mxu0 %v4413_v16 }
  0x64   :  { %4421 = vmatprep.subr.bf16.mxu0 %v5044_v1  ;;  %4420 = vmatpush3.bf16.msra.mxu1 %v5165_v19 }
  0x65   :  { %4427 = vmatprep.subr.bf16.mxu1 %v5044_v1 }
  0x66   :  { %3831 = vmatmul.mubr.msk.f32.vlgmr.msra.gmra.mrb[0].mxu0 %vm117_vm1, %v95_v20 }
  0x67   :  { %4423 = vmatpush3.bf16.msra.mxu0 %v5162_v17  ;;  %194 = vmatprep.mubr.f32.mxu0 %v5043_v0 }
  0x68   :  { %4064 = vmatmul.mubr.f32.vlgmr.msra.gmra.mrb[0].mxu1 %v5043_v0  ;;  %4424 = vmatprep.subr.bf16.mxu0 %v5044_v1 }
  0x69   :  { %4429 = vmatpush3.bf16.msra.mxu1 %v5162_v17  ;;  %4085 = vmatprep.mubr.msk.f32.mxu1 %vm5045_vm0, %v5043_v0 }
  0x6a   :  { %4430 = vmatprep.subr.bf16.mxu1 %v5044_v1  ;;  %3832 = vmatmul.mubr.msk.f32.gmra.mrb[2].mxu0 %vm117_vm1, %v96_v46 }
  0x6b   :  { %4426 = vmatpush3.bf16.msra.mxu0 %v5165_v19  ;;  %4074 = vmatprep.mubr.msk.f32.mxu0 %vm5045_vm0, %v5043_v0 }
  0x6c   :  { %4433 = vmatprep.subr.bf16.mxu0 %v5044_v1 }
  0x6d   :  { %4432 = vmatpush3.bf16.msra.mxu1 %v5165_v19 }
  0x6e   :  { %4439 = vmatprep.subr.bf16.mxu1 %v5044_v1 }
 0x139   :  { %v190_v28 = vpop.f32.mrb[0].mxu0 }
 0x13a   :  { %v191_v29 = vadd.f32 %v190_v28, %v110_v26  ;;  %v192_v30 = vpop.f32.mrb[1].mxu0 }
 0x13b   :  { %v193_v31 = vadd.f32 %v192_v30, %v114_v27  ;;  %v279_v32 = vpop.f32.mrb[0].mxu1 }
 0x13c   :  { %201 = vst [vmem:[#allocation3] sm:$0xff] %v191_v29  ;;  %v4065_v33 = vpop.f32.mrb[1].mxu1 }
 0x13d   :  { %202 = vst [vmem:[#allocation3 + $0x8] sm:$0xff] %v193_v31  ;;  %v196_v50 = vpop.f32.mrb[2].mxu0 }
 0x13e   :  { %v197_v51 = vadd.f32 %v196_v50, %v110_v26  ;;  %v198_v52 = vpop.f32.mrb[3].mxu0 }
 0x13f   :  { %v199_v53 = vadd.f32 %v198_v52, %v114_v27 }
 0x140   :  { %203 = vst [vmem:[#allocation3 + $0x10] sm:$0xff] %v197_v51 }
 0x141   :  { %204 = vst [vmem:[#allocation3 + $0x18] sm:$0xff] %v199_v53 }
 0x143   :  { %v209_v34 = vld [vmem:[#allocation3] sm:$0x3]  ;;  %v314_v58 = vld [vmem:[#allocation3] sm:$0xc]  ;;  %v424_v18 = vld [vmem:[#allocation3] sm:$0x30] }
 0x144   :  { %v283_v35 = vadd.f32 %v279_v32, %v209_v34 }
 0x146   :  { %4638 = vtanh.f32 %v283_v35  ;;  %v3833_v37 = vmul.f32 -1.442695, %v283_v35 }
 0x148   :  { %4640 = vpow2.f32 %v3833_v37 }
 0x150   :  { %v4639_v36 = vpop.eup %4638 }
 0x151   :  { %293 = vrot.lane.b32.xlu0 %v4639_v36, %s5046_s3 }
 0x152   :  { %v4641_v38 = vpop.eup %4640 }
 0x153   :  { %v287_v39 = vadd.f32 1.0, %v4641_v38 }
 0x155   :  { %4642 = vrcp.f32 %v287_v39 }
 0x15f   :  { %v4643_v40 = vpop.eup %4642 }
 0x160   :  { %v291_v43 = vmul.f32 0.0, %v4643_v40 }
 0x1c3   :  { %v294_v41 = vpop.permute.xlu0 %293 }
 0x1c4   :  { %v296_v42 = vmul.f32 %v4643_v40, %v294_v41 }
 0x1c6   :  { %298 = vrot.lane.b32.xlu0 %v296_v42, %s5047_s11 }
 0x238   :  { %v299_v44 = vpop.permute.xlu0 %298 }
 0x239   :  { %v301_v45 = vadd.f32 %v299_v44, %v291_v43  ;;  %v537_v43 = vld [vmem:[#allocation3] sm:$0xc0] }
 0x23b   :  { %4644 = vtanh.f32 %v301_v45  ;;  %v399_v5 = vrot.slane %v301_v45, 6 }
 0x245   :  { %v4645_v47 = vpop.eup %4644 }
 0x246   :  { %304 = vrot.lane.b32.xlu1 %v4645_v47, %s5046_s3 }
 0x2b8   :  { %v305_v48 = vpop.permute.xlu1 %304 }
 0x2b9   :  { %v307_v49 = vmul.f32 %v4643_v40, %v305_v48 }
 0x2bb   :  { %309 = vrot.lane.b32.xlu1 %v307_v49, %s5047_s11 }
 0x32d   :  { %v310_v54 = vpop.permute.xlu1 %309 }
 0x32e   :  { %313 = vst.msk [vmem:[#allocation2] sm:$0x3] %vm312_vm2, %v310_v54  ;;  %4075 = vmatmul.mubr.msk.f32.vlgmr.msra.gmra.mrb[4].mxu0 %vm117_vm1, %v310_v54 }
 0x32f   :  { %4435 = vmatpush3.bf16.msra.mxu0 %v5162_v17  ;;  %4096 = vmatprep.mubr.msk.f32.mxu0 %vm5045_vm0, %v5043_v0 }
 0x330   :  { %4436 = vmatprep.subr.bf16.mxu0 %v5044_v1 }
 0x333   :  { %4438 = vmatpush3.bf16.msra.mxu0 %v5165_v19 }
 0x334   :  { %4445 = vmatprep.subr.bf16.mxu0 %v5044_v1 }
 0x401   :  { %v383_v55 = vpop.f32.mrb[4].mxu0 }
 0x402   :  { %v388_v56 = vrot.slane %v383_v55, 6  ;;  %v4076_v57 = vpop.f32.mrb[5].mxu0 }
 0x404   :  { %v390_v59 = vadd.f32 %v388_v56, %v314_v58 }
 0x406   :  { %4646 = vtanh.f32 %v390_v59  ;;  %v3835_v61 = vmul.f32 -1.442695, %v390_v59 }
 0x408   :  { %4648 = vpow2.f32 %v3835_v61  ;;  %v650_v61 = vld [vmem:[#allocation3 + $0x10] sm:$0x3] }
 0x410   :  { %v4647_v60 = vpop.eup %4646 }
 0x411   :  { %403 = vrot.lane.b32.xlu0 %v4647_v60, %s5046_s3 }
 0x412   :  { %v4649_v62 = vpop.eup %4648 }
 0x413   :  { %v394_v63 = vadd.f32 1.0, %v4649_v62 }
 0x415   :  { %4650 = vrcp.f32 %v394_v63 }
 0x41f   :  { %v4651_v2 = vpop.eup %4650 }
 0x420   :  { %v401_v6 = vmul.f32 %v4651_v2, %v399_v5 }
 0x483   :  { %v404_v3 = vpop.permute.xlu0 %403 }
 0x484   :  { %v406_v4 = vmul.f32 %v4651_v2, %v404_v3 }
 0x486   :  { %408 = vrot.lane.b32.xlu1 %v406_v4, %s5047_s11 }
 0x4f8   :  { %v409_v7 = vpop.permute.xlu1 %408 }
 0x4f9   :  { %v411_v8 = vadd.f32 %v409_v7, %v401_v6 }
 0x4fb   :  { %4652 = vtanh.f32 %v411_v8  ;;  %v512_v31 = vrot.slane %v411_v8, 6 }
 0x505   :  { %v4653_v9 = vpop.eup %4652 }
 0x506   :  { %414 = vrot.lane.b32.xlu0 %v4653_v9, %s5046_s3 }
 0x578   :  { %v415_v10 = vpop.permute.xlu0 %414 }
 0x579   :  { %v5213_v11 = vmul.f32 %v4651_v2, %v415_v10 }
 0x57b   :  { %v425_v12 = vrot.slane %v5213_v11, 2 }
 0x57d   :  { %426 = vrot.lane.b32.xlu1 %v425_v12, %s5047_s11 }
 0x5ef   :  { %v427_v13 = vpop.permute.xlu1 %426 }
 0x5f0   :  { %4086 = vmatmul.mubr.msk.f32.vlgmr.msra.gmra.mrb[2].mxu1 %vm117_vm1, %v427_v13 }
 0x5f1   :  { %4441 = vmatpush3.bf16.msra.mxu1 %v5162_v17  ;;  %4107 = vmatprep.mubr.msk.f32.mxu1 %vm5045_vm0, %v5043_v0 }
 0x5f2   :  { %4442 = vmatprep.subr.bf16.mxu1 %v5044_v1 }
 0x5f5   :  { %4444 = vmatpush3.bf16.msra.mxu1 %v5165_v19 }
 0x5f6   :  { %4451 = vmatprep.subr.bf16.mxu1 %v5044_v1 }
 0x6c3   :  { %v496_v14 = vpop.f32.mrb[2].mxu1 }
 0x6c4   :  { %v501_v15 = vrot.slane %v496_v14, 4  ;;  %v4087_v16 = vpop.f32.mrb[3].mxu1 }
 0x6c6   :  { %v503_v20 = vadd.f32 %v501_v15, %v424_v18 }
 0x6c8   :  { %4654 = vtanh.f32 %v503_v20  ;;  %v3837_v24 = vmul.f32 -1.442695, %v503_v20 }
 0x6ca   :  { %4656 = vpow2.f32 %v3837_v24 }
 0x6d2   :  { %v4655_v21 = vpop.eup %4654 }
 0x6d3   :  { %516 = vrot.lane.b32.xlu0 %v4655_v21, %s5046_s3 }
 0x6d4   :  { %v4657_v26 = vpop.eup %4656 }
 0x6d5   :  { %v507_v27 = vadd.f32 1.0, %v4657_v26 }
 0x6d7   :  { %4658 = vrcp.f32 %v507_v27  ;;  %v759_v27 = vld [vmem:[#allocation3 + $0x10] sm:$0xc] }
 0x6e1   :  { %v4659_v28 = vpop.eup %4658 }
 0x6e2   :  { %v514_v32 = vmul.f32 %v4659_v28, %v512_v31 }
 0x745   :  { %v517_v29 = vpop.permute.xlu0 %516 }
 0x746   :  { %v519_v30 = vmul.f32 %v4659_v28, %v517_v29 }
 0x748   :  { %521 = vrot.lane.b32.xlu1 %v519_v30, %s5047_s11 }
 0x7ba   :  { %v522_v33 = vpop.permute.xlu1 %521 }
 0x7bb   :  { %v524_v34 = vadd.f32 %v522_v33, %v514_v32 }
 0x7bd   :  { %4660 = vtanh.f32 %v524_v34  ;;  %v625_v52 = vrot.slane %v524_v34, 6 }
 0x7c7   :  { %v4661_v35 = vpop.eup %4660 }
 0x7c8   :  { %527 = vrot.lane.b32.xlu0 %v4661_v35, %s5046_s3 }
 0x83a   :  { %v528_v36 = vpop.permute.xlu0 %527 }
 0x83b   :  { %v5227_v37 = vmul.f32 %v4659_v28, %v528_v36 }
 0x83d   :  { %v538_v38 = vrot.slane %v5227_v37, 4 }
 0x83f   :  { %539 = vrot.lane.b32.xlu1 %v538_v38, %s5047_s11 }
 0x8b1   :  { %v540_v39 = vpop.permute.xlu1 %539 }
 0x8b2   :  { %4097 = vmatmul.mubr.msk.f32.vlgmr.msra.gmra.mrb[6].mxu0 %vm117_vm1, %v540_v39 }
 0x8b3   :  { %4447 = vmatpush3.bf16.msra.mxu0 %v5162_v17  ;;  %4118 = vmatprep.mubr.msk.f32.mxu0 %vm5045_vm0, %v5043_v0 }
 0x8b4   :  { %4448 = vmatprep.subr.bf16.mxu0 %v5044_v1 }
 0x8b7   :  { %4450 = vmatpush3.bf16.msra.mxu0 %v5165_v19 }
 0x8b8   :  { %4457 = vmatprep.subr.bf16.mxu0 %v5044_v1 }
 0x985   :  { %v609_v40 = vpop.f32.mrb[6].mxu0 }
 0x986   :  { %v614_v41 = vrot.slane %v609_v40, 2  ;;  %v4098_v42 = vpop.f32.mrb[7].mxu0 }
 0x988   :  { %v616_v44 = vadd.f32 %v614_v41, %v537_v43  ;;  %v1093_v43 = vld [vmem:[#allocation9 + $0x20] sm:$0xff] }
 0x98a   :  { %4662 = vtanh.f32 %v616_v44  ;;  %v3839_v46 = vmul.f32 -1.442695, %v616_v44  ;;  %v1094_v44 = vld [vmem:[#allocation9 + $0x28] sm:$0xff] }
 0x98c   :  { %4664 = vpow2.f32 %v3839_v46  ;;  %v1095_v46 = vld [vmem:[#allocation9 + $0x30] sm:$0xff] }
 0x994   :  { %v4663_v45 = vpop.eup %4662 }
 0x995   :  { %629 = vrot.lane.b32.xlu0 %v4663_v45, %s5046_s3  ;;  %v5274_v45 = vpack.c.bf16 %v1094_v44, %v1093_v43 }
 0x996   :  { %v4665_v47 = vpop.eup %4664 }
 0x997   :  { %v620_v48 = vadd.f32 1.0, %v4665_v47  ;;  %v1096_v47 = vld [vmem:[#allocation9 + $0x38] sm:$0xff] }
 0x999   :  { %4666 = vrcp.f32 %v620_v48 }
 0x9a3   :  { %v4667_v49 = vpop.eup %4666 }
 0x9a4   :  { %v627_v53 = vmul.f32 %v4667_v49, %v625_v52 }
 0xa07   :  { %v630_v50 = vpop.permute.xlu0 %629 }
 0xa08   :  { %v632_v51 = vmul.f32 %v4667_v49, %v630_v50 }
 0xa0a   :  { %634 = vrot.lane.b32.xlu1 %v632_v51, %s5047_s11 }
 0xa7c   :  { %v635_v54 = vpop.permute.xlu1 %634 }
 0xa7d   :  { %v637_v55 = vadd.f32 %v635_v54, %v627_v53  ;;  %v868_v53 = vld [vmem:[#allocation3 + $0x10] sm:$0x30] }
 0xa7f   :  { %4668 = vtanh.f32 %v637_v55  ;;  %v735_v10 = vrot.slane %v637_v55, 6 }
 0xa89   :  { %v4669_v56 = vpop.eup %4668 }
 0xa8a   :  { %640 = vrot.lane.b32.xlu0 %v4669_v56, %s5046_s3 }
 0xafc   :  { %v641_v57 = vpop.permute.xlu0 %640 }
 0xafd   :  { %v5241_v58 = vmul.f32 %v4667_v49, %v641_v57  ;;  %v5278_v49 = vpack.c.bf16 %v1096_v47, %v1095_v46 }
 0xaff   :  { %v651_v59 = vrot.slane %v5241_v58, 6 }
 0xb01   :  { %652 = vrot.lane.b32.xlu1 %v651_v59, %s5047_s11  ;;  %v1097_v59 = vld [vmem:[#allocation3 + $0x18] sm:$0xc0] }
 0xb73   :  { %v653_v60 = vpop.permute.xlu1 %652 }
 0xb74   :  { %4108 = vmatmul.mubr.msk.f32.vlgmr.msra.gmra.mrb[4].mxu1 %vm117_vm1, %v653_v60 }
 0xb75   :  { %4453 = vmatpush3.bf16.msra.mxu1 %v5162_v17  ;;  %4129 = vmatprep.mubr.msk.f32.mxu1 %vm5045_vm0, %v5043_v0 }
 0xb76   :  { %4454 = vmatprep.subr.bf16.mxu1 %v5044_v1 }
 0xb79   :  { %4456 = vmatpush3.bf16.msra.mxu1 %v5165_v19 }
 0xb7a   :  { %4463 = vmatprep.subr.bf16.mxu1 %v5044_v1 }
 0xc47   :  { %v722_v62 = vpop.f32.mrb[4].mxu1 }
 0xc48   :  { %v726_v63 = vadd.f32 %v722_v62, %v650_v61  ;;  %v4109_v2 = vpop.f32.mrb[5].mxu1 }
 0xc4a   :  { %4670 = vtanh.f32 %v726_v63  ;;  %v3841_v4 = vmul.f32 -1.442695, %v726_v63 }
 0xc4c   :  { %4672 = vpow2.f32 %v3841_v4 }
 0xc54   :  { %v4671_v3 = vpop.eup %4670 }
 0xc55   :  { %739 = vrot.lane.b32.xlu0 %v4671_v3, %s5046_s3 }
 0xc56   :  { %v4673_v5 = vpop.eup %4672 }
 0xc57   :  { %v730_v6 = vadd.f32 1.0, %v4673_v5 }
 0xc59   :  { %4674 = vrcp.f32 %v730_v6 }
 0xc63   :  { %v4675_v7 = vpop.eup %4674 }
 0xc64   :  { %v737_v12 = vmul.f32 %v4675_v7, %v735_v10 }
 0xcc7   :  { %v740_v8 = vpop.permute.xlu0 %739 }
 0xcc8   :  { %v742_v9 = vmul.f32 %v4675_v7, %v740_v8 }
 0xcca   :  { %744 = vrot.lane.b32.xlu1 %v742_v9, %s5047_s11 }
 0xd3c   :  { %v745_v13 = vpop.permute.xlu1 %744 }
 0xd3d   :  { %v747_v14 = vadd.f32 %v745_v13, %v737_v12 }
 0xd3f   :  { %4676 = vtanh.f32 %v747_v14 }
 0xd49   :  { %v4677_v15 = vpop.eup %4676 }
 0xd4a   :  { %750 = vrot.lane.b32.xlu0 %v4677_v15, %s5046_s3 }
 0xdbc   :  { %v751_v16 = vpop.permute.xlu0 %750 }
 0xdbd   :  { %v753_v18 = vmul.f32 %v4675_v7, %v751_v16 }
 0xdbf   :  { %755 = vrot.lane.b32.xlu1 %v753_v18, %s5047_s11 }
 0xe31   :  { %v756_v20 = vpop.permute.xlu1 %755 }
 0xe32   :  { %758 = vst.msk [vmem:[#allocation2 + $0x8] sm:$0x3] %vm312_vm2, %v756_v20  ;;  %4119 = vmatmul.mubr.msk.f32.vlgmr.msra.gmra.mrb[8].mxu0 %vm117_vm1, %v756_v20 }
 0xe33   :  { %4459 = vmatpush3.bf16.msra.mxu0 %v5162_v17  ;;  %4140 = vmatprep.mubr.msk.f32.mxu0 %vm5045_vm0, %v5043_v0 }
 0xe34   :  { %4460 = vmatprep.subr.bf16.mxu0 %v5044_v1 }
 0xe37   :  { %4462 = vmatpush3.bf16.msra.mxu0 %v5165_v19  ;;  %v844_v19 = vrot.slane %v747_v14, 6 }
 0xe38   :  { %4469 = vmatprep.subr.bf16.mxu0 %v5044_v1 }
 0xf05   :  { %v828_v21 = vpop.f32.mrb[8].mxu0 }
 0xf06   :  { %v833_v24 = vrot.slane %v828_v21, 6  ;;  %v4120_v26 = vpop.f32.mrb[9].mxu0 }
 0xf08   :  { %v835_v28 = vadd.f32 %v833_v24, %v759_v27 }
 0xf0a   :  { %4678 = vtanh.f32 %v835_v28  ;;  %v3843_v30 = vmul.f32 -1.442695, %v835_v28 }
 0xf0c   :  { %4680 = vpow2.f32 %v3843_v30 }
 0xf14   :  { %v4679_v29 = vpop.eup %4678 }
 0xf15   :  { %848 = vrot.lane.b32.xlu0 %v4679_v29, %s5046_s3 }
 0xf16   :  { %v4681_v17 = vpop.eup %4680 }
 0xf17   :  { %v839_v31 = vadd.f32 1.0, %v4681_v17 }
 0xf19   :  { %4682 = vrcp.f32 %v839_v31 }
 0xf23   :  { %v4683_v32 = vpop.eup %4682 }
 0xf24   :  { %v846_v35 = vmul.f32 %v4683_v32, %v844_v19 }
 0xf87   :  { %v849_v33 = vpop.permute.xlu0 %848 }
 0xf88   :  { %v851_v34 = vmul.f32 %v4683_v32, %v849_v33 }
 0xf8a   :  { %853 = vrot.lane.b32.xlu1 %v851_v34, %s5047_s11 }
 0xffc   :  { %v854_v36 = vpop.permute.xlu1 %853 }
 0xffd   :  { %v5266_v38 = vadd.f32 %v854_v36, %v846_v35 }
 0xfff   :  { %4684 = vtanh.f32 %v5266_v38  ;;  %v956_v14 = vrot.slane %v5266_v38, 6 }
0x1009   :  { %v4685_v39 = vpop.eup %4684 }
0x100a   :  { %859 = vrot.lane.b32.xlu0 %v4685_v39, %s5046_s3 }
0x107c   :  { %v860_v40 = vpop.permute.xlu0 %859 }
0x107d   :  { %v5270_v41 = vmul.f32 %v4683_v32, %v860_v40  ;;  %v1202_v40 = vld [vmem:[#allocation3 + $0x18] sm:$0x30] }
0x107f   :  { %v869_v42 = vrot.slane %v5270_v41, 2 }
0x1081   :  { %870 = vrot.lane.b32.xlu1 %v869_v42, %s5047_s11 }
0x10f3   :  { %v871_v48 = vpop.permute.xlu1 %870 }
0x10f4   :  { %4130 = vmatmul.mubr.msk.f32.vlgmr.msra.gmra.mrb[6].mxu1 %vm117_vm1, %v871_v48 }
0x10f5   :  { %4465 = vmatpush3.bf16.msra.mxu1 %v5274_v45  ;;  %4151 = vmatprep.mubr.msk.f32.mxu1 %vm5045_vm0, %v5043_v0 }
0x10f6   :  { %4466 = vmatprep.subr.bf16.mxu1 %v5044_v1 }
0x10f9   :  { %4468 = vmatpush3.bf16.msra.mxu1 %v5278_v49 }
0x10fa   :  { %4475 = vmatprep.subr.bf16.mxu1 %v5044_v1 }
0x10fc   :  { %4152 = vmatmul.mubr.f32.vlgmr.msra.gmra.mrb[8].mxu1 %v5043_v0 }
0x10fd   :  { %4477 = vmatpush3.bf16.msra.mxu1 %v5274_v45  ;;  %4173 = vmatprep.mubr.msk.f32.mxu1 %vm5045_vm0, %v5043_v0 }
0x10fe   :  { %4478 = vmatprep.subr.bf16.mxu1 %v5044_v1 }
0x1101   :  { %4480 = vmatpush3.bf16.msra.mxu1 %v5278_v49 }
0x1102   :  { %4487 = vmatprep.subr.bf16.mxu1 %v5044_v1 }
0x11c7   :  { %v940_v50 = vpop.f32.mrb[6].mxu1 }
0x11c8   :  { %v945_v51 = vrot.slane %v940_v50, 4  ;;  %v4131_v52 = vpop.f32.mrb[7].mxu1 }
0x11ca   :  { %v947_v54 = vadd.f32 %v945_v51, %v868_v53 }
0x11cc   :  { %4686 = vtanh.f32 %v947_v54  ;;  %v3845_v63 = vmul.f32 -1.442695, %v947_v54 }
0x11cf   :  { %v1164_v55 = vpop.f32.mrb[8].mxu1 }
0x11d0   :  { %v1169_v56 = vrot.slane %v1164_v55, 2  ;;  %v4153_v57 = vpop.f32.mrb[9].mxu1 }
0x11d2   :  { %v1171_v60 = vadd.f32 %v1169_v56, %v1097_v59 }
0x11d4   :  { %4688 = vtanh.f32 %v1171_v60  ;;  %v3848_v2 = vmul.f32 -1.442695, %v1171_v60 }
0x11d5   :  { %4690 = vpow2.f32 %v3845_v63 }
0x11d6   :  { %v4687_v61 = vpop.eup %4686  ;;  %4692 = vpow2.f32 %v3848_v2 }
0x11d7   :  { %960 = vrot.lane.b32.xlu0 %v4687_v61, %s5046_s3 }
0x11de   :  { %v4689_v62 = vpop.eup %4688 }
0x11df   :  { %1181 = vrot.lane.b32.xlu1 %v4689_v62, %s5046_s3  ;;  %v4691_v3 = vpop.eup %4690 }
0x11e0   :  { %v951_v4 = vadd.f32 1.0, %v4691_v3  ;;  %v4693_v5 = vpop.eup %4692  ;;  %v1315_v3 = vld [vmem:[#allocation3 + $0x18] sm:$0xc] }
0x11e1   :  { %v1175_v6 = vadd.f32 1.0, %v4693_v5 }
0x11e2   :  { %4694 = vrcp.f32 %v951_v4 }
0x11e3   :  { %4696 = vrcp.f32 %v1175_v6 }
0x11ec   :  { %v4695_v7 = vpop.eup %4694 }
0x11ed   :  { %v4697_v10 = vpop.eup %4696  ;;  %v958_v15 = vmul.f32 %v4695_v7, %v956_v14 }
0x11ee   :  { %v1179_v20 = vmul.f32 0.0, %v4697_v10 }
0x1249   :  { %v961_v8 = vpop.permute.xlu0 %960 }
0x124a   :  { %v963_v9 = vmul.f32 %v4695_v7, %v961_v8 }
0x124c   :  { %965 = vrot.lane.b32.xlu0 %v963_v9, %s5047_s11 }
0x1251   :  { %v1182_v12 = vpop.permute.xlu1 %1181 }
0x1252   :  { %v1184_v13 = vmul.f32 %v4697_v10, %v1182_v12 }
0x1254   :  { %1186 = vrot.lane.b32.xlu1 %v1184_v13, %s5047_s11 }
0x12be   :  { %v966_v16 = vpop.permute.xlu0 %965 }
0x12bf   :  { %v5297_v18 = vadd.f32 %v966_v16, %v958_v15 }
0x12c1   :  { %4698 = vtanh.f32 %v5297_v18 }
0x12c6   :  { %v1187_v21 = vpop.permute.xlu1 %1186 }
0x12c7   :  { %v1189_v24 = vadd.f32 %v1187_v21, %v1179_v20 }
0x12c9   :  { %4700 = vtanh.f32 %v1189_v24  ;;  %v1290_v52 = vrot.slane %v1189_v24, 2 }
0x12cb   :  { %v4699_v26 = vpop.eup %4698 }
0x12cc   :  { %971 = vrot.lane.b32.xlu0 %v4699_v26, %s5046_s3 }
0x12d3   :  { %v4701_v27 = vpop.eup %4700 }
0x12d4   :  { %1192 = vrot.lane.b32.xlu1 %v4701_v27, %s5046_s3 }
0x133e   :  { %v972_v28 = vpop.permute.xlu0 %971 }
0x133f   :  { %v5302_v29 = vmul.f32 %v4695_v7, %v972_v28  ;;  %v1428_v28 = vld [vmem:[#allocation3 + $0x18] sm:$0x3] }
0x1341   :  { %v981_v30 = vrot.slane %v5302_v29, 4 }
0x1343   :  { %982 = vrot.lane.b32.xlu0 %v981_v30, %s5047_s11 }
0x1346   :  { %v1193_v17 = vpop.permute.xlu1 %1192 }
0x1347   :  { %v5306_v31 = vmul.f32 %v4697_v10, %v1193_v17 }
0x1349   :  { %v1203_v32 = vrot.slane %v5306_v31, 6 }
0x134b   :  { %1204 = vrot.lane.b32.xlu1 %v1203_v32, %s5047_s11 }
0x13b5   :  { %v983_v33 = vpop.permute.xlu0 %982 }
0x13b6   :  { %4141 = vmatmul.mubr.msk.f32.vlgmr.msra.gmra.mrb[10].mxu0 %vm117_vm1, %v983_v33 }
0x13b7   :  { %4471 = vmatpush3.bf16.msra.mxu0 %v5274_v45  ;;  %4162 = vmatprep.mubr.msk.f32.mxu0 %vm5045_vm0, %v5043_v0 }
0x13b8   :  { %4472 = vmatprep.subr.bf16.mxu0 %v5044_v1 }
0x13bb   :  { %4474 = vmatpush3.bf16.msra.mxu0 %v5278_v49 }
0x13bc   :  { %4481 = vmatprep.subr.bf16.mxu0 %v5044_v1 }
0x13bd   :  { %v1205_v34 = vpop.permute.xlu1 %1204 }
0x13be   :  { %4163 = vmatmul.mubr.msk.f32.vlgmr.msra.gmra.mrb[12].mxu0 %vm117_vm1, %v1205_v34 }
0x13bf   :  { %4483 = vmatpush3.bf16.msra.mxu0 %v5274_v45  ;;  %4184 = vmatprep.mubr.msk.f32.mxu0 %vm5045_vm0, %v5043_v0 }
0x13c0   :  { %4484 = vmatprep.subr.bf16.mxu0 %v5044_v1 }
0x13c3   :  { %4486 = vmatpush3.bf16.msra.mxu0 %v5278_v49 }
0x13c4   :  { %4493 = vmatprep.subr.bf16.mxu0 %v5044_v1 }
0x1489   :  { %v5324_v19 = vpop.f32.mrb[10].mxu0 }
0x148a   :  { %v4142_v35 = vpop.f32.mrb[11].mxu0 }
0x1491   :  { %v1274_v36 = vpop.f32.mrb[12].mxu0 }
0x1492   :  { %v1279_v38 = vrot.slane %v1274_v36, 4  ;;  %v4164_v39 = vpop.f32.mrb[13].mxu0 }
0x1494   :  { %v1281_v42 = vadd.f32 %v1279_v38, %v1202_v40 }
0x1496   :  { %4702 = vtanh.f32 %v1281_v42  ;;  %v3850_v44 = vmul.f32 -1.442695, %v1281_v42 }
0x1498   :  { %4704 = vpow2.f32 %v3850_v44 }
0x14a0   :  { %v4703_v43 = vpop.eup %4702 }
0x14a1   :  { %1294 = vrot.lane.b32.xlu0 %v4703_v43, %s5046_s3 }
0x14a2   :  { %v4705_v46 = vpop.eup %4704 }
0x14a3   :  { %v1285_v47 = vadd.f32 1.0, %v4705_v46 }
0x14a5   :  { %4706 = vrcp.f32 %v1285_v47 }
0x14af   :  { %v4707_v48 = vpop.eup %4706 }
0x14b0   :  { %v1292_v53 = vmul.f32 %v4707_v48, %v1290_v52 }
0x1513   :  { %v1295_v50 = vpop.permute.xlu0 %1294 }
0x1514   :  { %v1297_v51 = vmul.f32 %v4707_v48, %v1295_v50 }
0x1516   :  { %1299 = vrot.lane.b32.xlu1 %v1297_v51, %s5047_s11 }
0x1588   :  { %v1300_v54 = vpop.permute.xlu1 %1299 }
0x1589   :  { %v1302_v55 = vadd.f32 %v1300_v54, %v1292_v53 }
0x158b   :  { %4708 = vtanh.f32 %v1302_v55  ;;  %v1403_v13 = vrot.slane %v1302_v55, 2  ;;  %v1538_v55 = vld [vmem:[#allocation3 + $0x8] sm:$0xc0] }
0x1595   :  { %v4709_v56 = vpop.eup %4708 }
0x1596   :  { %1305 = vrot.lane.b32.xlu0 %v4709_v56, %s5046_s3 }
0x1608   :  { %v1306_v57 = vpop.permute.xlu0 %1305 }
0x1609   :  { %v5329_v59 = vmul.f32 %v4707_v48, %v1306_v57 }
0x160b   :  { %v1316_v60 = vrot.slane %v5329_v59, 4 }
0x160d   :  { %1317 = vrot.lane.b32.xlu1 %v1316_v60, %s5047_s11 }
0x167f   :  { %v1318_v61 = vpop.permute.xlu1 %1317 }
0x1680   :  { %4174 = vmatmul.mubr.msk.f32.vlgmr.msra.gmra.mrb[10].mxu1 %vm117_vm1, %v1318_v61 }
0x1681   :  { %4489 = vmatpush3.bf16.msra.mxu1 %v5274_v45  ;;  %4195 = vmatprep.mubr.msk.f32.mxu1 %vm5045_vm0, %v5043_v0 }
0x1682   :  { %4490 = vmatprep.subr.bf16.mxu1 %v5044_v1 }
0x1685   :  { %4492 = vmatpush3.bf16.msra.mxu1 %v5278_v49 }
0x1686   :  { %4499 = vmatprep.subr.bf16.mxu1 %v5044_v1 }
0x1753   :  { %v1387_v62 = vpop.f32.mrb[10].mxu1 }
0x1754   :  { %v1392_v63 = vrot.slane %v1387_v62, 6  ;;  %v4175_v2 = vpop.f32.mrb[11].mxu1 }
0x1756   :  { %v1394_v4 = vadd.f32 %v1392_v63, %v1315_v3 }
0x1758   :  { %4710 = vtanh.f32 %v1394_v4  ;;  %v3852_v6 = vmul.f32 -1.442695, %v1394_v4 }
0x175a   :  { %4712 = vpow2.f32 %v3852_v6 }
0x1762   :  { %v4711_v5 = vpop.eup %4710 }
0x1763   :  { %1407 = vrot.lane.b32.xlu0 %v4711_v5, %s5046_s3 }
0x1764   :  { %v4713_v7 = vpop.eup %4712 }
0x1765   :  { %v1398_v8 = vadd.f32 1.0, %v4713_v7 }
0x1767   :  { %4714 = vrcp.f32 %v1398_v8 }
0x1771   :  { %v4715_v9 = vpop.eup %4714 }
0x1772   :  { %v1405_v14 = vmul.f32 %v4715_v9, %v1403_v13 }
0x17d5   :  { %v1408_v10 = vpop.permute.xlu0 %1407 }
0x17d6   :  { %v1410_v12 = vmul.f32 %v4715_v9, %v1408_v10 }
0x17d8   :  { %1412 = vrot.lane.b32.xlu1 %v1410_v12, %s5047_s11 }
0x184a   :  { %v1413_v15 = vpop.permute.xlu1 %1412 }
0x184b   :  { %v1415_v16 = vadd.f32 %v1413_v15, %v1405_v14 }
0x184d   :  { %4716 = vtanh.f32 %v1415_v16  ;;  %v1513_v42 = vrot.slane %v1415_v16, 2 }
0x1857   :  { %v4717_v20 = vpop.eup %4716 }
0x1858   :  { %1418 = vrot.lane.b32.xlu0 %v4717_v20, %s5046_s3  ;;  %v1649_v20 = vld [vmem:[#allocation3 + $0x8] sm:$0x30] }
0x18ca   :  { %v1419_v21 = vpop.permute.xlu0 %1418 }
0x18cb   :  { %v5343_v24 = vmul.f32 %v4715_v9, %v1419_v21 }
0x18cd   :  { %v1429_v26 = vrot.slane %v5343_v24, 2 }
0x18cf   :  { %1430 = vrot.lane.b32.xlu1 %v1429_v26, %s5047_s11 }
0x1941   :  { %v1431_v27 = vpop.permute.xlu1 %1430 }
0x1942   :  { %4185 = vmatmul.mubr.msk.f32.vlgmr.msra.gmra.mrb[14].mxu0 %vm117_vm1, %v1431_v27 }
0x1943   :  { %4495 = vmatpush3.bf16.msra.mxu0 %v5274_v45  ;;  %4206 = vmatprep.mubr.msk.f32.mxu0 %vm5045_vm0, %v5043_v0 }
0x1944   :  { %4496 = vmatprep.subr.bf16.mxu0 %v5044_v1 }
0x1947   :  { %4498 = vmatpush3.bf16.msra.mxu0 %v5278_v49 }
0x1948   :  { %4505 = vmatprep.subr.bf16.mxu0 %v5044_v1 }
0x1a15   :  { %v1500_v30 = vpop.f32.mrb[14].mxu0 }
0x1a16   :  { %v1504_v17 = vadd.f32 %v1500_v30, %v1428_v28  ;;  %v4186_v32 = vpop.f32.mrb[15].mxu0 }
0x1a18   :  { %4718 = vtanh.f32 %v1504_v17  ;;  %v3854_v34 = vmul.f32 -1.442695, %v1504_v17 }
0x1a1a   :  { %4720 = vpow2.f32 %v3854_v34 }
0x1a22   :  { %v4719_v33 = vpop.eup %4718 }
0x1a23   :  { %1517 = vrot.lane.b32.xlu0 %v4719_v33, %s5046_s3 }
0x1a24   :  { %v4721_v35 = vpop.eup %4720 }
0x1a25   :  { %v1508_v36 = vadd.f32 1.0, %v4721_v35 }
0x1a27   :  { %4722 = vrcp.f32 %v1508_v36 }
0x1a31   :  { %v4723_v38 = vpop.eup %4722 }
0x1a32   :  { %v1515_v43 = vmul.f32 %v4723_v38, %v1513_v42 }
0x1a95   :  { %v1518_v39 = vpop.permute.xlu0 %1517 }
0x1a96   :  { %v1520_v40 = vmul.f32 %v4723_v38, %v1518_v39 }
0x1a98   :  { %1522 = vrot.lane.b32.xlu1 %v1520_v40, %s5047_s11 }
0x1b0a   :  { %v1523_v44 = vpop.permute.xlu1 %1522 }
0x1b0b   :  { %v1525_v46 = vadd.f32 %v1523_v44, %v1515_v43 }
0x1b0d   :  { %4724 = vtanh.f32 %v1525_v46  ;;  %v1625_v4 = vrot.slane %v1525_v46, 2 }
0x1b17   :  { %v4725_v47 = vpop.eup %4724 }
0x1b18   :  { %1528 = vrot.lane.b32.xlu0 %v4725_v47, %s5046_s3  ;;  %v1761_v47 = vld [vmem:[#allocation3 + $0x8] sm:$0xc] }
0x1b8a   :  { %v1529_v48 = vpop.permute.xlu0 %1528 }
0x1b8b   :  { %v5357_v50 = vmul.f32 %v4723_v38, %v1529_v48 }
0x1b8d   :  { %1539 = vrot.lane.b32.xlu1 %v5357_v50, %s5047_s11 }
0x1bff   :  { %v1540_v51 = vpop.permute.xlu1 %1539 }
0x1c00   :  { %4196 = vmatmul.mubr.msk.f32.vlgmr.msra.gmra.mrb[12].mxu1 %vm117_vm1, %v1540_v51 }
0x1c01   :  { %4501 = vmatpush3.bf16.msra.mxu1 %v5274_v45  ;;  %4217 = vmatprep.mubr.msk.f32.mxu1 %vm5045_vm0, %v5043_v0 }
0x1c02   :  { %4502 = vmatprep.subr.bf16.mxu1 %v5044_v1 }
0x1c05   :  { %4504 = vmatpush3.bf16.msra.mxu1 %v5278_v49 }
0x1cd3   :  { %v1609_v52 = vpop.f32.mrb[12].mxu1 }
0x1cd4   :  { %v1614_v53 = vrot.slane %v1609_v52, 2  ;;  %v4197_v54 = vpop.f32.mrb[13].mxu1 }
0x1cd6   :  { %v1616_v56 = vadd.f32 %v1614_v53, %v1538_v55 }
0x1cd8   :  { %4726 = vtanh.f32 %v1616_v56  ;;  %v3856_v60 = vmul.f32 -1.442695, %v1616_v56 }
0x1cda   :  { %4728 = vpow2.f32 %v3856_v60 }
0x1ce2   :  { %v4727_v57 = vpop.eup %4726 }
0x1ce3   :  { %1629 = vrot.lane.b32.xlu0 %v4727_v57, %s5046_s3 }
0x1ce4   :  { %v4729_v61 = vpop.eup %4728 }
0x1ce5   :  { %v1620_v62 = vadd.f32 1.0, %v4729_v61 }
0x1ce7   :  { %4730 = vrcp.f32 %v1620_v62 }
0x1cf1   :  { %v4731_v63 = vpop.eup %4730 }
0x1cf2   :  { %v1627_v5 = vmul.f32 %v4731_v63, %v1625_v4 }
0x1d55   :  { %v1630_v2 = vpop.permute.xlu0 %1629 }
0x1d56   :  { %v1632_v3 = vmul.f32 %v4731_v63, %v1630_v2 }
0x1d58   :  { %1634 = vrot.lane.b32.xlu1 %v1632_v3, %s5047_s11 }
0x1dca   :  { %v1635_v6 = vpop.permute.xlu1 %1634 }
0x1dcb   :  { %v1637_v7 = vadd.f32 %v1635_v6, %v1627_v5 }
0x1dcd   :  { %4732 = vtanh.f32 %v1637_v7 }
0x1dd7   :  { %v4733_v8 = vpop.eup %4732 }
0x1dd8   :  { %1640 = vrot.lane.b32.xlu0 %v4733_v8, %s5046_s3 }
0x1e4a   :  { %v1641_v9 = vpop.permute.xlu0 %1640 }
0x1e4b   :  { %v5370_v10 = vmul.f32 %v4731_v63, %v1641_v9 }
0x1e4d   :  { %v1650_v12 = vrot.slane %v5370_v10, 6 }
0x1e4f   :  { %1651 = vrot.lane.b32.xlu1 %v1650_v12, %s5047_s11 }
0x1ec1   :  { %v1652_v13 = vpop.permute.xlu1 %1651 }
0x1ec2   :  { %4207 = vmatmul.mubr.msk.f32.vlgmr.msra.gmra.mrb[16].mxu0 %vm117_vm1, %v1652_v13 }
0x1ec3   :  { %4507 = vmatpush3.bf16.msra.mxu0 %v5274_v45  ;;  %4228 = vmatprep.mubr.msk.f32.mxu0 %vm5045_vm0, %v5043_v0 }
0x1ec4   :  { %4508 = vmatprep.subr.bf16.mxu0 %v5044_v1 }
0x1ec7   :  { %4510 = vmatpush3.bf16.msra.mxu0 %v5278_v49  ;;  %v1737_v49 = vrot.slane %v1637_v7, 2  ;;  %v1873_v7 = vld [vmem:[#allocation3 + $0x8] sm:$0x3] }
0x1ec8   :  { %4527 = vmatprep.subr.bf16.mxu0 %v5044_v1 }
0x1f95   :  { %v1721_v14 = vpop.f32.mrb[16].mxu0 }
0x1f96   :  { %v1726_v15 = vrot.slane %v1721_v14, 4  ;;  %v4208_v16 = vpop.f32.mrb[17].mxu0 }
0x1f98   :  { %v1728_v21 = vadd.f32 %v1726_v15, %v1649_v20 }
0x1f9a   :  { %4734 = vtanh.f32 %v1728_v21  ;;  %v3858_v27 = vmul.f32 -1.442695, %v1728_v21 }
0x1f9c   :  { %4736 = vpow2.f32 %v3858_v27 }
0x1fa4   :  { %v4735_v26 = vpop.eup %4734 }
0x1fa5   :  { %1741 = vrot.lane.b32.xlu0 %v4735_v26, %s5046_s3 }
0x1fa6   :  { %v4737_v45 = vpop.eup %4736 }
0x1fa7   :  { %v1732_v28 = vadd.f32 1.0, %v4737_v45 }
0x1fa9   :  { %4738 = vrcp.f32 %v1732_v28 }
0x1fb3   :  { %v4739_v30 = vpop.eup %4738 }
0x1fb4   :  { %v1739_v33 = vmul.f32 %v4739_v30, %v1737_v49  ;;  %v1985_v49 = vld [vmem:[#allocation10 + $0x8] sm:$0xff] }
0x2017   :  { %v1742_v17 = vpop.permute.xlu0 %1741 }
0x2018   :  { %v1744_v32 = vmul.f32 %v4739_v30, %v1742_v17 }
0x201a   :  { %1746 = vrot.lane.b32.xlu1 %v1744_v32, %s5047_s11 }
0x208c   :  { %v1747_v34 = vpop.permute.xlu1 %1746 }
0x208d   :  { %v1749_v35 = vadd.f32 %v1747_v34, %v1739_v33  ;;  %v1987_v33 = vld [vmem:[#allocation10 + $0x18] sm:$0xff] }
0x208e   :  { %v4511_v34 = vpack.c.bf16 %v1987_v33, %v1985_v49 }
0x208f   :  { %4740 = vtanh.f32 %v1749_v35  ;;  %v1849_v60 = vrot.slane %v1749_v35, 2  ;;  %v1986_v35 = vld [vmem:[#allocation10 + $0x10] sm:$0xff] }
0x2090   :  { %4512 = vmatprep.subr.bf16.mxu1 %v4511_v34 }
0x2099   :  { %v4741_v36 = vpop.eup %4740 }
0x209a   :  { %1752 = vrot.lane.b32.xlu0 %v4741_v36, %s5046_s3  ;;  %v1989_v36 = vld [vmem:[#allocation10 + $0x28] sm:$0xff] }
0x210c   :  { %v1753_v38 = vpop.permute.xlu0 %1752 }
0x210d   :  { %v1755_v39 = vmul.f32 %v4739_v30, %v1753_v38  ;;  %v1991_v38 = vld [vmem:[#allocation10 + $0x38] sm:$0xff] }
0x210f   :  { %v1762_v40 = vrot.slane %v1755_v39, 4 }
0x2111   :  { %1763 = vrot.lane.b32.xlu1 %v1762_v40, %s5047_s11  ;;  %v4515_v40 = vpack.c.bf16 %v1991_v38, %v1989_v36  ;;  %v980_v38 = vld [vmem:[#allocation3 + $0x10] sm:$0xc0] }
0x2183   :  { %v1764_v42 = vpop.permute.xlu1 %1763 }
0x2184   :  { %4218 = vmatmul.mubr.msk.f32.vlgmr.msra.gmra.mrb[14].mxu1 %vm117_vm1, %v1764_v42  ;;  %v1988_v42 = vld [vmem:[#allocation10 + $0x20] sm:$0xff] }
0x2185   :  { %2083 = vmatprep.mubr.f32.mxu1 %v5043_v0 }
0x2257   :  { %v1833_v43 = vpop.f32.mrb[14].mxu1 }
0x2258   :  { %v1838_v44 = vrot.slane %v1833_v43, 6  ;;  %v4219_v46 = vpop.f32.mrb[15].mxu1  ;;  %v1990_v43 = vld [vmem:[#allocation10 + $0x30] sm:$0xff] }
0x2259   :  { %v1993_v46 = vld [vmem:[#allocation10 + $0x48] sm:$0xff] }
0x225a   :  { %v1840_v48 = vadd.f32 %v1838_v44, %v1761_v47  ;;  %v4517_v44 = vpack.c.bf16 %v1990_v43, %v1988_v42  ;;  %v1995_v47 = vld [vmem:[#allocation10 + $0x58] sm:$0xff] }
0x225c   :  { %4742 = vtanh.f32 %v1840_v48  ;;  %v3860_v52 = vmul.f32 -1.442695, %v1840_v48  ;;  %v4519_v48 = vpack.c.bf16 %v1995_v47, %v1993_v46 }
0x225e   :  { %4744 = vpow2.f32 %v3860_v52  ;;  %v1994_v52 = vld [vmem:[#allocation10 + $0x50] sm:$0xff] }
0x2266   :  { %v4743_v51 = vpop.eup %4742 }
0x2267   :  { %1853 = vrot.lane.b32.xlu0 %v4743_v51, %s5046_s3  ;;  %v1992_v51 = vld [vmem:[#allocation10 + $0x40] sm:$0xff] }
0x2268   :  { %v4745_v53 = vpop.eup %4744 }
0x2269   :  { %v1844_v54 = vadd.f32 1.0, %v4745_v53  ;;  %v4521_v53 = vpack.c.bf16 %v1994_v52, %v1992_v51 }
0x226b   :  { %4746 = vrcp.f32 %v1844_v54  ;;  %v1997_v54 = vld [vmem:[#allocation10 + $0x68] sm:$0xff] }
0x2275   :  { %v4747_v55 = vpop.eup %4746 }
0x2276   :  { %v1851_v61 = vmul.f32 %v4747_v55, %v1849_v60 }
0x22d9   :  { %v1854_v56 = vpop.permute.xlu0 %1853 }
0x22da   :  { %v1856_v57 = vmul.f32 %v4747_v55, %v1854_v56  ;;  %v1996_v56 = vld [vmem:[#allocation10 + $0x60] sm:$0xff] }
0x22dc   :  { %1858 = vrot.lane.b32.xlu1 %v1856_v57, %s5047_s11 }
0x234e   :  { %v1859_v62 = vpop.permute.xlu1 %1858 }
0x234f   :  { %v1861_v63 = vadd.f32 %v1859_v62, %v1851_v61  ;;  %v2101_v61 = vld [vmem:[#allocation12 + $0x8] sm:$0xff] }
0x2351   :  { %4748 = vtanh.f32 %v1861_v63  ;;  %v1958_v27 = vrot.slane %v1861_v63, 2  ;;  %v2102_v63 = vld [vmem:[#allocation12 + $0x10] sm:$0xff] }
0x235b   :  { %v4749_v2 = vpop.eup %4748 }
0x235c   :  { %1864 = vrot.lane.b32.xlu0 %v4749_v2, %s5046_s3  ;;  %v2103_v2 = vld [vmem:[#allocation12 + $0x18] sm:$0xff] }
0x23ce   :  { %v1865_v3 = vpop.permute.xlu0 %1864 }
0x23cf   :  { %v1867_v4 = vmul.f32 %v4747_v55, %v1865_v3  ;;  %v1999_v55 = vld [vmem:[#allocation10 + $0x78] sm:$0xff] }
0x23d0   :  { %v4523_v57 = vpack.c.bf16 %v1999_v55, %v1997_v54  ;;  %v1068_v54 = vrot.slane %v5297_v18, 6 }
0x23d1   :  { %v1874_v5 = vrot.slane %v1867_v4, 2 }
0x23d3   :  { %1875 = vrot.lane.b32.xlu1 %v1874_v5, %s5047_s11 }
0x2445   :  { %v1876_v6 = vpop.permute.xlu1 %1875 }
0x2446   :  { %4229 = vmatmul.mubr.msk.f32.vlgmr.msra.gmra.mrb[18].mxu0 %vm117_vm1, %v1876_v6 }
0x2447   :  { %4239 = vmatprep.mubr.msk.f32.mxu0 %vm5045_vm0, %v5043_v0 }
0x2519   :  { %v1945_v8 = vpop.f32.mrb[18].mxu0 }
0x251a   :  { %v1949_v9 = vadd.f32 %v1945_v8, %v1873_v7  ;;  %v4230_v12 = vpop.f32.mrb[19].mxu0 }
0x251c   :  { %4750 = vtanh.f32 %v1949_v9  ;;  %v3862_v14 = vmul.f32 -1.442695, %v1949_v9 }
0x251e   :  { %4752 = vpow2.f32 %v3862_v14 }
0x2526   :  { %v4751_v13 = vpop.eup %4750 }
0x2527   :  { %1962 = vrot.lane.b32.xlu0 %v4751_v13, %s5046_s3 }
0x2528   :  { %v4753_v15 = vpop.eup %4752 }
0x2529   :  { %v1953_v16 = vadd.f32 1.0, %v4753_v15 }
0x252b   :  { %4754 = vrcp.f32 %v1953_v16  ;;  %v2000_v16 = vld [vmem:[%s5679_s6] sm:$0x3]  ;;  %s5048_s6 = smov [#allocation13]  }
0x252c   :  { %s3820_s17 = sshll.u32 %s5048_s6, 4  ;;  %s3821_s17 = int_to_ptr.vmem [resolvable:$true] %s3820_s17 }
0x252d   :  { %s5004_s19 = scalar_lea.vmem %s3821_s17, 32  ;;  %p5009_p13 = scmp.lt.s32.totalorder %s3821_s17, %s3821_s17 }
0x252e   :  { %p5005_p12 = scmp.ne.s32.totalorder %s3821_s17, %s5004_s19  ;;  %p5010_p0 = scmp.lt.s32.totalorder %s5004_s19, %s5004_s19 }
0x2530   :  { %p5011_p1 = por %p5010_p0, %p5009_p13 }
0x2532   :  { %p5012_p2 = pnand %p5011_p1, %p5005_p12 }
0x2535   :  { %v5395_v20 = vpop.eup %4754 }
0x2536   :  { %v1960_v45 = vmul.f32 %v5395_v20, %v1958_v27 }
0x2599   :  { %v1963_v21 = vpop.permute.xlu0 %1962 }
0x259a   :  { %v1965_v26 = vmul.f32 %v5395_v20, %v1963_v21  ;;  %v5451_v21 = vrot.slane %v2000_v16, %v113_v25 }
0x259c   :  { %1967 = vrot.lane.b32.xlu1 %v1965_v26, %s5047_s11 }
0x25a0   :  { %419 = vrot.lane.b32.xlu1 %v5213_v11, %s5047_s11 }
0x25a4   :  { %645 = vrot.lane.b32.xlu1 %v5241_v58, %s5047_s11  ;;  %v1984_v58 = vld [vmem:[#allocation10] sm:$0xff] }
0x25a8   :  { %1757 = vrot.lane.b32.xlu1 %v1755_v39, %s5046_s3  ;;  %v4513_v39 = vpack.c.bf16 %v1986_v35, %v1984_v58  ;;  %v1057_v58 = vrot.slane %v5324_v19, 2 }
0x25aa   :  { %4514 = vmatpush1.bf16.msra.mxu1 %v4513_v39  ;;  %v1059_v39 = vadd.f32 %v1057_v58, %v980_v38 }
0x25ab   :  { %4516 = vmatprep.subr.bf16.mxu1 %v4515_v40 }
0x25ac   :  { %v3847_v43 = vmul.f32 -1.442695, %v1059_v39 }
0x25ae   :  { %4518 = vmatpush1.bf16.msra.mxu1 %v4517_v44 }
0x25af   :  { %4520 = vmatprep.subr.bf16.mxu1 %v4519_v48 }
0x25b2   :  { %4522 = vmatpush1.bf16.msra.mxu1 %v4521_v53 }
0x25b3   :  { %4524 = vmatprep.subr.bf16.mxu1 %v4523_v57 }
0x260e   :  { %v1968_v28 = vpop.permute.xlu1 %1967 }
0x260f   :  { %v1970_v30 = vadd.f32 %v1968_v28, %v1960_v45 }
0x2611   :  { %4756 = vtanh.f32 %v1970_v30 }
0x2612   :  { %v420_v17 = vpop.permute.xlu1 %419 }
0x2613   :  { %423 = vst.msk [vmem:[#allocation2] sm:$0xc] %vm422_vm3, %v420_v17 }
0x2616   :  { %v646_v32 = vpop.permute.xlu1 %645 }
0x2617   :  { %649 = vst.msk [vmem:[#allocation2] sm:$0xc0] %vm648_vm4, %v646_v32 }
0x261a   :  { %v1758_v7 = vpop.permute.xlu1 %1757 }
0x261b   :  { %v4757_v11 = vpop.eup %4756 }
0x261c   :  { %1973 = vrot.lane.b32.xlu0 %v4757_v11, %s5046_s3 }
0x2620   :  { %532 = vrot.lane.b32.xlu0 %v5227_v37, %s5047_s11  ;;  %v1998_v37 = vld [vmem:[#allocation10 + $0x70] sm:$0xff] }
0x2621   :  { %v4525_v60 = vpack.c.bf16 %v1998_v37, %v1996_v56 }
0x2623   :  { %4526 = vmatpush1.bf16.msra.mxu1 %v4525_v60 }
0x2624   :  { %1645 = vrot.lane.b32.xlu0 %v5370_v10, %s5046_s3  ;;  %4539 = vmatprep.subr.bf16.mxu1 %v5044_v1  ;;  %v2100_v10 = vld [vmem:[#allocation12] sm:$0xff] }
0x2625   :  { %v5414_v62 = vpack.c.bf16 %v2101_v61, %v2100_v10 }
0x2627   :  { %4529 = vmatpush3.bf16.msra.mxu0 %v5414_v62 }
0x2628   :  { %1869 = vrot.lane.b32.xlu0 %v1867_v4, %s5046_s3  ;;  %v5417_v4 = vpack.c.bf16 %v2103_v2, %v2102_v63  ;;  %4530 = vmatprep.subr.bf16.mxu0 %v5044_v1 }
0x262b   :  { %4532 = vmatpush3.bf16.msra.mxu0 %v5417_v4 }
0x262c   :  { %4533 = vmatprep.subr.bf16.mxu0 %v5044_v1 }
0x262e   :  { %4240 = vmatmul.mubr.f32.vlgmr.msra.gmra.mrb[20].mxu0 %v5043_v0 }
0x262f   :  { %4535 = vmatpush3.bf16.msra.mxu0 %v5414_v62  ;;  %4250 = vmatprep.mubr.msk.f32.mxu0 %vm5045_vm0, %v5043_v0 }
0x2630   :  { %4536 = vmatprep.subr.bf16.mxu0 %v5044_v1 }
0x2633   :  { %4538 = vmatpush3.bf16.msra.mxu0 %v5417_v4 }
0x2634   :  { %4545 = vmatprep.subr.bf16.mxu0 %v5044_v1 }
0x268e   :  { %v1974_v3 = vpop.permute.xlu0 %1973 }
0x268f   :  { %v1976_v5 = vmul.f32 %v5395_v20, %v1974_v3  ;;  %v5447_v20 = vrot.slane %v2000_v16, %v109_v23 }
0x2691   :  { %1978 = vrot.lane.b32.xlu1 %v1976_v5, %s5046_s3 }
0x2692   :  { %v533_v6 = vpop.permute.xlu0 %532 }
0x2693   :  { %536 = vst.msk [vmem:[#allocation2] sm:$0x30] %vm535_vm5, %v533_v6 }
0x2694   :  { %1760 = vst.msk [vmem:[#allocation2] sm:$0x30] %vm1313_vm6, %v1758_v7 }
0x2696   :  { %v1646_v8 = vpop.permute.xlu0 %1645 }
0x2697   :  { %1648 = vst.msk [vmem:[#allocation2] sm:$0xc0] %vm1200_vm7, %v1646_v8 }
0x269a   :  { %v1870_v9 = vpop.permute.xlu0 %1869 }
0x269b   :  { %1872 = vst.msk [vmem:[#allocation2] sm:$0xc] %vm1426_vm8, %v1870_v9 }
0x2701   :  { %v2171_v14 = vpop.f32.mrb[20].mxu0 }
0x2702   :  { %v4241_v15 = vpop.f32.mrb[21].mxu0 }
0x2703   :  { %v1979_v12 = vpop.permute.xlu1 %1978 }
0x2704   :  { %1981 = vst.msk [vmem:[#allocation2] sm:$0x3] %vm1536_vm9, %v1979_v12 }
0x270b   :  { %v1982_v13 = vld [vmem:[#allocation2] sm:$0xff] }
0x270c   :  { %3863 = vmatmul.mubr.msk.f32.vlgmr.msra.gmra.mrb[16].mxu1 %vm2012_vm10, %v1982_v13 }
0x270d   :  { %2089 = vmatprep.mubr.f32.mxu1 %v5043_v0  ;;  %4541 = vmatpush3.bf16.msra.mxu1 %v5414_v62 }
0x270e   :  { %4542 = vmatprep.subr.bf16.mxu1 %v5044_v1 }
0x2711   :  { %4544 = vmatpush3.bf16.msra.mxu1 %v5417_v4 }
0x2712   :  { %4551 = vmatprep.subr.bf16.mxu1 %v5044_v1 }
0x27df   :  { %v2085_v26 = vpop.f32.mrb[16].mxu1 }
0x27e0   :  { %v2086_v27 = vadd.f32 %v2085_v26, %v5447_v20  ;;  %v2087_v45 = vpop.f32.mrb[17].mxu1 }
0x27e1   :  { %v2088_v28 = vadd.f32 %v2087_v45, %v5451_v21 }
0x27e2   :  { %2096 = vst [vmem:[#allocation3] sm:$0xff] %v2086_v27 }
0x27e3   :  { %2097 = vst [vmem:[#allocation3 + $0x8] sm:$0xff] %v2088_v28 }
0x27e9   :  { %v2104_v30 = vld [vmem:[#allocation3] sm:$0x3]  ;;  %v2200_v3 = vld [vmem:[#allocation3] sm:$0xc] }
0x27ea   :  { %v2175_v17 = vadd.f32 %v2171_v14, %v2104_v30 }
0x27ec   :  { %4758 = vtanh.f32 %v2175_v17  ;;  %v3865_v23 = vmul.f32 -1.442695, %v2175_v17 }
0x27ee   :  { %4760 = vpow2.f32 %v3865_v23 }
0x27f6   :  { %v4759_v32 = vpop.eup %4758 }
0x27f7   :  { %2185 = vrot.lane.b32.xlu0 %v4759_v32, %s5046_s3 }
0x27f8   :  { %v4761_v11 = vpop.eup %4760 }
0x27f9   :  { %v2179_v22 = vadd.f32 1.0, %v4761_v11 }
0x27fb   :  { %4762 = vrcp.f32 %v2179_v22 }
0x2805   :  { %v4763_v25 = vpop.eup %4762 }
0x2806   :  { %v2183_v34 = vmul.f32 0.0, %v4763_v25 }
0x2869   :  { %v2186_v49 = vpop.permute.xlu0 %2185 }
0x286a   :  { %v2188_v33 = vmul.f32 %v4763_v25, %v2186_v49 }
0x286c   :  { %2190 = vrot.lane.b32.xlu1 %v2188_v33, %s5047_s11 }
0x28de   :  { %v2191_v35 = vpop.permute.xlu1 %2190 }
0x28df   :  { %v5458_v36 = vadd.f32 %v2191_v35, %v2183_v34  ;;  %v2307_v35 = vld [vmem:[#allocation3] sm:$0x30] }
0x28e1   :  { %4764 = vtanh.f32 %v5458_v36  ;;  %v2288_v15 = vrot.slane %v5458_v36, 6 }
0x28e2   :  { %4766 = vtanh.f32 %v1059_v39 }
0x28e3   :  { %4768 = vpow2.f32 %v3847_v43 }
0x28eb   :  { %v4765_v40 = vpop.eup %4764 }
0x28ec   :  { %2196 = vrot.lane.b32.xlu0 %v4765_v40, %s5046_s3  ;;  %v4767_v42 = vpop.eup %4766 }
0x28ed   :  { %v4769_v44 = vpop.eup %4768 }
0x28ee   :  { %v1063_v46 = vadd.f32 1.0, %v4769_v44 }
0x28f0   :  { %1072 = vrot.lane.b32.xlu0 %v4767_v42, %s5046_s3  ;;  %4770 = vrcp.f32 %v1063_v46 }
0x28fa   :  { %v4771_v48 = vpop.eup %4770 }
0x28fb   :  { %v1070_v55 = vmul.f32 %v4771_v48, %v1068_v54 }
0x295e   :  { %v2197_v19 = vpop.permute.xlu0 %2196 }
0x295f   :  { %v2199_v47 = vmul.f32 %v4763_v25, %v2197_v19 }
0x2961   :  { %2202 = vrot.lane.b32.xlu1 %v2199_v47, %s5047_s11 }
0x2962   :  { %v1073_v51 = vpop.permute.xlu0 %1072 }
0x2963   :  { %v1075_v52 = vmul.f32 %v4771_v48, %v1073_v51 }
0x2965   :  { %1077 = vrot.lane.b32.xlu0 %v1075_v52, %s5047_s11 }
0x29d3   :  { %v2203_v53 = vpop.permute.xlu1 %2202 }
0x29d4   :  { %4251 = vmatmul.mubr.msk.f32.vlgmr.msra.gmra.mrb[22].mxu0 %vm117_vm1, %v2203_v53 }
0x29d5   :  { %4547 = vmatpush3.bf16.msra.mxu0 %v5414_v62  ;;  %4272 = vmatprep.mubr.msk.f32.mxu0 %vm5045_vm0, %v5043_v0 }
0x29d6   :  { %4548 = vmatprep.subr.bf16.mxu0 %v5044_v1 }
0x29d7   :  { %v1078_v56 = vpop.permute.xlu0 %1077 }
0x29d8   :  { %v1080_v57 = vadd.f32 %v1078_v56, %v1070_v55 }
0x29d9   :  { %4550 = vmatpush3.bf16.msra.mxu0 %v5417_v4 }
0x29da   :  { %4772 = vtanh.f32 %v1080_v57  ;;  %4557 = vmatprep.subr.bf16.mxu0 %v5044_v1 }
0x29e4   :  { %v4773_v37 = vpop.eup %4772 }
0x29e5   :  { %1083 = vrot.lane.b32.xlu0 %v4773_v37, %s5046_s3  ;;  %v2415_v37 = vld [vmem:[#allocation3] sm:$0xc0] }
0x29e9   :  { %864 = vrot.lane.b32.xlu0 %v5270_v41, %s5047_s11 }
0x2a57   :  { %v1084_v18 = vpop.permute.xlu0 %1083 }
0x2a58   :  { %v1086_v60 = vmul.f32 %v4771_v48, %v1084_v18 }
0x2a5a   :  { %1088 = vrot.lane.b32.xlu0 %v1086_v60, %s5047_s11 }
0x2a5b   :  { %v865_v10 = vpop.permute.xlu0 %864 }
0x2a5c   :  { %867 = vst.msk [vmem:[#allocation2 + $0x8] sm:$0xc] %vm422_vm3, %v865_v10 }
0x2a5e   :  { %1310 = vrot.lane.b32.xlu0 %v5329_v59, %s5046_s3 }
0x2a62   :  { %1533 = vrot.lane.b32.xlu0 %v5357_v50, %s5046_s3 }
0x2aa7   :  { %v2272_v61 = vpop.f32.mrb[22].mxu0 }
0x2aa8   :  { %v2277_v63 = vrot.slane %v2272_v61, 6  ;;  %v4252_v2 = vpop.f32.mrb[23].mxu0 }
0x2aaa   :  { %v2279_v5 = vadd.f32 %v2277_v63, %v2200_v3 }
0x2aac   :  { %4774 = vtanh.f32 %v2279_v5  ;;  %v3867_v59 = vmul.f32 -1.442695, %v2279_v5 }
0x2aae   :  { %4776 = vpow2.f32 %v3867_v59 }
0x2ab6   :  { %v4775_v41 = vpop.eup %4774 }
0x2ab7   :  { %2292 = vrot.lane.b32.xlu1 %v4775_v41, %s5046_s3 }
0x2ab8   :  { %v4777_v9 = vpop.eup %4776 }
0x2ab9   :  { %v2283_v50 = vadd.f32 1.0, %v4777_v9 }
0x2abb   :  { %4778 = vrcp.f32 %v2283_v50 }
0x2ac5   :  { %v4779_v12 = vpop.eup %4778 }
0x2ac6   :  { %v2290_v16 = vmul.f32 %v4779_v12, %v2288_v15 }
0x2acc   :  { %v1089_v6 = vpop.permute.xlu0 %1088 }
0x2acd   :  { %1091 = vst.msk [vmem:[#allocation2 + $0x8] sm:$0xc0] %vm648_vm4, %v1089_v6 }
0x2ad0   :  { %v1311_v7 = vpop.permute.xlu0 %1310 }
0x2ad4   :  { %v1534_v8 = vpop.permute.xlu0 %1533 }
0x2ad5   :  { %1537 = vst.msk [vmem:[#allocation2 + $0x8] sm:$0x3] %vm1536_vm9, %v1534_v8 }
0x2b29   :  { %v2293_v13 = vpop.permute.xlu1 %2292 }
0x2b2a   :  { %v2295_v14 = vmul.f32 %v4779_v12, %v2293_v13 }
0x2b2c   :  { %2297 = vrot.lane.b32.xlu1 %v2295_v14, %s5047_s11 }
0x2b9e   :  { %v2298_v26 = vpop.permute.xlu1 %2297 }
0x2b9f   :  { %v2300_v27 = vadd.f32 %v2298_v26, %v2290_v16 }
0x2ba1   :  { %4780 = vtanh.f32 %v2300_v27 }
0x2bab   :  { %v4781_v45 = vpop.eup %4780 }
0x2bac   :  { %2303 = vrot.lane.b32.xlu1 %v4781_v45, %s5046_s3 }
0x2bb0   :  { %976 = vrot.lane.b32.xlu1 %v5302_v29, %s5047_s11 }
0x2bb4   :  { %1197 = vrot.lane.b32.xlu1 %v5306_v31, %s5046_s3 }
0x2bb8   :  { %1423 = vrot.lane.b32.xlu1 %v5343_v24, %s5046_s3 }
0x2c1e   :  { %v2304_v28 = vpop.permute.xlu1 %2303 }
0x2c1f   :  { %v2306_v30 = vmul.f32 %v4779_v12, %v2304_v28 }
0x2c21   :  { %v2309_v17 = vrot.slane %v2306_v30, 2 }
0x2c22   :  { %v977_v32 = vpop.permute.xlu1 %976 }
0x2c23   :  { %979 = vst.msk [vmem:[#allocation2 + $0x8] sm:$0x30] %vm535_vm5, %v977_v32  ;;  %2310 = vrot.lane.b32.xlu1 %v2309_v17, %s5047_s11 }
0x2c24   :  { %1314 = vst.msk [vmem:[#allocation2 + $0x8] sm:$0x30] %vm1313_vm6, %v1311_v7 }
0x2c26   :  { %v1198_v23 = vpop.permute.xlu1 %1197 }
0x2c27   :  { %1201 = vst.msk [vmem:[#allocation2 + $0x8] sm:$0xc0] %vm1200_vm7, %v1198_v23 }
0x2c2a   :  { %v1424_v29 = vpop.permute.xlu1 %1423 }
0x2c2b   :  { %1427 = vst.msk [vmem:[#allocation2 + $0x8] sm:$0xc] %vm1426_vm8, %v1424_v29 }
0x2c32   :  { %v1983_v31 = vld [vmem:[#allocation2 + $0x8] sm:$0xff] }
0x2c33   :  { %3864 = vmatmul.mubr.msk.f32.gmra.mrb[18].mxu1 %vm2012_vm10, %v1983_v31 }
0x2c34   :  { %4261 = vmatprep.mubr.msk.f32.mxu1 %vm5045_vm0, %v5043_v0 }
0x2c95   :  { %v2311_v24 = vpop.permute.xlu1 %2310 }
0x2c96   :  { %4262 = vmatmul.mubr.msk.f32.vlgmr.msra.gmra.mrb[20].mxu1 %vm117_vm1, %v2311_v24 }
0x2c97   :  { %4553 = vmatpush3.bf16.msra.mxu1 %v5414_v62  ;;  %4283 = vmatprep.mubr.msk.f32.mxu1 %vm5045_vm0, %v5043_v0 }
0x2c98   :  { %4554 = vmatprep.subr.bf16.mxu1 %v5044_v1 }
0x2c9b   :  { %4556 = vmatpush3.bf16.msra.mxu1 %v5417_v4 }
0x2c9c   :  { %4563 = vmatprep.subr.bf16.mxu1 %v5044_v1 }
0x2d06   :  { %v2091_v11 = vpop.f32.mrb[18].mxu1 }
0x2d07   :  { %v2092_v22 = vadd.f32 %v2091_v11, %v5447_v20  ;;  %v2093_v25 = vpop.f32.mrb[19].mxu1 }
0x2d08   :  { %v2094_v49 = vadd.f32 %v2093_v25, %v5451_v21  ;;  %v2396_v21 = vrot.slane %v2300_v27, 6 }
0x2d09   :  { %2098 = vst [vmem:[#allocation3 + $0x10] sm:$0xff] %v2092_v22 }
0x2d0a   :  { %2099 = vst [vmem:[#allocation3 + $0x18] sm:$0xff] %v2094_v49 }
0x2d10   :  { %v2523_v14 = vld [vmem:[#allocation3 + $0x10] sm:$0x3] }
0x2d69   :  { %v2380_v33 = vpop.f32.mrb[20].mxu1 }
0x2d6a   :  { %v2385_v58 = vrot.slane %v2380_v33, 4  ;;  %v4263_v34 = vpop.f32.mrb[21].mxu1 }
0x2d6c   :  { %v2387_v36 = vadd.f32 %v2385_v58, %v2307_v35 }
0x2d6e   :  { %4782 = vtanh.f32 %v2387_v36  ;;  %v3869_v39 = vmul.f32 -1.442695, %v2387_v36  ;;  %v2628_v36 = vld [vmem:[#allocation3 + $0x10] sm:$0xc] }
0x2d70   :  { %4784 = vpow2.f32 %v3869_v39 }
0x2d78   :  { %v4783_v38 = vpop.eup %4782 }
0x2d79   :  { %2400 = vrot.lane.b32.xlu0 %v4783_v38, %s5046_s3 }
0x2d7a   :  { %v4785_v40 = vpop.eup %4784 }
0x2d7b   :  { %v2391_v42 = vadd.f32 1.0, %v4785_v40 }
0x2d7d   :  { %4786 = vrcp.f32 %v2391_v42 }
0x2d87   :  { %v4787_v20 = vpop.eup %4786 }
0x2d88   :  { %v2398_v46 = vmul.f32 %v4787_v20, %v2396_v21 }
0x2deb   :  { %v2401_v43 = vpop.permute.xlu0 %2400 }
0x2dec   :  { %v2403_v44 = vmul.f32 %v4787_v20, %v2401_v43 }
0x2dee   :  { %2405 = vrot.lane.b32.xlu1 %v2403_v44, %s5047_s11 }
0x2e60   :  { %v2406_v19 = vpop.permute.xlu1 %2405 }
0x2e61   :  { %v2408_v47 = vadd.f32 %v2406_v19, %v2398_v46 }
0x2e63   :  { %4788 = vtanh.f32 %v2408_v47  ;;  %v2504_v41 = vrot.slane %v2408_v47, 6 }
0x2e6d   :  { %v4789_v48 = vpop.eup %4788 }
0x2e6e   :  { %2411 = vrot.lane.b32.xlu0 %v4789_v48, %s5046_s3 }
0x2ee0   :  { %v2412_v51 = vpop.permute.xlu0 %2411 }
0x2ee1   :  { %v2414_v52 = vmul.f32 %v4787_v20, %v2412_v51 }
0x2ee3   :  { %v2417_v53 = vrot.slane %v2414_v52, 4 }
0x2ee5   :  { %2418 = vrot.lane.b32.xlu1 %v2417_v53, %s5047_s11  ;;  %v2957_v53 = vld [vmem:[#allocation12 + $0x20] sm:$0xff] }
0x2f57   :  { %v2419_v54 = vpop.permute.xlu1 %2418 }
0x2f58   :  { %4273 = vmatmul.mubr.msk.f32.vlgmr.msra.gmra.mrb[24].mxu0 %vm117_vm1, %v2419_v54  ;;  %v2958_v54 = vld [vmem:[#allocation12 + $0x28] sm:$0xff] }
0x2f59   :  { %4559 = vmatpush3.bf16.msra.mxu0 %v5414_v62  ;;  %4294 = vmatprep.mubr.msk.f32.mxu0 %vm5045_vm0, %v5043_v0 }
0x2f5a   :  { %4560 = vmatprep.subr.bf16.mxu0 %v5044_v1 }
0x2f5d   :  { %4562 = vmatpush3.bf16.msra.mxu0 %v5417_v4 }
0x2f5e   :  { %4569 = vmatprep.subr.bf16.mxu0 %v5044_v1 }
0x302b   :  { %v2488_v55 = vpop.f32.mrb[24].mxu0 }
0x302c   :  { %v2493_v56 = vrot.slane %v2488_v55, 2  ;;  %v4274_v57 = vpop.f32.mrb[25].mxu0  ;;  %v5551_v55 = vpack.c.bf16 %v2958_v54, %v2957_v53 }
0x302d   :  { %v2960_v57 = vld [vmem:[#allocation12 + $0x38] sm:$0xff] }
0x302e   :  { %v2495_v18 = vadd.f32 %v2493_v56, %v2415_v37  ;;  %v2959_v56 = vld [vmem:[#allocation12 + $0x30] sm:$0xff] }
0x3030   :  { %4790 = vtanh.f32 %v2495_v18  ;;  %v3871_v10 = vmul.f32 -1.442695, %v2495_v18  ;;  %v5555_v18 = vpack.c.bf16 %v2960_v57, %v2959_v56 }
0x3032   :  { %4792 = vpow2.f32 %v3871_v10 }
0x303a   :  { %v4791_v60 = vpop.eup %4790 }
0x303b   :  { %2508 = vrot.lane.b32.xlu0 %v4791_v60, %s5046_s3 }
0x303c   :  { %v4793_v61 = vpop.eup %4792 }
0x303d   :  { %v2499_v63 = vadd.f32 1.0, %v4793_v61 }
0x303f   :  { %4794 = vrcp.f32 %v2499_v63  ;;  %v2735_v63 = vld [vmem:[#allocation3 + $0x10] sm:$0x30] }
0x3049   :  { %v4795_v2 = vpop.eup %4794 }
0x304a   :  { %v2506_v6 = vmul.f32 %v4795_v2, %v2504_v41 }
0x30ad   :  { %v2509_v3 = vpop.permute.xlu0 %2508 }
0x30ae   :  { %v2511_v5 = vmul.f32 %v4795_v2, %v2509_v3 }
0x30b0   :  { %2513 = vrot.lane.b32.xlu1 %v2511_v5, %s5047_s11 }
0x3122   :  { %v2514_v7 = vpop.permute.xlu1 %2513 }
0x3123   :  { %v2516_v8 = vadd.f32 %v2514_v7, %v2506_v6  ;;  %v2961_v6 = vld [vmem:[#allocation3 + $0x18] sm:$0xc0] }
0x3125   :  { %4796 = vtanh.f32 %v2516_v8  ;;  %v2609_v29 = vrot.slane %v2516_v8, 6 }
0x312f   :  { %v4797_v59 = vpop.eup %4796 }
0x3130   :  { %2519 = vrot.lane.b32.xlu0 %v4797_v59, %s5046_s3 }
0x31a2   :  { %v2520_v9 = vpop.permute.xlu0 %2519 }
0x31a3   :  { %v2522_v50 = vmul.f32 %v4795_v2, %v2520_v9 }
0x31a5   :  { %v2525_v12 = vrot.slane %v2522_v50, 6 }
0x31a7   :  { %2526 = vrot.lane.b32.xlu1 %v2525_v12, %s5047_s11 }
0x3219   :  { %v2527_v13 = vpop.permute.xlu1 %2526 }
0x321a   :  { %4284 = vmatmul.mubr.msk.f32.vlgmr.msra.gmra.mrb[22].mxu1 %vm117_vm1, %v2527_v13 }
0x321b   :  { %4565 = vmatpush3.bf16.msra.mxu1 %v5414_v62  ;;  %4305 = vmatprep.mubr.msk.f32.mxu1 %vm5045_vm0, %v5043_v0 }
0x321c   :  { %4566 = vmatprep.subr.bf16.mxu1 %v5044_v1 }
0x321f   :  { %4568 = vmatpush3.bf16.msra.mxu1 %v5417_v4 }
0x3220   :  { %4575 = vmatprep.subr.bf16.mxu1 %v5044_v1 }
0x32ed   :  { %v2596_v15 = vpop.f32.mrb[22].mxu1 }
0x32ee   :  { %v2600_v16 = vadd.f32 %v2596_v15, %v2523_v14  ;;  %v4285_v26 = vpop.f32.mrb[23].mxu1 }
0x32f0   :  { %4798 = vtanh.f32 %v2600_v16  ;;  %v3873_v45 = vmul.f32 -1.442695, %v2600_v16 }
0x32f2   :  { %4800 = vpow2.f32 %v3873_v45 }
0x32fa   :  { %v4799_v27 = vpop.eup %4798 }
0x32fb   :  { %2613 = vrot.lane.b32.xlu0 %v4799_v27, %s5046_s3 }
0x32fc   :  { %v4801_v28 = vpop.eup %4800 }
0x32fd   :  { %v2604_v30 = vadd.f32 1.0, %v4801_v28 }
0x32ff   :  { %4802 = vrcp.f32 %v2604_v30 }
0x3309   :  { %v4803_v17 = vpop.eup %4802 }
0x330a   :  { %v2611_v31 = vmul.f32 %v4803_v17, %v2609_v29 }
0x336d   :  { %v2614_v32 = vpop.permute.xlu0 %2613 }
0x336e   :  { %v2616_v23 = vmul.f32 %v4803_v17, %v2614_v32 }
0x3370   :  { %2618 = vrot.lane.b32.xlu1 %v2616_v23, %s5047_s11 }
0x33e2   :  { %v2619_v24 = vpop.permute.xlu1 %2618 }
0x33e3   :  { %v2621_v11 = vadd.f32 %v2619_v24, %v2611_v31 }
0x33e5   :  { %4804 = vtanh.f32 %v2621_v11 }
0x33ef   :  { %v4805_v22 = vpop.eup %4804 }
0x33f0   :  { %2624 = vrot.lane.b32.xlu0 %v4805_v22, %s5046_s3 }
0x3462   :  { %v2625_v25 = vpop.permute.xlu0 %2624 }
0x3463   :  { %v2627_v49 = vmul.f32 %v4803_v17, %v2625_v25 }
0x3465   :  { %2630 = vrot.lane.b32.xlu1 %v2627_v49, %s5047_s11 }
0x34d7   :  { %v2631_v33 = vpop.permute.xlu1 %2630 }
0x34d8   :  { %4295 = vmatmul.mubr.msk.f32.vlgmr.msra.gmra.mrb[26].mxu0 %vm117_vm1, %v2631_v33 }
0x34d9   :  { %4571 = vmatpush3.bf16.msra.mxu0 %v5414_v62  ;;  %4316 = vmatprep.mubr.msk.f32.mxu0 %vm5045_vm0, %v5043_v0 }
0x34da   :  { %4572 = vmatprep.subr.bf16.mxu0 %v5044_v1 }
0x34dd   :  { %4574 = vmatpush3.bf16.msra.mxu0 %v5417_v4  ;;  %v2716_v4 = vrot.slane %v2621_v11, 6 }
0x34de   :  { %4581 = vmatprep.subr.bf16.mxu0 %v5044_v1 }
0x35ab   :  { %v2700_v58 = vpop.f32.mrb[26].mxu0 }
0x35ac   :  { %v2705_v34 = vrot.slane %v2700_v58, 6  ;;  %v4296_v35 = vpop.f32.mrb[27].mxu0 }
0x35ae   :  { %v2707_v38 = vadd.f32 %v2705_v34, %v2628_v36 }
0x35b0   :  { %4806 = vtanh.f32 %v2707_v38  ;;  %v3875_v40 = vmul.f32 -1.442695, %v2707_v38 }
0x35b2   :  { %4808 = vpow2.f32 %v3875_v40 }
0x35ba   :  { %v4807_v39 = vpop.eup %4806 }
0x35bb   :  { %2720 = vrot.lane.b32.xlu0 %v4807_v39, %s5046_s3 }
0x35bc   :  { %v4809_v62 = vpop.eup %4808 }
0x35bd   :  { %v2711_v42 = vadd.f32 1.0, %v4809_v62 }
0x35bf   :  { %4810 = vrcp.f32 %v2711_v42 }
0x35c9   :  { %v4811_v20 = vpop.eup %4810 }
0x35ca   :  { %v2718_v21 = vmul.f32 %v4811_v20, %v2716_v4 }
0x362d   :  { %v2721_v43 = vpop.permute.xlu0 %2720 }
0x362e   :  { %v2723_v44 = vmul.f32 %v4811_v20, %v2721_v43 }
0x3630   :  { %2725 = vrot.lane.b32.xlu1 %v2723_v44, %s5047_s11  ;;  %v3060_v44 = vld [vmem:[#allocation3 + $0x18] sm:$0x30] }
0x36a2   :  { %v2726_v46 = vpop.permute.xlu1 %2725 }
0x36a3   :  { %v5546_v19 = vadd.f32 %v2726_v46, %v2718_v21 }
0x36a5   :  { %4812 = vtanh.f32 %v5546_v19  ;;  %v2824_v17 = vrot.slane %v5546_v19, 6 }
0x36af   :  { %v4813_v47 = vpop.eup %4812 }
0x36b0   :  { %2731 = vrot.lane.b32.xlu0 %v4813_v47, %s5046_s3 }
0x3722   :  { %v2732_v48 = vpop.permute.xlu0 %2731 }
0x3723   :  { %v2734_v51 = vmul.f32 %v4811_v20, %v2732_v48 }
0x3725   :  { %v2737_v52 = vrot.slane %v2734_v51, 2 }
0x3727   :  { %2738 = vrot.lane.b32.xlu1 %v2737_v52, %s5047_s11 }
0x3799   :  { %v2739_v37 = vpop.permute.xlu1 %2738 }
0x379a   :  { %4306 = vmatmul.mubr.msk.f32.vlgmr.msra.gmra.mrb[24].mxu1 %vm117_vm1, %v2739_v37 }
0x379b   :  { %4577 = vmatpush3.bf16.msra.mxu1 %v5551_v55  ;;  %4327 = vmatprep.mubr.msk.f32.mxu1 %vm5045_vm0, %v5043_v0 }
0x379c   :  { %4578 = vmatprep.subr.bf16.mxu1 %v5044_v1 }
0x379f   :  { %4580 = vmatpush3.bf16.msra.mxu1 %v5555_v18 }
0x37a0   :  { %4587 = vmatprep.subr.bf16.mxu1 %v5044_v1 }
0x37a2   :  { %4328 = vmatmul.mubr.f32.vlgmr.msra.gmra.mrb[26].mxu1 %v5043_v0 }
0x37a3   :  { %4589 = vmatpush3.bf16.msra.mxu1 %v5551_v55  ;;  %4349 = vmatprep.mubr.msk.f32.mxu1 %vm5045_vm0, %v5043_v0 }
0x37a4   :  { %4590 = vmatprep.subr.bf16.mxu1 %v5044_v1 }
0x37a7   :  { %4592 = vmatpush3.bf16.msra.mxu1 %v5555_v18 }
0x37a8   :  { %4599 = vmatprep.subr.bf16.mxu1 %v5044_v1 }
0x386d   :  { %v2808_v60 = vpop.f32.mrb[24].mxu1 }
0x386e   :  { %v2813_v10 = vrot.slane %v2808_v60, 4  ;;  %v4307_v61 = vpop.f32.mrb[25].mxu1 }
0x3870   :  { %v2815_v2 = vadd.f32 %v2813_v10, %v2735_v63 }
0x3872   :  { %4814 = vtanh.f32 %v2815_v2  ;;  %v3877_v9 = vmul.f32 -1.442695, %v2815_v2 }
0x3875   :  { %v3028_v3 = vpop.f32.mrb[26].mxu1 }
0x3876   :  { %v3033_v5 = vrot.slane %v3028_v3, 2  ;;  %v4329_v41 = vpop.f32.mrb[27].mxu1 }
0x3877   :  { %v3168_v41 = vld [vmem:[#allocation3 + $0x18] sm:$0xc] }
0x3878   :  { %v3035_v7 = vadd.f32 %v3033_v5, %v2961_v6 }
0x387a   :  { %4816 = vtanh.f32 %v3035_v7  ;;  %v3880_v50 = vmul.f32 -1.442695, %v3035_v7 }
0x387b   :  { %4818 = vpow2.f32 %v3877_v9 }
0x387c   :  { %v4815_v8 = vpop.eup %4814  ;;  %4820 = vpow2.f32 %v3880_v50 }
0x387d   :  { %2828 = vrot.lane.b32.xlu0 %v4815_v8, %s5046_s3 }
0x3884   :  { %v4817_v59 = vpop.eup %4816 }
0x3885   :  { %3045 = vrot.lane.b32.xlu1 %v4817_v59, %s5046_s3  ;;  %v4819_v12 = vpop.eup %4818 }
0x3886   :  { %v2819_v13 = vadd.f32 1.0, %v4819_v12  ;;  %v4821_v14 = vpop.eup %4820 }
0x3887   :  { %v3039_v15 = vadd.f32 1.0, %v4821_v14 }
0x3888   :  { %4822 = vrcp.f32 %v2819_v13 }
0x3889   :  { %4824 = vrcp.f32 %v3039_v15 }
0x3892   :  { %v4823_v16 = vpop.eup %4822 }
0x3893   :  { %v4825_v45 = vpop.eup %4824  ;;  %v2826_v32 = vmul.f32 %v4823_v16, %v2824_v17 }
0x3894   :  { %v3043_v31 = vmul.f32 0.0, %v4825_v45 }
0x38ef   :  { %v2829_v26 = vpop.permute.xlu0 %2828 }
0x38f0   :  { %v2831_v27 = vmul.f32 %v4823_v16, %v2829_v26 }
0x38f2   :  { %2833 = vrot.lane.b32.xlu0 %v2831_v27, %s5047_s11 }
0x38f7   :  { %v3046_v28 = vpop.permute.xlu1 %3045 }
0x38f8   :  { %v3048_v30 = vmul.f32 %v4825_v45, %v3046_v28 }
0x38fa   :  { %3050 = vrot.lane.b32.xlu1 %v3048_v30, %s5047_s11 }
0x3964   :  { %v2834_v23 = vpop.permute.xlu0 %2833 }
0x3965   :  { %v5574_v29 = vadd.f32 %v2834_v23, %v2826_v32  ;;  %v3276_v32 = vld [vmem:[#allocation3 + $0x18] sm:$0x3] }
0x3967   :  { %4826 = vtanh.f32 %v5574_v29 }
0x396c   :  { %v3051_v24 = vpop.permute.xlu1 %3050 }
0x396d   :  { %v3053_v11 = vadd.f32 %v3051_v24, %v3043_v31 }
0x396f   :  { %4828 = vtanh.f32 %v3053_v11  ;;  %v3149_v53 = vrot.slane %v3053_v11, 2 }
0x3971   :  { %v4827_v22 = vpop.eup %4826 }
0x3972   :  { %2839 = vrot.lane.b32.xlu0 %v4827_v22, %s5046_s3 }
0x3979   :  { %v4829_v25 = vpop.eup %4828 }
0x397a   :  { %3056 = vrot.lane.b32.xlu1 %v4829_v25, %s5046_s3 }
0x39e4   :  { %v2840_v49 = vpop.permute.xlu0 %2839 }
0x39e5   :  { %v2842_v33 = vmul.f32 %v4823_v16, %v2840_v49 }
0x39e7   :  { %v2845_v58 = vrot.slane %v2842_v33, 4 }
0x39e9   :  { %2846 = vrot.lane.b32.xlu0 %v2845_v58, %s5047_s11 }
0x39ec   :  { %v3057_v34 = vpop.permute.xlu1 %3056 }
0x39ed   :  { %v3059_v35 = vmul.f32 %v4825_v45, %v3057_v34 }
0x39ef   :  { %v3062_v36 = vrot.slane %v3059_v35, 6 }
0x39f1   :  { %3063 = vrot.lane.b32.xlu1 %v3062_v36, %s5047_s11 }
0x3a5b   :  { %v2847_v38 = vpop.permute.xlu0 %2846 }
0x3a5c   :  { %4317 = vmatmul.mubr.msk.f32.vlgmr.msra.gmra.mrb[28].mxu0 %vm117_vm1, %v2847_v38 }
0x3a5d   :  { %4583 = vmatpush3.bf16.msra.mxu0 %v5551_v55  ;;  %4338 = vmatprep.mubr.msk.f32.mxu0 %vm5045_vm0, %v5043_v0 }
0x3a5e   :  { %4584 = vmatprep.subr.bf16.mxu0 %v5044_v1 }
0x3a61   :  { %4586 = vmatpush3.bf16.msra.mxu0 %v5555_v18 }
0x3a62   :  { %4593 = vmatprep.subr.bf16.mxu0 %v5044_v1 }
0x3a63   :  { %v3064_v39 = vpop.permute.xlu1 %3063 }
0x3a64   :  { %4339 = vmatmul.mubr.msk.f32.vlgmr.msra.gmra.mrb[30].mxu0 %vm117_vm1, %v3064_v39 }
0x3a65   :  { %4595 = vmatpush3.bf16.msra.mxu0 %v5551_v55  ;;  %4360 = vmatprep.mubr.msk.f32.mxu0 %vm5045_vm0, %v5043_v0 }
0x3a66   :  { %4596 = vmatprep.subr.bf16.mxu0 %v5044_v1 }
0x3a69   :  { %4598 = vmatpush3.bf16.msra.mxu0 %v5555_v18 }
0x3a6a   :  { %4605 = vmatprep.subr.bf16.mxu0 %v5044_v1 }
0x3b2f   :  { %v5595_v40 = vpop.f32.mrb[28].mxu0 }
0x3b30   :  { %v4318_v62 = vpop.f32.mrb[29].mxu0 }
0x3b37   :  { %v3133_v42 = vpop.f32.mrb[30].mxu0 }
0x3b38   :  { %v3138_v20 = vrot.slane %v3133_v42, 4  ;;  %v4340_v43 = vpop.f32.mrb[31].mxu0 }
0x3b3a   :  { %v3140_v4 = vadd.f32 %v3138_v20, %v3060_v44 }
0x3b3c   :  { %4830 = vtanh.f32 %v3140_v4  ;;  %v3882_v46 = vmul.f32 -1.442695, %v3140_v4 }
0x3b3e   :  { %4832 = vpow2.f32 %v3882_v46  ;;  %v3381_v46 = vld [vmem:[#allocation3 + $0x8] sm:$0xc0] }
0x3b46   :  { %v4831_v21 = vpop.eup %4830 }
0x3b47   :  { %3153 = vrot.lane.b32.xlu0 %v4831_v21, %s5046_s3 }
0x3b48   :  { %v4833_v19 = vpop.eup %4832 }
0x3b49   :  { %v3144_v47 = vadd.f32 1.0, %v4833_v19 }
0x3b4b   :  { %4834 = vrcp.f32 %v3144_v47 }
0x3b55   :  { %v4835_v48 = vpop.eup %4834 }
0x3b56   :  { %v3151_v54 = vmul.f32 %v4835_v48, %v3149_v53 }
0x3bb9   :  { %v3154_v51 = vpop.permute.xlu0 %3153 }
0x3bba   :  { %v3156_v52 = vmul.f32 %v4835_v48, %v3154_v51 }
0x3bbc   :  { %3158 = vrot.lane.b32.xlu1 %v3156_v52, %s5047_s11 }
0x3c2e   :  { %v3159_v56 = vpop.permute.xlu1 %3158 }
0x3c2f   :  { %v3161_v57 = vadd.f32 %v3159_v56, %v3151_v54 }
0x3c31   :  { %4836 = vtanh.f32 %v3161_v57  ;;  %v3257_v14 = vrot.slane %v3161_v57, 2 }
0x3c3b   :  { %v4837_v37 = vpop.eup %4836 }
0x3c3c   :  { %3164 = vrot.lane.b32.xlu0 %v4837_v37, %s5046_s3 }
0x3cae   :  { %v3165_v60 = vpop.permute.xlu0 %3164 }
0x3caf   :  { %v3167_v10 = vmul.f32 %v4835_v48, %v3165_v60 }
0x3cb1   :  { %v3170_v61 = vrot.slane %v3167_v10, 4 }
0x3cb3   :  { %3171 = vrot.lane.b32.xlu1 %v3170_v61, %s5047_s11 }
0x3d25   :  { %v3172_v63 = vpop.permute.xlu1 %3171 }
0x3d26   :  { %4350 = vmatmul.mubr.msk.f32.vlgmr.msra.gmra.mrb[28].mxu1 %vm117_vm1, %v3172_v63 }
0x3d27   :  { %4601 = vmatpush3.bf16.msra.mxu1 %v5551_v55  ;;  %4371 = vmatprep.mubr.msk.f32.mxu1 %vm5045_vm0, %v5043_v0 }
0x3d28   :  { %4602 = vmatprep.subr.bf16.mxu1 %v5044_v1 }
0x3d2b   :  { %4604 = vmatpush3.bf16.msra.mxu1 %v5555_v18 }
0x3d2c   :  { %4611 = vmatprep.subr.bf16.mxu1 %v5044_v1 }
0x3df9   :  { %v3241_v2 = vpop.f32.mrb[28].mxu1 }
0x3dfa   :  { %v3246_v3 = vrot.slane %v3241_v2, 6  ;;  %v4351_v5 = vpop.f32.mrb[29].mxu1 }
0x3dfc   :  { %v3248_v6 = vadd.f32 %v3246_v3, %v3168_v41 }
0x3dfe   :  { %4838 = vtanh.f32 %v3248_v6  ;;  %v3884_v8 = vmul.f32 -1.442695, %v3248_v6 }
0x3e00   :  { %4840 = vpow2.f32 %v3884_v8  ;;  %v3488_v8 = vld [vmem:[#allocation3 + $0x8] sm:$0x30] }
0x3e08   :  { %v4839_v7 = vpop.eup %4838 }
0x3e09   :  { %3261 = vrot.lane.b32.xlu0 %v4839_v7, %s5046_s3 }
0x3e0a   :  { %v4841_v59 = vpop.eup %4840 }
0x3e0b   :  { %v3252_v9 = vadd.f32 1.0, %v4841_v59 }
0x3e0d   :  { %4842 = vrcp.f32 %v3252_v9 }
0x3e17   :  { %v4843_v50 = vpop.eup %4842 }
0x3e18   :  { %v3259_v15 = vmul.f32 %v4843_v50, %v3257_v14 }
0x3e7b   :  { %v3262_v12 = vpop.permute.xlu0 %3261 }
0x3e7c   :  { %v3264_v13 = vmul.f32 %v4843_v50, %v3262_v12 }
0x3e7e   :  { %3266 = vrot.lane.b32.xlu1 %v3264_v13, %s5047_s11 }
0x3ef0   :  { %v3267_v16 = vpop.permute.xlu1 %3266 }
0x3ef1   :  { %v3269_v26 = vadd.f32 %v3267_v16, %v3259_v15 }
0x3ef3   :  { %4844 = vtanh.f32 %v3269_v26  ;;  %v3362_v35 = vrot.slane %v3269_v26, 2 }
0x3efd   :  { %v4845_v27 = vpop.eup %4844 }
0x3efe   :  { %3272 = vrot.lane.b32.xlu0 %v4845_v27, %s5046_s3 }
0x3f70   :  { %v3273_v45 = vpop.permute.xlu0 %3272 }
0x3f71   :  { %v3275_v28 = vmul.f32 %v4843_v50, %v3273_v45 }
0x3f73   :  { %v3278_v30 = vrot.slane %v3275_v28, 2 }
0x3f75   :  { %3279 = vrot.lane.b32.xlu1 %v3278_v30, %s5047_s11 }
0x3fe7   :  { %v3280_v17 = vpop.permute.xlu1 %3279 }
0x3fe8   :  { %4361 = vmatmul.mubr.msk.f32.vlgmr.msra.gmra.mrb[32].mxu0 %vm117_vm1, %v3280_v17 }
0x3fe9   :  { %4607 = vmatpush3.bf16.msra.mxu0 %v5551_v55  ;;  %4382 = vmatprep.mubr.msk.f32.mxu0 %vm5045_vm0, %v5043_v0 }
0x3fea   :  { %4608 = vmatprep.subr.bf16.mxu0 %v5044_v1 }
0x3fed   :  { %4610 = vmatpush3.bf16.msra.mxu0 %v5555_v18 }
0x3fee   :  { %4617 = vmatprep.subr.bf16.mxu0 %v5044_v1 }
0x40bb   :  { %v3349_v23 = vpop.f32.mrb[32].mxu0 }
0x40bc   :  { %v3353_v31 = vadd.f32 %v3349_v23, %v3276_v32  ;;  %v4362_v24 = vpop.f32.mrb[33].mxu0 }
0x40be   :  { %4846 = vtanh.f32 %v3353_v31  ;;  %v3886_v22 = vmul.f32 -1.442695, %v3353_v31  ;;  %v3596_v31 = vld [vmem:[#allocation3 + $0x8] sm:$0xc] }
0x40c0   :  { %4848 = vpow2.f32 %v3886_v22 }
0x40c8   :  { %v4847_v11 = vpop.eup %4846 }
0x40c9   :  { %3366 = vrot.lane.b32.xlu0 %v4847_v11, %s5046_s3 }
0x40ca   :  { %v4849_v25 = vpop.eup %4848 }
0x40cb   :  { %v3357_v49 = vadd.f32 1.0, %v4849_v25 }
0x40cd   :  { %4850 = vrcp.f32 %v3357_v49 }
0x40d7   :  { %v4851_v33 = vpop.eup %4850 }
0x40d8   :  { %v3364_v36 = vmul.f32 %v4851_v33, %v3362_v35 }
0x413b   :  { %v3367_v58 = vpop.permute.xlu0 %3366 }
0x413c   :  { %v3369_v34 = vmul.f32 %v4851_v33, %v3367_v58 }
0x413e   :  { %3371 = vrot.lane.b32.xlu1 %v3369_v34, %s5047_s11 }
0x41b0   :  { %v3372_v38 = vpop.permute.xlu1 %3371 }
0x41b1   :  { %v3374_v39 = vadd.f32 %v3372_v38, %v3364_v36  ;;  %v2921_v36 = vrot.slane %v5595_v40, 2 }
0x41b3   :  { %4852 = vtanh.f32 %v3374_v39  ;;  %v3469_v57 = vrot.slane %v3374_v39, 2 }
0x41bd   :  { %v4853_v62 = vpop.eup %4852 }
0x41be   :  { %3377 = vrot.lane.b32.xlu0 %v4853_v62, %s5046_s3 }
0x4230   :  { %v3378_v42 = vpop.permute.xlu0 %3377 }
0x4231   :  { %v3380_v20 = vmul.f32 %v4851_v33, %v3378_v42  ;;  %v2843_v42 = vld [vmem:[#allocation3 + $0x10] sm:$0xc0] }
0x4233   :  { %3383 = vrot.lane.b32.xlu1 %v3380_v20, %s5047_s11  ;;  %v2923_v20 = vadd.f32 %v2921_v36, %v2843_v42 }
0x42a5   :  { %v3384_v43 = vpop.permute.xlu1 %3383 }
0x42a6   :  { %4372 = vmatmul.mubr.msk.f32.vlgmr.msra.gmra.mrb[30].mxu1 %vm117_vm1, %v3384_v43 }
0x42a7   :  { %4613 = vmatpush3.bf16.msra.mxu1 %v5551_v55  ;;  %4393 = vmatprep.mubr.msk.f32.mxu1 %vm5045_vm0, %v5043_v0 }
0x42a8   :  { %4614 = vmatprep.subr.bf16.mxu1 %v5044_v1 }
0x42ab   :  { %4616 = vmatpush3.bf16.msra.mxu1 %v5555_v18 }
0x4379   :  { %v3453_v44 = vpop.f32.mrb[30].mxu1 }
0x437a   :  { %v3458_v4 = vrot.slane %v3453_v44, 2  ;;  %v4373_v21 = vpop.f32.mrb[31].mxu1 }
0x437c   :  { %v3460_v19 = vadd.f32 %v3458_v4, %v3381_v46  ;;  %v3879_v4 = vmul.f32 -1.442695, %v2923_v20 }
0x437e   :  { %4854 = vtanh.f32 %v3460_v19  ;;  %v3888_v48 = vmul.f32 -1.442695, %v3460_v19 }
0x4380   :  { %4856 = vpow2.f32 %v3888_v48 }
0x4388   :  { %v4855_v47 = vpop.eup %4854 }
0x4389   :  { %3473 = vrot.lane.b32.xlu0 %v4855_v47, %s5046_s3 }
0x438a   :  { %v4857_v51 = vpop.eup %4856 }
0x438b   :  { %v3464_v52 = vadd.f32 1.0, %v4857_v51 }
0x438d   :  { %4858 = vrcp.f32 %v3464_v52 }
0x4397   :  { %v4859_v53 = vpop.eup %4858 }
0x4398   :  { %v3471_v37 = vmul.f32 %v4859_v53, %v3469_v57 }
0x43fb   :  { %v3474_v54 = vpop.permute.xlu0 %3473 }
0x43fc   :  { %v3476_v56 = vmul.f32 %v4859_v53, %v3474_v54 }
0x43fe   :  { %3478 = vrot.lane.b32.xlu1 %v3476_v56, %s5047_s11 }
0x4470   :  { %v3479_v60 = vpop.permute.xlu1 %3478 }
0x4471   :  { %v3481_v10 = vadd.f32 %v3479_v60, %v3471_v37 }
0x4473   :  { %4860 = vtanh.f32 %v3481_v10 }
0x447d   :  { %v4861_v61 = vpop.eup %4860 }
0x447e   :  { %3484 = vrot.lane.b32.xlu0 %v4861_v61, %s5046_s3 }
0x44f0   :  { %v3485_v63 = vpop.permute.xlu0 %3484 }
0x44f1   :  { %v3487_v2 = vmul.f32 %v4859_v53, %v3485_v63  ;;  %v2932_v53 = vrot.slane %v5574_v29, 6  ;;  %v3704_v63 = vld [vmem:[#allocation3 + $0x8] sm:$0x3] }
0x44f3   :  { %v3490_v3 = vrot.slane %v3487_v2, 6 }
0x44f5   :  { %3491 = vrot.lane.b32.xlu1 %v3490_v3, %s5047_s11 }
0x4567   :  { %v3492_v5 = vpop.permute.xlu1 %3491 }
0x4568   :  { %4383 = vmatmul.mubr.msk.f32.vlgmr.msra.gmra.mrb[34].mxu0 %vm117_vm1, %v3492_v5 }
0x4569   :  { %4619 = vmatpush3.bf16.msra.mxu0 %v5551_v55  ;;  %4404 = vmatprep.mubr.msk.f32.mxu0 %vm5045_vm0, %v5043_v0 }
0x456a   :  { %4620 = vmatprep.subr.bf16.mxu0 %v5044_v1  ;;  %v3577_v1 = vrot.slane %v3481_v10, 2 }
0x456d   :  { %4622 = vmatpush3.bf16.msra.mxu0 %v5555_v18 }
0x463b   :  { %v3561_v41 = vpop.f32.mrb[34].mxu0 }
0x463c   :  { %v3566_v6 = vrot.slane %v3561_v41, 4  ;;  %v4384_v7 = vpop.f32.mrb[35].mxu0 }
0x463e   :  { %v3568_v59 = vadd.f32 %v3566_v6, %v3488_v8 }
0x4640   :  { %4862 = vtanh.f32 %v3568_v59  ;;  %v3890_v50 = vmul.f32 -1.442695, %v3568_v59 }
0x4642   :  { %4864 = vpow2.f32 %v3890_v50 }
0x464a   :  { %v4863_v9 = vpop.eup %4862 }
0x464b   :  { %3581 = vrot.lane.b32.xlu0 %v4863_v9, %s5046_s3 }
0x464c   :  { %v4865_v12 = vpop.eup %4864 }
0x464d   :  { %v3572_v55 = vadd.f32 1.0, %v4865_v12 }
0x464f   :  { %4866 = vrcp.f32 %v3572_v55 }
0x4659   :  { %v4867_v13 = vpop.eup %4866 }
0x465a   :  { %v3579_v18 = vmul.f32 %v4867_v13, %v3577_v1 }
0x46bd   :  { %v3582_v0 = vpop.permute.xlu0 %3581 }
0x46be   :  { %v3584_v14 = vmul.f32 %v4867_v13, %v3582_v0 }
0x46c0   :  { %3586 = vrot.lane.b32.xlu1 %v3584_v14, %s5047_s11 }
0x4732   :  { %v3587_v15 = vpop.permute.xlu1 %3586 }
0x4733   :  { %v3589_v16 = vadd.f32 %v3587_v15, %v3579_v18 }
0x4735   :  { %4868 = vtanh.f32 %v3589_v16  ;;  %v3685_v35 = vrot.slane %v3589_v16, 2 }
0x473f   :  { %v4869_v26 = vpop.eup %4868 }
0x4740   :  { %3592 = vrot.lane.b32.xlu0 %v4869_v26, %s5046_s3 }
0x47b2   :  { %v3593_v27 = vpop.permute.xlu0 %3592 }
0x47b3   :  { %v3595_v45 = vmul.f32 %v4867_v13, %v3593_v27 }
0x47b5   :  { %v3598_v28 = vrot.slane %v3595_v45, 4 }
0x47b7   :  { %3599 = vrot.lane.b32.xlu1 %v3598_v28, %s5047_s11 }
0x4829   :  { %v3600_v30 = vpop.permute.xlu1 %3599 }
0x482a   :  { %4394 = vmatmul.mubr.msk.f32.vlgmr.msra.gmra.mrb[32].mxu1 %vm117_vm1, %v3600_v30 }
0x48fd   :  { %v3669_v17 = vpop.f32.mrb[32].mxu1 }
0x48fe   :  { %v3674_v32 = vrot.slane %v3669_v17, 6  ;;  %v4395_v23 = vpop.f32.mrb[33].mxu1 }
0x4900   :  { %v3676_v24 = vadd.f32 %v3674_v32, %v3596_v31 }
0x4902   :  { %4870 = vtanh.f32 %v3676_v24  ;;  %v3892_v22 = vmul.f32 -1.442695, %v3676_v24 }
0x4904   :  { %4872 = vpow2.f32 %v3892_v22 }
0x490c   :  { %v4871_v11 = vpop.eup %4870 }
0x490d   :  { %3689 = vrot.lane.b32.xlu0 %v4871_v11, %s5046_s3 }
0x490e   :  { %v4873_v25 = vpop.eup %4872 }
0x490f   :  { %v3680_v49 = vadd.f32 1.0, %v4873_v25 }
0x4911   :  { %4874 = vrcp.f32 %v3680_v49 }
0x491b   :  { %v4875_v33 = vpop.eup %4874 }
0x491c   :  { %v3687_v38 = vmul.f32 %v4875_v33, %v3685_v35 }
0x497f   :  { %v3690_v58 = vpop.permute.xlu0 %3689 }
0x4980   :  { %v3692_v34 = vmul.f32 %v4875_v33, %v3690_v58 }
0x4982   :  { %3694 = vrot.lane.b32.xlu1 %v3692_v34, %s5047_s11 }
0x49f4   :  { %v3695_v39 = vpop.permute.xlu1 %3694 }
0x49f5   :  { %v3697_v62 = vadd.f32 %v3695_v39, %v3687_v38 }
0x49f7   :  { %4876 = vtanh.f32 %v3697_v62  ;;  %v3790_v12 = vrot.slane %v3697_v62, 2 }
0x49f8   :  { %4878 = vtanh.f32 %v2923_v20 }
0x49f9   :  { %4880 = vpow2.f32 %v3879_v4 }
0x4a01   :  { %v4877_v43 = vpop.eup %4876 }
0x4a02   :  { %3700 = vrot.lane.b32.xlu0 %v4877_v43, %s5046_s3  ;;  %v4879_v44 = vpop.eup %4878 }
0x4a03   :  { %v4881_v21 = vpop.eup %4880 }
0x4a04   :  { %v2927_v46 = vadd.f32 1.0, %v4881_v21 }
0x4a06   :  { %2936 = vrot.lane.b32.xlu0 %v4879_v44, %s5046_s3  ;;  %4882 = vrcp.f32 %v2927_v46 }
0x4a10   :  { %v4883_v48 = vpop.eup %4882 }
0x4a11   :  { %v2934_v56 = vmul.f32 %v4883_v48, %v2932_v53 }
0x4a74   :  { %v3701_v19 = vpop.permute.xlu0 %3700 }
0x4a75   :  { %v3703_v40 = vmul.f32 %v4875_v33, %v3701_v19 }
0x4a77   :  { %v3706_v47 = vrot.slane %v3703_v40, 2 }
0x4a78   :  { %v2937_v51 = vpop.permute.xlu0 %2936 }
0x4a79   :  { %v2939_v52 = vmul.f32 %v4883_v48, %v2937_v51  ;;  %3707 = vrot.lane.b32.xlu1 %v3706_v47, %s5047_s11 }
0x4a7b   :  { %2941 = vrot.lane.b32.xlu0 %v2939_v52, %s5047_s11 }
0x4aeb   :  { %v3708_v54 = vpop.permute.xlu1 %3707 }
0x4aec   :  { %4405 = vmatmul.mubr.msk.f32.vlgmr.msra.gmra.mrb[36].mxu0 %vm117_vm1, %v3708_v54 }
0x4aed   :  { %v2942_v57 = vpop.permute.xlu0 %2941 }
0x4aee   :  { %v2944_v37 = vadd.f32 %v2942_v57, %v2934_v56 }
0x4af0   :  { %4884 = vtanh.f32 %v2944_v37 }
0x4afa   :  { %v4885_v60 = vpop.eup %4884 }
0x4afb   :  { %2947 = vrot.lane.b32.xlu0 %v4885_v60, %s5046_s3 }
0x4b6d   :  { %v2948_v10 = vpop.permute.xlu0 %2947 }
0x4b6e   :  { %v2950_v61 = vmul.f32 %v4883_v48, %v2948_v10 }
0x4b70   :  { %2952 = vrot.lane.b32.xlu0 %v2950_v61, %s5047_s11 }
0x4bbf   :  { %v3777_v2 = vpop.f32.mrb[36].mxu0 }
0x4bc0   :  { %v3781_v3 = vadd.f32 %v3777_v2, %v3704_v63  ;;  %v4406_v5 = vpop.f32.mrb[37].mxu0 }
0x4bc2   :  { %4886 = vtanh.f32 %v3781_v3  ;;  %v3894_v6 = vmul.f32 -1.442695, %v3781_v3 }
0x4bc4   :  { %4888 = vpow2.f32 %v3894_v6 }
0x4bcc   :  { %v4887_v29 = vpop.eup %4886 }
0x4bcd   :  { %3794 = vrot.lane.b32.xlu1 %v4887_v29, %s5046_s3 }
0x4bce   :  { %v4889_v7 = vpop.eup %4888 }
0x4bcf   :  { %v3785_v8 = vadd.f32 1.0, %v4889_v7 }
0x4bd1   :  { %4890 = vrcp.f32 %v3785_v8 }
0x4bdb   :  { %v4891_v59 = vpop.eup %4890 }
0x4bdc   :  { %v3792_v55 = vmul.f32 %v4891_v59, %v3790_v12 }
0x4be2   :  { %v2953_v41 = vpop.permute.xlu0 %2952 }
0x4be3   :  { %2955 = vst.msk [vmem:[#allocation13 - $0x6] sm:$0xc0] %vm648_vm4, %v2953_v41 }
0x4c3f   :  { %v3795_v9 = vpop.permute.xlu1 %3794 }
0x4c40   :  { %v3797_v50 = vmul.f32 %v4891_v59, %v3795_v9 }
0x4c42   :  { %3799 = vrot.lane.b32.xlu1 %v3797_v50, %s5047_s11 }
0x4cb4   :  { %v3800_v13 = vpop.permute.xlu1 %3799 }
0x4cb5   :  { %v3802_v0 = vadd.f32 %v3800_v13, %v3792_v55 }
0x4cb7   :  { %4892 = vtanh.f32 %v3802_v0 }
0x4cc1   :  { %v4893_v14 = vpop.eup %4892 }
0x4cc2   :  { %3805 = vrot.lane.b32.xlu1 %v4893_v14, %s5046_s3 }
0x4d34   :  { %v3806_v1 = vpop.permute.xlu1 %3805 }
0x4d35   :  { %v3808_v18 = vmul.f32 %v4891_v59, %v3806_v1 }
0x4d37   :  { %3810 = vrot.lane.b32.xlu1 %v3808_v18, %s5046_s3 }
0x4da9   :  { %v3811_v15 = vpop.permute.xlu1 %3810 }
0x4daa   :  { %3813 = vst.msk [vmem:[#allocation13] sm:$0x3] %vm1536_vm9, %v3811_v15 }
0x4dab   :  { %5015 = shalt.err (!%p5012_p2)
}
0x4dac   :  { %s5016_s22 = scalar_lea.hbm %s5680_s7, 32 }
0x4dad   :  { %p5017_p3 = scmp.ne.s32.totalorder %s5680_s7, %s5016_s22  ;;  %p5020_p4 = scmp.lt.u32.totalorder %s5016_s22, %s5680_s7 }
0x4daf   :  { %p5022_p5 = pnand %p5020_p4, %p5017_p3 }
0x4db1   :  { %5025 = shalt.err (!%p5022_p5)
}
0x4db2   :  { %3823 = dma.vmem_to_hbm [thread:$0]  %s3821_s17, 32, %s5680_s7, [#allocation6]  }
0x4db3   :  { %5032 = dma.done.wait [#allocation6], 32  }
0x4db4   :  { %5033 = vsyncadd [#allocation6], 4294967264 }
0x4db5   :  { %3827 = vsyncpa [#allocation5], 1 }
0x4db6   :  { %3828 = vsyncpa [#allocation8], 1 }
0x4db7   :  { %3829 = vsyncpa [#allocation11], 1 }
0x4db8   :  { %3830 = vsyncpa [#allocation6], 1 }

</bundles_post_ra>
